<compile_context>
chip_gen: v7x
topology: tpu7x:2x2x1
jax: 0.10.0
libtpu: 0.0.40
codegen_flags: <defaults>
</compile_context>

<pallas_src>
import jax
import jax.numpy as jnp
from jax.experimental import pallas as pl
from jax.experimental.pallas import tpu as pltpu

EPS = 1e-5
N_CHANNELS = 1  # organmnist3d is single-channel


# ----------------------------------------------------------------------------- kernel

def _fused_block_kernel(pt_ref, wt_ref, g_ref, b_ref, o_ref):
    """Fused Conv3d(as matmul) + BatchNorm(batch stats) + ReLU + 2x2x2 max-pool.

    pt_ref : (K, M)   im2col patches, transposed; column order m = l*P + p where
                      l in [0,8) is the (dd,dh,dw) pool-local offset and
                      p in [0,P) is the pooled output voxel (n,do,ho,wo).
    wt_ref : (Cout, K) transposed conv weights.
    g_ref  : (Cout, 1) BN gamma.
    b_ref  : (Cout, 1) BN beta.
    o_ref  : (Cout, P) pooled output (lane-dense).
    """
    # Conv as a single MXU matmul, output kept lane-dense: (Cout, M).
    yT = jnp.dot(wt_ref[...], pt_ref[...], preferred_element_type=jnp.float32)
    m_total = yT.shape[1]

    # Training-mode BN statistics over all M conv-output voxels (biased variance).
    s = jnp.sum(yT, axis=1, keepdims=True)          # (Cout, 1)
    ss = jnp.sum(yT * yT, axis=1, keepdims=True)    # (Cout, 1)
    mean = s / m_total
    var = ss / m_total - mean * mean
    scale = g_ref[...] * jax.lax.rsqrt(var + EPS)   # (Cout, 1)
    shift = b_ref[...] - mean * scale

    # BN + ReLU (broadcast (Cout,1) along the lane axis).
    z = jnp.maximum(yT * scale + shift, 0.0)        # (Cout, M)

    # 2x2x2 max-pool: the 8 window members are 8 contiguous 128-aligned lane slabs.
    p_total = o_ref.shape[1]
    pooled = z[:, 0:p_total]
    for l in range(1, 8):
        pooled = jnp.maximum(pooled, z[:, l * p_total:(l + 1) * p_total])
    o_ref[...] = pooled


# ----------------------------------------------------------------------------- pallas wrapper

def _fused_block_call(patchesT, wT, gamma, beta, P):
    K, M = patchesT.shape
    Cout = wT.shape[0]
    return pl.pallas_call(
        _fused_block_kernel,
        out_shape=jax.ShapeDtypeStruct((Cout, P), jnp.float32),
        grid_spec=pltpu.PrefetchScalarGridSpec(
            num_scalar_prefetch=0,
            grid=(1,),
            in_specs=[
                pl.BlockSpec((K, M), lambda i: (0, 0)),
                pl.BlockSpec((Cout, K), lambda i: (0, 0)),
                pl.BlockSpec((Cout, 1), lambda i: (0, 0)),
                pl.BlockSpec((Cout, 1), lambda i: (0, 0)),
            ],
            out_specs=pl.BlockSpec((Cout, P), lambda i: (0, 0)),
        ),
        compiler_params=pltpu.CompilerParams(dimension_semantics=("arbitrary",)),
    )(patchesT, wT, gamma, beta)


# ----------------------------------------------------------------------------- glue

def _round_up(x, m):
    return (x + m - 1) // m * m


def conv_bn_relu_pool(x, w, gamma, beta):
    """One block: Conv3d(k=3,p=1) -> BatchNorm3d(batch stats) -> ReLU -> MaxPool3d(2).

    x: (N, D, H, W, Cin) channels-last  ->  (N, D/2, H/2, W/2, Cout) channels-last.
    """
    N, D, H, W, Cin = x.shape
    Cout = w.shape[-1]
    Do, Ho, Wo = D // 2, H // 2, W // 2
    P = N * Do * Ho * Wo
    K = 27 * Cin

    # im2col, transposed and with pool-window-major column order (cheap XLA glue).
    xp = jnp.pad(x, ((0, 0), (1, 1), (1, 1), (1, 1), (0, 0)))
    cols = [xp[:, kd:kd + D, kh:kh + H, kw:kw + W, :]
            for kd in range(3) for kh in range(3) for kw in range(3)]
    pat = jnp.concatenate(cols, axis=-1)                 # (N, D, H, W, 27*Cin)
    pat = pat.reshape(N, Do, 2, Ho, 2, Wo, 2, K)
    pat = pat.transpose(7, 2, 4, 6, 0, 1, 3, 5)          # (K, dd, dh, dw, N, Do, Ho, Wo)
    patchesT = pat.reshape(K, 8 * P)                     # column m = l*P + p

    wT = w.reshape(K, Cout).T                            # (Cout, K)

    # Zero-pad the contraction dim to a multiple of 8 (identical math, clean MXU tiles).
    Kp = _round_up(K, 8)
    if Kp != K:
        patchesT = jnp.pad(patchesT, ((0, Kp - K), (0, 0)))
        wT = jnp.pad(wT, ((0, 0), (0, Kp - K)))

    out = _fused_block_call(patchesT, wT,
                            gamma.reshape(Cout, 1), beta.reshape(Cout, 1), P)
    # (Cout, P) -> (N, Do, Ho, Wo, Cout)
    return out.reshape(Cout, N, Do, Ho, Wo).transpose(1, 2, 3, 4, 0)


def simple_3d_conv_forward(x_ncdhw, params):
    # NCDHW (PyTorch) -> NDHWC (kernel layout)
    x = jnp.transpose(x_ncdhw, (0, 2, 3, 4, 1)).astype(jnp.float32)
    # Conv bias is omitted in the kernel path: it cancels exactly under training-mode BN.
    x = conv_bn_relu_pool(x, params["w1"], params["g1"], params["bt1"])
    x = conv_bn_relu_pool(x, params["w2"], params["g2"], params["bt2"])
    # NDHWC -> NCDHW to match PyTorch output convention
    return jnp.transpose(x, (0, 4, 1, 2, 3))


# ----------------------------------------------------------------------------- reference & params

def reference_forward(x_ncdhw, params):
    """Pure-JAX reference (includes the conv bias, which must cancel under training BN)."""
    def block(x, w, b, g, bt):
        y = jax.lax.conv_general_dilated(
            x, w, window_strides=(1, 1, 1),
            padding=((1, 1), (1, 1), (1, 1)),
            dimension_numbers=("NDHWC", "DHWIO", "NDHWC"))
        y = y + b
        mean = jnp.mean(y, axis=(0, 1, 2, 3))
        var = jnp.mean(jnp.square(y - mean), axis=(0, 1, 2, 3))
        y = (y - mean) * jax.lax.rsqrt(var + EPS) * g + bt
        y = jnp.maximum(y, 0.0)
        n, d, h, wdim, c = y.shape
        y = y.reshape(n, d // 2, 2, h // 2, 2, wdim // 2, 2, c).max(axis=(2, 4, 6))
        return y

    x = jnp.transpose(x_ncdhw, (0, 2, 3, 4, 1)).astype(jnp.float32)
    x = block(x, params["w1"], params["b1"], params["g1"], params["bt1"])
    x = block(x, params["w2"], params["b2"], params["g2"], params["bt2"])
    return jnp.transpose(x, (0, 4, 1, 2, 3))


def init_params(key, in_ch=N_CHANNELS, mid_ch=16, out_ch=32):
    ks = jax.random.split(key, 8)

    def conv_w(k, cin, cout):
        bound = 1.0 / jnp.sqrt(cin * 27.0)
        return jax.random.uniform(k, (3, 3, 3, cin, cout), jnp.float32, -bound, bound)

    def conv_b(k, cin, cout):
        bound = 1.0 / jnp.sqrt(cin * 27.0)
        return jax.random.uniform(k, (cout,), jnp.float32, -bound, bound)

    return {
        "w1": conv_w(ks[0], in_ch, mid_ch),
        "b1": conv_b(ks[1], in_ch, mid_ch),
        "g1": 1.0 + 0.1 * jax.random.normal(ks[2], (mid_ch,), jnp.float32),
        "bt1": 0.1 * jax.random.normal(ks[3], (mid_ch,), jnp.float32),
        "w2": conv_w(ks[4], mid_ch, out_ch),
        "b2": conv_b(ks[5], mid_ch, out_ch),
        "g2": 1.0 + 0.1 * jax.random.normal(ks[6], (out_ch,), jnp.float32),
        "bt2": 0.1 * jax.random.normal(ks[7], (out_ch,), jnp.float32),
    }


if __name__ == "__main__":
    key = jax.random.PRNGKey(0)
    kx, kp = jax.random.split(key)

    # organmnist3d-like: single channel, 16^3 volume, batch 2 (NCDHW)
    x = jax.random.normal(kx, (2, N_CHANNELS, 16, 16, 16), dtype=jnp.float32)
    params = init_params(kp)

    out = jax.jit(simple_3d_conv_forward)(x, params)
    jax.block_until_ready(out)
    assert out.shape == (2, 32, 4, 4, 4), out.shape
    assert bool(jnp.all(jnp.isfinite(out)))

    ref = jax.jit(reference_forward)(x, params)
    jax.block_until_ready(ref)
    assert jnp.allclose(out, ref, rtol=1e-3, atol=1e-3), float(jnp.max(jnp.abs(out - ref)))

    print("KERNEL_OK")
</pallas_src>

<mosaic_0001>
module attributes {stable_mosaic.version = 11 : i64} {
  func.func @_fused_block_kernel(%arg0: i32, %arg1: memref<32x8192xf32, #tpu.memory_space<vmem>>, %arg2: memref<16x32xf32, #tpu.memory_space<vmem>>, %arg3: memref<16x1xf32, #tpu.memory_space<vmem>>, %arg4: memref<16x1xf32, #tpu.memory_space<vmem>>, %arg5: memref<16x1024xf32, #tpu.memory_space<vmem>>) attributes {dimension_semantics = [#tpu.dimension_semantics<arbitrary>], iteration_bounds = array<i64: 1>, scalar_prefetch = 0 : i64, scratch_operands = 0 : i64, tpu.core_type = #tpu.core_type<tc>, window_params = [{pipeline_mode = #tpu.pipeline_mode<synchronous>, transform_indices = @transform_0, window_bounds = array<i64: 32, 8192>}, {pipeline_mode = #tpu.pipeline_mode<synchronous>, transform_indices = @transform_1, window_bounds = array<i64: 16, 32>}, {pipeline_mode = #tpu.pipeline_mode<synchronous>, transform_indices = @transform_2, window_bounds = array<i64: 16, 1>}, {pipeline_mode = #tpu.pipeline_mode<synchronous>, transform_indices = @transform_3, window_bounds = array<i64: 16, 1>}, {pipeline_mode = #tpu.pipeline_mode<synchronous>, transform_indices = @transform_4, window_bounds = array<i64: 16, 1024>}]} {
    %c0 = arith.constant 0 : index
    %c0_0 = arith.constant 0 : index
    %0 = vector.load %arg2[%c0, %c0_0] : memref<16x32xf32, #tpu.memory_space<vmem>>, vector<16x32xf32>
    %c0_1 = arith.constant 0 : index
    %c0_2 = arith.constant 0 : index
    %1 = vector.load %arg1[%c0_1, %c0_2] : memref<32x8192xf32, #tpu.memory_space<vmem>>, vector<32x8192xf32>
    %cst = arith.constant dense<0.000000e+00> : vector<16x8192xf32>
    %2 = tpu.matmul %0, %1, %cst {dimension_numbers = #tpu.dot_dimension_numbers<[1], [0], [0], [1], [0, 0, 1, 1], [], []>} : vector<16x32xf32>, vector<32x8192xf32>, vector<16x8192xf32> -> vector<16x8192xf32>
    %cst_3 = arith.constant dense<0.000000e+00> : vector<16xf32>
    %3 = vector.multi_reduction <add>, %2, %cst_3 [1] : vector<16x8192xf32> to vector<16xf32>
    %4 = vector.shape_cast %3 : vector<16xf32> to vector<16x1xf32>
    %5 = arith.mulf %2, %2 : vector<16x8192xf32>
    %cst_4 = arith.constant dense<0.000000e+00> : vector<16xf32>
    %6 = vector.multi_reduction <add>, %5, %cst_4 [1] : vector<16x8192xf32> to vector<16xf32>
    %7 = vector.shape_cast %6 : vector<16xf32> to vector<16x1xf32>
    %cst_5 = arith.constant 8.192000e+03 : f32
    %8 = vector.broadcast %cst_5 : f32 to vector<16x1xf32>
    %9 = arith.divf %4, %8 : vector<16x1xf32>
    %cst_6 = arith.constant 8.192000e+03 : f32
    %10 = vector.broadcast %cst_6 : f32 to vector<16x1xf32>
    %11 = arith.divf %7, %10 : vector<16x1xf32>
    %12 = arith.mulf %9, %9 : vector<16x1xf32>
    %13 = arith.subf %11, %12 : vector<16x1xf32>
    %c0_7 = arith.constant 0 : index
    %c0_8 = arith.constant 0 : index
    %14 = vector.load %arg3[%c0_7, %c0_8] : memref<16x1xf32, #tpu.memory_space<vmem>>, vector<16x1xf32>
    %cst_9 = arith.constant 9.99999974E-6 : f32
    %15 = vector.broadcast %cst_9 : f32 to vector<16x1xf32>
    %16 = arith.addf %13, %15 : vector<16x1xf32>
    %17 = math.rsqrt %16 : vector<16x1xf32>
    %18 = arith.mulf %14, %17 : vector<16x1xf32>
    %c0_10 = arith.constant 0 : index
    %c0_11 = arith.constant 0 : index
    %19 = vector.load %arg4[%c0_10, %c0_11] : memref<16x1xf32, #tpu.memory_space<vmem>>, vector<16x1xf32>
    %20 = arith.mulf %9, %18 : vector<16x1xf32>
    %21 = arith.subf %19, %20 : vector<16x1xf32>
    %22 = vector.broadcast %18 : vector<16x1xf32> to vector<16x8192xf32>
    %23 = arith.mulf %2, %22 : vector<16x8192xf32>
    %24 = vector.broadcast %21 : vector<16x1xf32> to vector<16x8192xf32>
    %25 = arith.addf %23, %24 : vector<16x8192xf32>
    %cst_12 = arith.constant 0.000000e+00 : f32
    %26 = vector.broadcast %cst_12 : f32 to vector<16x8192xf32>
    %27 = arith.maximumf %25, %26 : vector<16x8192xf32>
    %28 = vector.extract_strided_slice %27 {offsets = [0, 0], sizes = [16, 1024], strides = [1, 1]} : vector<16x8192xf32> to vector<16x1024xf32>
    %29 = vector.extract_strided_slice %27 {offsets = [0, 1024], sizes = [16, 1024], strides = [1, 1]} : vector<16x8192xf32> to vector<16x1024xf32>
    %30 = arith.maximumf %28, %29 : vector<16x1024xf32>
    %31 = vector.extract_strided_slice %27 {offsets = [0, 2048], sizes = [16, 1024], strides = [1, 1]} : vector<16x8192xf32> to vector<16x1024xf32>
    %32 = arith.maximumf %30, %31 : vector<16x1024xf32>
    %33 = vector.extract_strided_slice %27 {offsets = [0, 3072], sizes = [16, 1024], strides = [1, 1]} : vector<16x8192xf32> to vector<16x1024xf32>
    %34 = arith.maximumf %32, %33 : vector<16x1024xf32>
    %35 = vector.extract_strided_slice %27 {offsets = [0, 4096], sizes = [16, 1024], strides = [1, 1]} : vector<16x8192xf32> to vector<16x1024xf32>
    %36 = arith.maximumf %34, %35 : vector<16x1024xf32>
    %37 = vector.extract_strided_slice %27 {offsets = [0, 5120], sizes = [16, 1024], strides = [1, 1]} : vector<16x8192xf32> to vector<16x1024xf32>
    %38 = arith.maximumf %36, %37 : vector<16x1024xf32>
    %39 = vector.extract_strided_slice %27 {offsets = [0, 6144], sizes = [16, 1024], strides = [1, 1]} : vector<16x8192xf32> to vector<16x1024xf32>
    %40 = arith.maximumf %38, %39 : vector<16x1024xf32>
    %41 = vector.extract_strided_slice %27 {offsets = [0, 7168], sizes = [16, 1024], strides = [1, 1]} : vector<16x8192xf32> to vector<16x1024xf32>
    %42 = arith.maximumf %40, %41 : vector<16x1024xf32>
    %c0_13 = arith.constant 0 : index
    %c0_14 = arith.constant 0 : index
    %43 = vector.load %arg5[%c0_13, %c0_14] : memref<16x1024xf32, #tpu.memory_space<vmem>>, vector<16x1024xf32>
    tpu.vector_store %arg5[%c0_13, %c0_14], %42 {strides = array<i32>} : memref<16x1024xf32, #tpu.memory_space<vmem>>, vector<16x1024xf32>,
    return
  }
  func.func @transform_0(%arg0: i32) -> (i32, i32) {
    %c0_i32 = arith.constant 0 : i32
    %c0_i32_0 = arith.constant 0 : i32
    %c0_i32_1 = arith.constant 0 : i32
    return %c0_i32, %c0_i32_0 : i32, i32
  }
  func.func @transform_1(%arg0: i32) -> (i32, i32) {
    %c0_i32 = arith.constant 0 : i32
    %c0_i32_0 = arith.constant 0 : i32
    %c0_i32_1 = arith.constant 0 : i32
    return %c0_i32, %c0_i32_0 : i32, i32
  }
  func.func @transform_2(%arg0: i32) -> (i32, i32) {
    %c0_i32 = arith.constant 0 : i32
    %c0_i32_0 = arith.constant 0 : i32
    %c0_i32_1 = arith.constant 0 : i32
    return %c0_i32, %c0_i32_0 : i32, i32
  }
  func.func @transform_3(%arg0: i32) -> (i32, i32) {
    %c0_i32 = arith.constant 0 : i32
    %c0_i32_0 = arith.constant 0 : i32
    %c0_i32_1 = arith.constant 0 : i32
    return %c0_i32, %c0_i32_0 : i32, i32
  }
  func.func @transform_4(%arg0: i32) -> (i32, i32) {
    %c0_i32 = arith.constant 0 : i32
    %c0_i32_0 = arith.constant 0 : i32
    %c0_i32_1 = arith.constant 0 : i32
    return %c0_i32, %c0_i32_0 : i32, i32
  }
}

module attributes {stable_mosaic.version = 11 : i64} {
  func.func @_fused_block_kernel(%arg0: i32, %arg1: memref<432x1024xf32, #tpu.memory_space<vmem>>, %arg2: memref<32x432xf32, #tpu.memory_space<vmem>>, %arg3: memref<32x1xf32, #tpu.memory_space<vmem>>, %arg4: memref<32x1xf32, #tpu.memory_space<vmem>>, %arg5: memref<32x128xf32, #tpu.memory_space<vmem>>) attributes {dimension_semantics = [#tpu.dimension_semantics<arbitrary>], iteration_bounds = array<i64: 1>, scalar_prefetch = 0 : i64, scratch_operands = 0 : i64, tpu.core_type = #tpu.core_type<tc>, window_params = [{pipeline_mode = #tpu.pipeline_mode<synchronous>, transform_indices = @transform_0, window_bounds = array<i64: 432, 1024>}, {pipeline_mode = #tpu.pipeline_mode<synchronous>, transform_indices = @transform_1, window_bounds = array<i64: 32, 432>}, {pipeline_mode = #tpu.pipeline_mode<synchronous>, transform_indices = @transform_2, window_bounds = array<i64: 32, 1>}, {pipeline_mode = #tpu.pipeline_mode<synchronous>, transform_indices = @transform_3, window_bounds = array<i64: 32, 1>}, {pipeline_mode = #tpu.pipeline_mode<synchronous>, transform_indices = @transform_4, window_bounds = array<i64: 32, 128>}]} {
    %c0 = arith.constant 0 : index
    %c0_0 = arith.constant 0 : index
    %0 = vector.load %arg2[%c0, %c0_0] : memref<32x432xf32, #tpu.memory_space<vmem>>, vector<32x432xf32>
    %c0_1 = arith.constant 0 : index
    %c0_2 = arith.constant 0 : index
    %1 = vector.load %arg1[%c0_1, %c0_2] : memref<432x1024xf32, #tpu.memory_space<vmem>>, vector<432x1024xf32>
    %cst = arith.constant dense<0.000000e+00> : vector<32x1024xf32>
    %2 = tpu.matmul %0, %1, %cst {dimension_numbers = #tpu.dot_dimension_numbers<[1], [0], [0], [1], [0, 0, 1, 1], [], []>} : vector<32x432xf32>, vector<432x1024xf32>, vector<32x1024xf32> -> vector<32x1024xf32>
    %cst_3 = arith.constant dense<0.000000e+00> : vector<32xf32>
    %3 = vector.multi_reduction <add>, %2, %cst_3 [1] : vector<32x1024xf32> to vector<32xf32>
    %4 = vector.shape_cast %3 : vector<32xf32> to vector<32x1xf32>
    %5 = arith.mulf %2, %2 : vector<32x1024xf32>
    %cst_4 = arith.constant dense<0.000000e+00> : vector<32xf32>
    %6 = vector.multi_reduction <add>, %5, %cst_4 [1] : vector<32x1024xf32> to vector<32xf32>
    %7 = vector.shape_cast %6 : vector<32xf32> to vector<32x1xf32>
    %cst_5 = arith.constant 1.024000e+03 : f32
    %8 = vector.broadcast %cst_5 : f32 to vector<32x1xf32>
    %9 = arith.divf %4, %8 : vector<32x1xf32>
    %cst_6 = arith.constant 1.024000e+03 : f32
    %10 = vector.broadcast %cst_6 : f32 to vector<32x1xf32>
    %11 = arith.divf %7, %10 : vector<32x1xf32>
    %12 = arith.mulf %9, %9 : vector<32x1xf32>
    %13 = arith.subf %11, %12 : vector<32x1xf32>
    %c0_7 = arith.constant 0 : index
    %c0_8 = arith.constant 0 : index
    %14 = vector.load %arg3[%c0_7, %c0_8] : memref<32x1xf32, #tpu.memory_space<vmem>>, vector<32x1xf32>
    %cst_9 = arith.constant 9.99999974E-6 : f32
    %15 = vector.broadcast %cst_9 : f32 to vector<32x1xf32>
    %16 = arith.addf %13, %15 : vector<32x1xf32>
    %17 = math.rsqrt %16 : vector<32x1xf32>
    %18 = arith.mulf %14, %17 : vector<32x1xf32>
    %c0_10 = arith.constant 0 : index
    %c0_11 = arith.constant 0 : index
    %19 = vector.load %arg4[%c0_10, %c0_11] : memref<32x1xf32, #tpu.memory_space<vmem>>, vector<32x1xf32>
    %20 = arith.mulf %9, %18 : vector<32x1xf32>
    %21 = arith.subf %19, %20 : vector<32x1xf32>
    %22 = vector.broadcast %18 : vector<32x1xf32> to vector<32x1024xf32>
    %23 = arith.mulf %2, %22 : vector<32x1024xf32>
    %24 = vector.broadcast %21 : vector<32x1xf32> to vector<32x1024xf32>
    %25 = arith.addf %23, %24 : vector<32x1024xf32>
    %cst_12 = arith.constant 0.000000e+00 : f32
    %26 = vector.broadcast %cst_12 : f32 to vector<32x1024xf32>
    %27 = arith.maximumf %25, %26 : vector<32x1024xf32>
    %28 = vector.extract_strided_slice %27 {offsets = [0, 0], sizes = [32, 128], strides = [1, 1]} : vector<32x1024xf32> to vector<32x128xf32>
    %29 = vector.extract_strided_slice %27 {offsets = [0, 128], sizes = [32, 128], strides = [1, 1]} : vector<32x1024xf32> to vector<32x128xf32>
    %30 = arith.maximumf %28, %29 : vector<32x128xf32>
    %31 = vector.extract_strided_slice %27 {offsets = [0, 256], sizes = [32, 128], strides = [1, 1]} : vector<32x1024xf32> to vector<32x128xf32>
    %32 = arith.maximumf %30, %31 : vector<32x128xf32>
    %33 = vector.extract_strided_slice %27 {offsets = [0, 384], sizes = [32, 128], strides = [1, 1]} : vector<32x1024xf32> to vector<32x128xf32>
    %34 = arith.maximumf %32, %33 : vector<32x128xf32>
    %35 = vector.extract_strided_slice %27 {offsets = [0, 512], sizes = [32, 128], strides = [1, 1]} : vector<32x1024xf32> to vector<32x128xf32>
    %36 = arith.maximumf %34, %35 : vector<32x128xf32>
    %37 = vector.extract_strided_slice %27 {offsets = [0, 640], sizes = [32, 128], strides = [1, 1]} : vector<32x1024xf32> to vector<32x128xf32>
    %38 = arith.maximumf %36, %37 : vector<32x128xf32>
    %39 = vector.extract_strided_slice %27 {offsets = [0, 768], sizes = [32, 128], strides = [1, 1]} : vector<32x1024xf32> to vector<32x128xf32>
    %40 = arith.maximumf %38, %39 : vector<32x128xf32>
    %41 = vector.extract_strided_slice %27 {offsets = [0, 896], sizes = [32, 128], strides = [1, 1]} : vector<32x1024xf32> to vector<32x128xf32>
    %42 = arith.maximumf %40, %41 : vector<32x128xf32>
    %c0_13 = arith.constant 0 : index
    %c0_14 = arith.constant 0 : index
    %43 = vector.load %arg5[%c0_13, %c0_14] : memref<32x128xf32, #tpu.memory_space<vmem>>, vector<32x128xf32>
    tpu.vector_store %arg5[%c0_13, %c0_14], %42 {strides = array<i32>} : memref<32x128xf32, #tpu.memory_space<vmem>>, vector<32x128xf32>,
    return
  }
  func.func @transform_0(%arg0: i32) -> (i32, i32) {
    %c0_i32 = arith.constant 0 : i32
    %c0_i32_0 = arith.constant 0 : i32
    %c0_i32_1 = arith.constant 0 : i32
    return %c0_i32, %c0_i32_0 : i32, i32
  }
  func.func @transform_1(%arg0: i32) -> (i32, i32) {
    %c0_i32 = arith.constant 0 : i32
    %c0_i32_0 = arith.constant 0 : i32
    %c0_i32_1 = arith.constant 0 : i32
    return %c0_i32, %c0_i32_0 : i32, i32
  }
  func.func @transform_2(%arg0: i32) -> (i32, i32) {
    %c0_i32 = arith.constant 0 : i32
    %c0_i32_0 = arith.constant 0 : i32
    %c0_i32_1 = arith.constant 0 : i32
    return %c0_i32, %c0_i32_0 : i32, i32
  }
  func.func @transform_3(%arg0: i32) -> (i32, i32) {
    %c0_i32 = arith.constant 0 : i32
    %c0_i32_0 = arith.constant 0 : i32
    %c0_i32_1 = arith.constant 0 : i32
    return %c0_i32, %c0_i32_0 : i32, i32
  }
  func.func @transform_4(%arg0: i32) -> (i32, i32) {
    %c0_i32 = arith.constant 0 : i32
    %c0_i32_0 = arith.constant 0 : i32
    %c0_i32_1 = arith.constant 0 : i32
    return %c0_i32, %c0_i32_0 : i32, i32
  }
}

</mosaic_0001>

<bundles_post_ra>
// kernel: simple_3d_conv_forward.2
= control target key start
LH: loop header
LB: loop body
LE: loop exit
PB: predicated region body
PF: predicated region fallthrough
CT: control target
= control target key end

     0   :  { %v4023_v3 = vmov 0.0   ;;  %vm275_vm0 = vcmask 261120   ;;  %s6914_s0 = inlined_call_operand.vmem [shape: f32[32,8192], index: 0, kind: input, shape index: {}]   ;;  %s6915_s1 = inlined_call_operand.vmem [shape: f32[16,32], index: 1, kind: input, shape index: {}]   ;;  %s6916_s2 = inlined_call_operand.vmem [shape: f32[16,1], index: 2, kind: input, shape index: {}]   ;;  %s6917_s3 = inlined_call_operand.vmem [shape: f32[16,1], index: 3, kind: input, shape index: {}]   ;;  %s6918_s4 = inlined_call_operand.vmem [shape: f32[16,1024], index: 4, kind: output, shape index: {}]  }
   0x1   :  { %v20_v0 = vld [vmem:[%s6914_s0 + $0x8] sm:$0xff]  ;;  %v19_v2 = vld [vmem:[%s6914_s0] sm:$0xff]  ;;  %346 = vmatprep.mubr.f32.mxu0 %v4023_v3  ;;  %423 = vmatprep.mubr.f32.mxu1 %v4023_v3  ;;  %v22_v6 = vld [vmem:[%s6914_s0 + $0x18] sm:$0xff] }
   0x2   :  { %v84_v1 = vld [vmem:[%s6914_s0 + $0x208] sm:$0xff]  ;;  %v83_v5 = vld [vmem:[%s6914_s0 + $0x200] sm:$0xff]  ;;  %v86_v7 = vld [vmem:[%s6914_s0 + $0x218] sm:$0xff] }
   0x3   :  { %v3757_v4 = vpack.c.bf16 %v84_v1, %v20_v0  ;;  %v3759_v8 = vpack.c.bf16 %v83_v5, %v19_v2  ;;  %v3765_v9 = vpack.c.bf16 %v86_v7, %v22_v6  ;;  %v148_v10 = vld [vmem:[%s6914_s0 + $0x408] sm:$0xff]  ;;  %v21_v12 = vld [vmem:[%s6914_s0 + $0x10] sm:$0xff]  ;;  %v147_v15 = vld [vmem:[%s6914_s0 + $0x400] sm:$0xff] }
   0x4   :  { %v212_v11 = vld [vmem:[%s6914_s0 + $0x608] sm:$0xff]  ;;  %v85_v14 = vld [vmem:[%s6914_s0 + $0x210] sm:$0xff]  ;;  %v211_v16 = vld [vmem:[%s6914_s0 + $0x600] sm:$0xff] }
   0x5   :  { %3758 = vmatprep.subr.bf16.mxu0 %v3757_v4  ;;  %v3761_v13 = vpack.c.bf16 %v212_v11, %v148_v10  ;;  %3766 = vmatprep.subr.bf16.mxu1 %v3765_v9  ;;  %v3767_v17 = vpack.c.bf16 %v85_v14, %v21_v12  ;;  %v3763_v18 = vpack.c.bf16 %v211_v16, %v147_v15  ;;  %v150_v19 = vld [vmem:[%s6914_s0 + $0x418] sm:$0xff]  ;;  %v149_v22 = vld [vmem:[%s6914_s0 + $0x410] sm:$0xff]  ;;  %v24_v24 = vld [vmem:[%s6914_s0 + $0x28] sm:$0xff] }
   0x6   :  { %3760 = vmatpush1.bf16.msra.mxu0 %v3759_v8  ;;  %v214_v20 = vld [vmem:[%s6914_s0 + $0x618] sm:$0xff]  ;;  %v213_v23 = vld [vmem:[%s6914_s0 + $0x610] sm:$0xff]  ;;  %v88_v26 = vld [vmem:[%s6914_s0 + $0x228] sm:$0xff] }
   0x7   :  { %3762 = vmatprep.subr.bf16.mxu0 %v3761_v13  ;;  %v3769_v21 = vpack.c.bf16 %v214_v20, %v150_v19  ;;  %3768 = vmatpush1.bf16.msra.mxu1 %v3767_v17  ;;  %v3771_v25 = vpack.c.bf16 %v213_v23, %v149_v22  ;;  %v23_v27 = vld [vmem:[%s6914_s0 + $0x20] sm:$0xff]  ;;  %v3773_v30 = vpack.c.bf16 %v88_v26, %v24_v24  ;;  %v152_v31 = vld [vmem:[%s6914_s0 + $0x428] sm:$0xff]  ;;  %v26_v34 = vld [vmem:[%s6914_s0 + $0x38] sm:$0xff] }
   0x8   :  { %v87_v28 = vld [vmem:[%s6914_s0 + $0x220] sm:$0xff]  ;;  %v216_v32 = vld [vmem:[%s6914_s0 + $0x628] sm:$0xff]  ;;  %v90_v35 = vld [vmem:[%s6914_s0 + $0x238] sm:$0xff] }
   0x9   :  { %3770 = vmatprep.subr.bf16.mxu1 %v3769_v21  ;;  %v4115_v29 = vld [vmem:[%s6915_s1] sm:$0xff]  ;;  %v3775_v33 = vpack.c.bf16 %v87_v28, %v23_v27  ;;  %v3777_v37 = vpack.c.bf16 %v216_v32, %v152_v31  ;;  %v3781_v38 = vpack.c.bf16 %v90_v35, %v26_v34  ;;  %v25_v40 = vld [vmem:[%s6914_s0 + $0x30] sm:$0xff]  ;;  %v154_v43 = vld [vmem:[%s6914_s0 + $0x438] sm:$0xff] }
   0xa   :  { %3764 = vmatpush1.bf16.msra.mxu0 %v3763_v18  ;;  %v151_v36 = vld [vmem:[%s6914_s0 + $0x420] sm:$0xff]  ;;  %v89_v41 = vld [vmem:[%s6914_s0 + $0x230] sm:$0xff]  ;;  %v218_v44 = vld [vmem:[%s6914_s0 + $0x638] sm:$0xff] }
   0xb   :  { %3774 = vmatprep.subr.bf16.mxu0 %v3773_v30  ;;  %v215_v39 = vld [vmem:[%s6914_s0 + $0x620] sm:$0xff]  ;;  %3772 = vmatpush1.bf16.msra.mxu1 %v3771_v25  ;;  %v3783_v42 = vpack.c.bf16 %v89_v41, %v25_v40  ;;  %v28_v45 = vld [vmem:[%s6914_s0 + $0x48] sm:$0xff]  ;;  %v3785_v46 = vpack.c.bf16 %v218_v44, %v154_v43  ;;  %v153_v48 = vld [vmem:[%s6914_s0 + $0x430] sm:$0xff] }
   0xc   :  { %3782 = vmatprep.subr.bf16.mxu1 %v3781_v38  ;;  %v92_v47 = vld [vmem:[%s6914_s0 + $0x248] sm:$0xff]  ;;  %v217_v49 = vld [vmem:[%s6914_s0 + $0x630] sm:$0xff]  ;;  %v3779_v51 = vpack.c.bf16 %v215_v39, %v151_v36  ;;  %v27_v52 = vld [vmem:[%s6914_s0 + $0x40] sm:$0xff] }
   0xd   :  { %3693 = vmatmul.mubr.msk.f32.vlgmr.msra.gmra.mrb[0].mxu0 %vm275_vm0, %v4115_v29  ;;  %v4165_v50 = vld [vmem:[%s6915_s1 + $0x8] sm:$0xff]  ;;  %v3789_v53 = vpack.c.bf16 %v92_v47, %v28_v45  ;;  %v91_v54 = vld [vmem:[%s6914_s0 + $0x240] sm:$0xff]  ;;  %v30_v55 = vld [vmem:[%s6914_s0 + $0x58] sm:$0xff]  ;;  %v3787_v57 = vpack.c.bf16 %v217_v49, %v153_v48 }
   0xe   :  { %3776 = vmatpush1.bf16.msra.mxu0 %v3775_v33  ;;  %352 = vmatprep.mubr.f32.mxu0 %v4023_v3  ;;  %v94_v56 = vld [vmem:[%s6914_s0 + $0x258] sm:$0xff]  ;;  %v156_v58 = vld [vmem:[%s6914_s0 + $0x448] sm:$0xff]  ;;  %v29_v61 = vld [vmem:[%s6914_s0 + $0x50] sm:$0xff]  ;;  %v3791_v63 = vpack.c.bf16 %v91_v54, %v27_v52 }
   0xf   :  { %3695 = vmatmul.mubr.msk.f32.vlgmr.msra.gmra.mrb[0].mxu1 %vm275_vm0, %v4115_v29  ;;  %3778 = vmatprep.subr.bf16.mxu0 %v3777_v37  ;;  %v220_v59 = vld [vmem:[%s6914_s0 + $0x648] sm:$0xff]  ;;  %v3797_v60 = vpack.c.bf16 %v94_v56, %v30_v55  ;;  %v93_v62 = vld [vmem:[%s6914_s0 + $0x250] sm:$0xff]  ;;  %v158_v0 = vld [vmem:[%s6914_s0 + $0x458] sm:$0xff] }
  0x10   :  { %3784 = vmatpush1.bf16.msra.mxu1 %v3783_v42  ;;  %429 = vmatprep.mubr.f32.mxu1 %v4023_v3  ;;  %v222_v1 = vld [vmem:[%s6914_s0 + $0x658] sm:$0xff]  ;;  %v3793_v2 = vpack.c.bf16 %v220_v59, %v156_v58  ;;  %v155_v4 = vld [vmem:[%s6914_s0 + $0x440] sm:$0xff]  ;;  %v3799_v6 = vpack.c.bf16 %v93_v62, %v29_v61  ;;  %v32_v7 = vld [vmem:[%s6914_s0 + $0x68] sm:$0xff] }
  0x11   :  { %3694 = vmatmul.mubr.msk.f32.gmra.mrb[2].mxu0 %vm275_vm0, %v4165_v50  ;;  %3786 = vmatprep.subr.bf16.mxu1 %v3785_v46  ;;  %v219_v5 = vld [vmem:[%s6914_s0 + $0x640] sm:$0xff]  ;;  %v96_v8 = vld [vmem:[%s6914_s0 + $0x268] sm:$0xff]  ;;  %v3801_v9 = vpack.c.bf16 %v222_v1, %v158_v0  ;;  %v157_v10 = vld [vmem:[%s6914_s0 + $0x450] sm:$0xff] }
  0x12   :  { %3780 = vmatpush1.bf16.msra.mxu0 %v3779_v51  ;;  %500 = vmatprep.mubr.f32.mxu0 %v4023_v3  ;;  %v221_v11 = vld [vmem:[%s6914_s0 + $0x650] sm:$0xff]  ;;  %v3795_v12 = vpack.c.bf16 %v219_v5, %v155_v4  ;;  %v34_v13 = vld [vmem:[%s6914_s0 + $0x78] sm:$0xff]  ;;  %v3805_v15 = vpack.c.bf16 %v96_v8, %v32_v7  ;;  %v31_v16 = vld [vmem:[%s6914_s0 + $0x60] sm:$0xff] }
  0x13   :  { %3696 = vmatmul.mubr.msk.f32.gmra.mrb[2].mxu1 %vm275_vm0, %v4165_v50  ;;  %3790 = vmatprep.subr.bf16.mxu0 %v3789_v53  ;;  %v98_v14 = vld [vmem:[%s6914_s0 + $0x278] sm:$0xff]  ;;  %v95_v17 = vld [vmem:[%s6914_s0 + $0x260] sm:$0xff]  ;;  %v3803_v18 = vpack.c.bf16 %v221_v11, %v157_v10  ;;  %v160_v19 = vld [vmem:[%s6914_s0 + $0x468] sm:$0xff] }
  0x14   :  { %3788 = vmatpush1.bf16.msra.mxu1 %v3787_v57  ;;  %577 = vmatprep.mubr.f32.mxu1 %v4023_v3  ;;  %v224_v20 = vld [vmem:[%s6914_s0 + $0x668] sm:$0xff]  ;;  %v3813_v21 = vpack.c.bf16 %v98_v14, %v34_v13  ;;  %v33_v22 = vld [vmem:[%s6914_s0 + $0x70] sm:$0xff]  ;;  %v3807_v24 = vpack.c.bf16 %v95_v17, %v31_v16  ;;  %v162_v25 = vld [vmem:[%s6914_s0 + $0x478] sm:$0xff] }
  0x15   :  { %3697 = vmatmul.mubr.msk.f32.vlgmr.msra.gmra.mrb[4].mxu0 %vm275_vm0, %v4115_v29  ;;  %3798 = vmatprep.subr.bf16.mxu1 %v3797_v60  ;;  %v97_v23 = vld [vmem:[%s6914_s0 + $0x270] sm:$0xff]  ;;  %v226_v26 = vld [vmem:[%s6914_s0 + $0x678] sm:$0xff]  ;;  %v3809_v27 = vpack.c.bf16 %v224_v20, %v160_v19  ;;  %v159_v28 = vld [vmem:[%s6914_s0 + $0x460] sm:$0xff] }
  0x16   :  { %3792 = vmatpush1.bf16.msra.mxu0 %v3791_v63  ;;  %506 = vmatprep.mubr.f32.mxu0 %v4023_v3  ;;  %v223_v30 = vld [vmem:[%s6914_s0 + $0x660] sm:$0xff]  ;;  %v3815_v31 = vpack.c.bf16 %v97_v23, %v33_v22  ;;  %v36_v32 = vld [vmem:[%s6914_s0 + $0x88] sm:$0xff]  ;;  %v3817_v34 = vpack.c.bf16 %v226_v26, %v162_v25  ;;  %v161_v35 = vld [vmem:[%s6914_s0 + $0x470] sm:$0xff] }
  0x17   :  { %3699 = vmatmul.mubr.msk.f32.vlgmr.msra.gmra.mrb[4].mxu1 %vm275_vm0, %v4115_v29  ;;  %3794 = vmatprep.subr.bf16.mxu0 %v3793_v2  ;;  %v100_v33 = vld [vmem:[%s6914_s0 + $0x288] sm:$0xff]  ;;  %v225_v36 = vld [vmem:[%s6914_s0 + $0x670] sm:$0xff]  ;;  %v3811_v37 = vpack.c.bf16 %v223_v30, %v159_v28  ;;  %v38_v38 = vld [vmem:[%s6914_s0 + $0x98] sm:$0xff] }
  0x18   :  { %3800 = vmatpush1.bf16.msra.mxu1 %v3799_v6  ;;  %583 = vmatprep.mubr.f32.mxu1 %v4023_v3  ;;  %v102_v39 = vld [vmem:[%s6914_s0 + $0x298] sm:$0xff]  ;;  %v3821_v40 = vpack.c.bf16 %v100_v33, %v36_v32  ;;  %v35_v41 = vld [vmem:[%s6914_s0 + $0x80] sm:$0xff]  ;;  %v3819_v43 = vpack.c.bf16 %v225_v36, %v161_v35  ;;  %v164_v44 = vld [vmem:[%s6914_s0 + $0x488] sm:$0xff] }
  0x19   :  { %3698 = vmatmul.mubr.msk.f32.gmra.mrb[6].mxu0 %vm275_vm0, %v4165_v50  ;;  %3802 = vmatprep.subr.bf16.mxu1 %v3801_v9  ;;  %v99_v42 = vld [vmem:[%s6914_s0 + $0x280] sm:$0xff]  ;;  %v228_v45 = vld [vmem:[%s6914_s0 + $0x688] sm:$0xff]  ;;  %v3829_v46 = vpack.c.bf16 %v102_v39, %v38_v38  ;;  %v37_v47 = vld [vmem:[%s6914_s0 + $0x90] sm:$0xff] }
  0x1a   :  { %3796 = vmatpush1.bf16.msra.mxu0 %v3795_v12  ;;  %654 = vmatprep.mubr.f32.mxu0 %v4023_v3  ;;  %v101_v48 = vld [vmem:[%s6914_s0 + $0x290] sm:$0xff]  ;;  %v3823_v49 = vpack.c.bf16 %v99_v42, %v35_v41  ;;  %v166_v51 = vld [vmem:[%s6914_s0 + $0x498] sm:$0xff]  ;;  %v3825_v53 = vpack.c.bf16 %v228_v45, %v164_v44  ;;  %v163_v54 = vld [vmem:[%s6914_s0 + $0x480] sm:$0xff] }
  0x1b   :  { %3700 = vmatmul.mubr.msk.f32.gmra.mrb[6].mxu1 %vm275_vm0, %v4165_v50  ;;  %3806 = vmatprep.subr.bf16.mxu0 %v3805_v15  ;;  %v230_v52 = vld [vmem:[%s6914_s0 + $0x698] sm:$0xff]  ;;  %v227_v55 = vld [vmem:[%s6914_s0 + $0x680] sm:$0xff]  ;;  %v3831_v56 = vpack.c.bf16 %v101_v48, %v37_v47  ;;  %v40_v57 = vld [vmem:[%s6914_s0 + $0xa8] sm:$0xff] }
  0x1c   :  { %3804 = vmatpush1.bf16.msra.mxu1 %v3803_v18  ;;  %731 = vmatprep.mubr.f32.mxu1 %v4023_v3  ;;  %v104_v58 = vld [vmem:[%s6914_s0 + $0x2a8] sm:$0xff]  ;;  %v3833_v59 = vpack.c.bf16 %v230_v52, %v166_v51  ;;  %v165_v60 = vld [vmem:[%s6914_s0 + $0x490] sm:$0xff]  ;;  %v3827_v62 = vpack.c.bf16 %v227_v55, %v163_v54  ;;  %v42_v63 = vld [vmem:[%s6914_s0 + $0xb8] sm:$0xff] }
  0x1d   :  { %3701 = vmatmul.mubr.msk.f32.vlgmr.msra.gmra.mrb[8].mxu0 %vm275_vm0, %v4115_v29  ;;  %3814 = vmatprep.subr.bf16.mxu1 %v3813_v21  ;;  %v229_v61 = vld [vmem:[%s6914_s0 + $0x690] sm:$0xff]  ;;  %v106_v0 = vld [vmem:[%s6914_s0 + $0x2b8] sm:$0xff]  ;;  %v3837_v1 = vpack.c.bf16 %v104_v58, %v40_v57  ;;  %v39_v2 = vld [vmem:[%s6914_s0 + $0xa0] sm:$0xff] }
  0x1e   :  { %3808 = vmatpush1.bf16.msra.mxu0 %v3807_v24  ;;  %660 = vmatprep.mubr.f32.mxu0 %v4023_v3  ;;  %v103_v4 = vld [vmem:[%s6914_s0 + $0x2a0] sm:$0xff]  ;;  %v3835_v5 = vpack.c.bf16 %v229_v61, %v165_v60  ;;  %v168_v6 = vld [vmem:[%s6914_s0 + $0x4a8] sm:$0xff]  ;;  %v3845_v8 = vpack.c.bf16 %v106_v0, %v42_v63  ;;  %v41_v9 = vld [vmem:[%s6914_s0 + $0xb0] sm:$0xff] }
  0x1f   :  { %3703 = vmatmul.mubr.msk.f32.vlgmr.msra.gmra.mrb[8].mxu1 %vm275_vm0, %v4115_v29  ;;  %3810 = vmatprep.subr.bf16.mxu0 %v3809_v27  ;;  %v232_v7 = vld [vmem:[%s6914_s0 + $0x6a8] sm:$0xff]  ;;  %v105_v10 = vld [vmem:[%s6914_s0 + $0x2b0] sm:$0xff]  ;;  %v3839_v11 = vpack.c.bf16 %v103_v4, %v39_v2  ;;  %v170_v12 = vld [vmem:[%s6914_s0 + $0x4b8] sm:$0xff] }
  0x20   :  { %3816 = vmatpush1.bf16.msra.mxu1 %v3815_v31  ;;  %737 = vmatprep.mubr.f32.mxu1 %v4023_v3  ;;  %v234_v13 = vld [vmem:[%s6914_s0 + $0x6b8] sm:$0xff]  ;;  %v3841_v14 = vpack.c.bf16 %v232_v7, %v168_v6  ;;  %v167_v15 = vld [vmem:[%s6914_s0 + $0x4a0] sm:$0xff]  ;;  %v3847_v17 = vpack.c.bf16 %v105_v10, %v41_v9  ;;  %v44_v18 = vld [vmem:[%s6914_s0 + $0xc8] sm:$0xff] }
  0x21   :  { %3702 = vmatmul.mubr.msk.f32.gmra.mrb[10].mxu0 %vm275_vm0, %v4165_v50  ;;  %3818 = vmatprep.subr.bf16.mxu1 %v3817_v34  ;;  %v231_v16 = vld [vmem:[%s6914_s0 + $0x6a0] sm:$0xff]  ;;  %v108_v19 = vld [vmem:[%s6914_s0 + $0x2c8] sm:$0xff]  ;;  %v3849_v20 = vpack.c.bf16 %v234_v13, %v170_v12  ;;  %v169_v21 = vld [vmem:[%s6914_s0 + $0x4b0] sm:$0xff] }
  0x22   :  { %3812 = vmatpush1.bf16.msra.mxu0 %v3811_v37  ;;  %808 = vmatprep.mubr.f32.mxu0 %v4023_v3  ;;  %v233_v22 = vld [vmem:[%s6914_s0 + $0x6b0] sm:$0xff]  ;;  %v3843_v23 = vpack.c.bf16 %v231_v16, %v167_v15  ;;  %v46_v24 = vld [vmem:[%s6914_s0 + $0xd8] sm:$0xff]  ;;  %v3853_v26 = vpack.c.bf16 %v108_v19, %v44_v18  ;;  %v43_v27 = vld [vmem:[%s6914_s0 + $0xc0] sm:$0xff] }
  0x23   :  { %3704 = vmatmul.mubr.msk.f32.gmra.mrb[10].mxu1 %vm275_vm0, %v4165_v50  ;;  %3822 = vmatprep.subr.bf16.mxu0 %v3821_v40  ;;  %v110_v25 = vld [vmem:[%s6914_s0 + $0x2d8] sm:$0xff]  ;;  %v107_v28 = vld [vmem:[%s6914_s0 + $0x2c0] sm:$0xff]  ;;  %v3851_v30 = vpack.c.bf16 %v233_v22, %v169_v21  ;;  %v172_v31 = vld [vmem:[%s6914_s0 + $0x4c8] sm:$0xff] }
  0x24   :  { %3820 = vmatpush1.bf16.msra.mxu1 %v3819_v43  ;;  %885 = vmatprep.mubr.f32.mxu1 %v4023_v3  ;;  %v236_v32 = vld [vmem:[%s6914_s0 + $0x6c8] sm:$0xff]  ;;  %v3861_v33 = vpack.c.bf16 %v110_v25, %v46_v24  ;;  %v45_v34 = vld [vmem:[%s6914_s0 + $0xd0] sm:$0xff]  ;;  %v3855_v36 = vpack.c.bf16 %v107_v28, %v43_v27  ;;  %v174_v37 = vld [vmem:[%s6914_s0 + $0x4d8] sm:$0xff] }
  0x25   :  { %3705 = vmatmul.mubr.msk.f32.vlgmr.msra.gmra.mrb[12].mxu0 %vm275_vm0, %v4115_v29  ;;  %3830 = vmatprep.subr.bf16.mxu1 %v3829_v46  ;;  %v109_v35 = vld [vmem:[%s6914_s0 + $0x2d0] sm:$0xff]  ;;  %v238_v38 = vld [vmem:[%s6914_s0 + $0x6d8] sm:$0xff]  ;;  %v3857_v39 = vpack.c.bf16 %v236_v32, %v172_v31  ;;  %v171_v40 = vld [vmem:[%s6914_s0 + $0x4c0] sm:$0xff] }
  0x26   :  { %3824 = vmatpush1.bf16.msra.mxu0 %v3823_v49  ;;  %814 = vmatprep.mubr.f32.mxu0 %v4023_v3  ;;  %v235_v41 = vld [vmem:[%s6914_s0 + $0x6c0] sm:$0xff]  ;;  %v3863_v42 = vpack.c.bf16 %v109_v35, %v45_v34  ;;  %v48_v43 = vld [vmem:[%s6914_s0 + $0xe8] sm:$0xff]  ;;  %v3865_v45 = vpack.c.bf16 %v238_v38, %v174_v37  ;;  %v173_v46 = vld [vmem:[%s6914_s0 + $0x4d0] sm:$0xff] }
  0x27   :  { %3707 = vmatmul.mubr.msk.f32.vlgmr.msra.gmra.mrb[12].mxu1 %vm275_vm0, %v4115_v29  ;;  %3826 = vmatprep.subr.bf16.mxu0 %v3825_v53  ;;  %v112_v44 = vld [vmem:[%s6914_s0 + $0x2e8] sm:$0xff]  ;;  %v237_v47 = vld [vmem:[%s6914_s0 + $0x6d0] sm:$0xff]  ;;  %v3859_v48 = vpack.c.bf16 %v235_v41, %v171_v40  ;;  %v50_v49 = vld [vmem:[%s6914_s0 + $0xf8] sm:$0xff] }
  0x28   :  { %3832 = vmatpush1.bf16.msra.mxu1 %v3831_v56  ;;  %891 = vmatprep.mubr.f32.mxu1 %v4023_v3  ;;  %v114_v51 = vld [vmem:[%s6914_s0 + $0x2f8] sm:$0xff]  ;;  %v3869_v52 = vpack.c.bf16 %v112_v44, %v48_v43  ;;  %v47_v53 = vld [vmem:[%s6914_s0 + $0xe0] sm:$0xff]  ;;  %v3867_v55 = vpack.c.bf16 %v237_v47, %v173_v46  ;;  %v176_v56 = vld [vmem:[%s6914_s0 + $0x4e8] sm:$0xff] }
  0x29   :  { %3706 = vmatmul.mubr.msk.f32.gmra.mrb[14].mxu0 %vm275_vm0, %v4165_v50  ;;  %3834 = vmatprep.subr.bf16.mxu1 %v3833_v59  ;;  %v111_v54 = vld [vmem:[%s6914_s0 + $0x2e0] sm:$0xff]  ;;  %v240_v57 = vld [vmem:[%s6914_s0 + $0x6e8] sm:$0xff]  ;;  %v3877_v58 = vpack.c.bf16 %v114_v51, %v50_v49  ;;  %v49_v59 = vld [vmem:[%s6914_s0 + $0xf0] sm:$0xff] }
  0x2a   :  { %3828 = vmatpush1.bf16.msra.mxu0 %v3827_v62  ;;  %962 = vmatprep.mubr.f32.mxu0 %v4023_v3  ;;  %v113_v60 = vld [vmem:[%s6914_s0 + $0x2f0] sm:$0xff]  ;;  %v3871_v61 = vpack.c.bf16 %v111_v54, %v47_v53  ;;  %v178_v62 = vld [vmem:[%s6914_s0 + $0x4f8] sm:$0xff]  ;;  %v3873_v0 = vpack.c.bf16 %v240_v57, %v176_v56  ;;  %v239_v2 = vld [vmem:[%s6914_s0 + $0x6e0] sm:$0xff] }
  0x2b   :  { %3708 = vmatmul.mubr.msk.f32.gmra.mrb[14].mxu1 %vm275_vm0, %v4165_v50  ;;  %3838 = vmatprep.subr.bf16.mxu0 %v3837_v1  ;;  %v242_v63 = vld [vmem:[%s6914_s0 + $0x6f8] sm:$0xff]  ;;  %v175_v1 = vld [vmem:[%s6914_s0 + $0x4e0] sm:$0xff]  ;;  %v3879_v4 = vpack.c.bf16 %v113_v60, %v49_v59  ;;  %v116_v6 = vld [vmem:[%s6914_s0 + $0x308] sm:$0xff] }
  0x2c   :  { %3836 = vmatpush1.bf16.msra.mxu1 %v3835_v5  ;;  %1039 = vmatprep.mubr.f32.mxu1 %v4023_v3  ;;  %v52_v5 = vld [vmem:[%s6914_s0 + $0x108] sm:$0xff]  ;;  %v3881_v7 = vpack.c.bf16 %v242_v63, %v178_v62  ;;  %v241_v9 = vld [vmem:[%s6914_s0 + $0x6f0] sm:$0xff]  ;;  %v3875_v10 = vpack.c.bf16 %v239_v2, %v175_v1  ;;  %v118_v12 = vld [vmem:[%s6914_s0 + $0x318] sm:$0xff] }
  0x2d   :  { %3709 = vmatmul.mubr.msk.f32.vlgmr.msra.gmra.mrb[16].mxu0 %vm275_vm0, %v4115_v29  ;;  %3846 = vmatprep.subr.bf16.mxu1 %v3845_v8  ;;  %v177_v8 = vld [vmem:[%s6914_s0 + $0x4f0] sm:$0xff]  ;;  %v3885_v13 = vpack.c.bf16 %v116_v6, %v52_v5  ;;  %v115_v15 = vld [vmem:[%s6914_s0 + $0x300] sm:$0xff]  ;;  %v244_v18 = vld [vmem:[%s6914_s0 + $0x708] sm:$0xff] }
  0x2e   :  { %3840 = vmatpush1.bf16.msra.mxu0 %v3839_v11  ;;  %968 = vmatprep.mubr.f32.mxu0 %v4023_v3  ;;  %v54_v11 = vld [vmem:[%s6914_s0 + $0x118] sm:$0xff]  ;;  %v3883_v16 = vpack.c.bf16 %v241_v9, %v177_v8  ;;  %v117_v21 = vld [vmem:[%s6914_s0 + $0x310] sm:$0xff]  ;;  %v243_v27 = vld [vmem:[%s6914_s0 + $0x700] sm:$0xff] }
  0x2f   :  { %3711 = vmatmul.mubr.msk.f32.vlgmr.msra.gmra.mrb[16].mxu1 %vm275_vm0, %v4115_v29  ;;  %3842 = vmatprep.subr.bf16.mxu0 %v3841_v14  ;;  %v51_v14 = vld [vmem:[%s6914_s0 + $0x100] sm:$0xff]  ;;  %v3893_v19 = vpack.c.bf16 %v118_v12, %v54_v11  ;;  %v246_v24 = vld [vmem:[%s6914_s0 + $0x718] sm:$0xff]  ;;  %v120_v31 = vld [vmem:[%s6914_s0 + $0x328] sm:$0xff] }
  0x30   :  { %3848 = vmatpush1.bf16.msra.mxu1 %v3847_v17  ;;  %1045 = vmatprep.mubr.f32.mxu1 %v4023_v3  ;;  %v180_v17 = vld [vmem:[%s6914_s0 + $0x508] sm:$0xff]  ;;  %v3887_v22 = vpack.c.bf16 %v115_v15, %v51_v14  ;;  %v245_v34 = vld [vmem:[%s6914_s0 + $0x710] sm:$0xff]  ;;  %v122_v37 = vld [vmem:[%s6914_s0 + $0x338] sm:$0xff] }
  0x31   :  { %3710 = vmatmul.mubr.msk.f32.gmra.mrb[18].mxu0 %vm275_vm0, %v4165_v50  ;;  %3850 = vmatprep.subr.bf16.mxu1 %v3849_v20  ;;  %v53_v20 = vld [vmem:[%s6914_s0 + $0x110] sm:$0xff]  ;;  %v3889_v25 = vpack.c.bf16 %v244_v18, %v180_v17  ;;  %v119_v40 = vld [vmem:[%s6914_s0 + $0x320] sm:$0xff]  ;;  %v248_v43 = vld [vmem:[%s6914_s0 + $0x728] sm:$0xff] }
  0x32   :  { %3844 = vmatpush1.bf16.msra.mxu0 %v3843_v23  ;;  %1116 = vmatprep.mubr.f32.mxu0 %v4023_v3  ;;  %v182_v23 = vld [vmem:[%s6914_s0 + $0x518] sm:$0xff]  ;;  %v3895_v28 = vpack.c.bf16 %v117_v21, %v53_v20  ;;  %v121_v46 = vld [vmem:[%s6914_s0 + $0x330] sm:$0xff]  ;;  %v247_v53 = vld [vmem:[%s6914_s0 + $0x720] sm:$0xff] }
  0x33   :  { %3712 = vmatmul.mubr.msk.f32.gmra.mrb[18].mxu1 %vm275_vm0, %v4165_v50  ;;  %3854 = vmatprep.subr.bf16.mxu0 %v3853_v26  ;;  %v179_v26 = vld [vmem:[%s6914_s0 + $0x500] sm:$0xff]  ;;  %v3897_v32 = vpack.c.bf16 %v246_v24, %v182_v23  ;;  %v250_v49 = vld [vmem:[%s6914_s0 + $0x738] sm:$0xff]  ;;  %v124_v56 = vld [vmem:[%s6914_s0 + $0x348] sm:$0xff] }
  0x34   :  { %3852 = vmatpush1.bf16.msra.mxu1 %v3851_v30  ;;  %1193 = vmatprep.mubr.f32.mxu1 %v4023_v3  ;;  %v56_v30 = vld [vmem:[%s6914_s0 + $0x128] sm:$0xff]  ;;  %v3891_v35 = vpack.c.bf16 %v243_v27, %v179_v26  ;;  %v249_v59 = vld [vmem:[%s6914_s0 + $0x730] sm:$0xff]  ;;  %v126_v62 = vld [vmem:[%s6914_s0 + $0x358] sm:$0xff] }
  0x35   :  { %3713 = vmatmul.mubr.msk.f32.vlgmr.msra.gmra.mrb[20].mxu0 %vm275_vm0, %v4115_v29  ;;  %3862 = vmatprep.subr.bf16.mxu1 %v3861_v33  ;;  %v181_v33 = vld [vmem:[%s6914_s0 + $0x510] sm:$0xff]  ;;  %v3901_v38 = vpack.c.bf16 %v120_v31, %v56_v30  ;;  %v123_v1 = vld [vmem:[%s6914_s0 + $0x340] sm:$0xff]  ;;  %v252_v5 = vld [vmem:[%s6914_s0 + $0x748] sm:$0xff] }
  0x36   :  { %3856 = vmatpush1.bf16.msra.mxu0 %v3855_v36  ;;  %1122 = vmatprep.mubr.f32.mxu0 %v4023_v3  ;;  %v58_v36 = vld [vmem:[%s6914_s0 + $0x138] sm:$0xff]  ;;  %v3899_v41 = vpack.c.bf16 %v245_v34, %v181_v33  ;;  %v125_v8 = vld [vmem:[%s6914_s0 + $0x350] sm:$0xff]  ;;  %v251_v14 = vld [vmem:[%s6914_s0 + $0x740] sm:$0xff] }
  0x37   :  { %3715 = vmatmul.mubr.msk.f32.vlgmr.msra.gmra.mrb[20].mxu1 %vm275_vm0, %v4115_v29  ;;  %3858 = vmatprep.subr.bf16.mxu0 %v3857_v39  ;;  %v55_v39 = vld [vmem:[%s6914_s0 + $0x120] sm:$0xff]  ;;  %v3909_v44 = vpack.c.bf16 %v122_v37, %v58_v36  ;;  %v254_v11 = vld [vmem:[%s6914_s0 + $0x758] sm:$0xff]  ;;  %v128_v17 = vld [vmem:[%s6914_s0 + $0x368] sm:$0xff] }
  0x38   :  { %3864 = vmatpush1.bf16.msra.mxu1 %v3863_v42  ;;  %1199 = vmatprep.mubr.f32.mxu1 %v4023_v3  ;;  %v184_v42 = vld [vmem:[%s6914_s0 + $0x528] sm:$0xff]  ;;  %v3903_v47 = vpack.c.bf16 %v119_v40, %v55_v39  ;;  %v253_v20 = vld [vmem:[%s6914_s0 + $0x750] sm:$0xff]  ;;  %v130_v23 = vld [vmem:[%s6914_s0 + $0x378] sm:$0xff] }
  0x39   :  { %3714 = vmatmul.mubr.msk.f32.gmra.mrb[22].mxu0 %vm275_vm0, %v4165_v50  ;;  %3866 = vmatprep.subr.bf16.mxu1 %v3865_v45  ;;  %v57_v45 = vld [vmem:[%s6914_s0 + $0x130] sm:$0xff]  ;;  %v3905_v51 = vpack.c.bf16 %v248_v43, %v184_v42  ;;  %v127_v26 = vld [vmem:[%s6914_s0 + $0x360] sm:$0xff]  ;;  %v256_v30 = vld [vmem:[%s6914_s0 + $0x768] sm:$0xff] }
  0x3a   :  { %3860 = vmatpush1.bf16.msra.mxu0 %v3859_v48  ;;  %1270 = vmatprep.mubr.f32.mxu0 %v4023_v3  ;;  %v186_v48 = vld [vmem:[%s6914_s0 + $0x538] sm:$0xff]  ;;  %v3911_v54 = vpack.c.bf16 %v121_v46, %v57_v45  ;;  %v129_v33 = vld [vmem:[%s6914_s0 + $0x370] sm:$0xff]  ;;  %v255_v39 = vld [vmem:[%s6914_s0 + $0x760] sm:$0xff] }
  0x3b   :  { %3716 = vmatmul.mubr.msk.f32.gmra.mrb[22].mxu1 %vm275_vm0, %v4165_v50  ;;  %3870 = vmatprep.subr.bf16.mxu0 %v3869_v52  ;;  %v183_v52 = vld [vmem:[%s6914_s0 + $0x520] sm:$0xff]  ;;  %v3913_v57 = vpack.c.bf16 %v250_v49, %v186_v48  ;;  %v258_v36 = vld [vmem:[%s6914_s0 + $0x778] sm:$0xff]  ;;  %v132_v42 = vld [vmem:[%s6914_s0 + $0x388] sm:$0xff] }
  0x3c   :  { %3868 = vmatpush1.bf16.msra.mxu1 %v3867_v55  ;;  %1347 = vmatprep.mubr.f32.mxu1 %v4023_v3  ;;  %v60_v55 = vld [vmem:[%s6914_s0 + $0x148] sm:$0xff]  ;;  %v3907_v60 = vpack.c.bf16 %v247_v53, %v183_v52  ;;  %v257_v45 = vld [vmem:[%s6914_s0 + $0x770] sm:$0xff]  ;;  %v134_v48 = vld [vmem:[%s6914_s0 + $0x398] sm:$0xff] }
  0x3d   :  { %3717 = vmatmul.mubr.msk.f32.vlgmr.msra.gmra.mrb[24].mxu0 %vm275_vm0, %v4115_v29  ;;  %3878 = vmatprep.subr.bf16.mxu1 %v3877_v58  ;;  %v185_v58 = vld [vmem:[%s6914_s0 + $0x530] sm:$0xff]  ;;  %v3917_v63 = vpack.c.bf16 %v124_v56, %v60_v55  ;;  %v131_v52 = vld [vmem:[%s6914_s0 + $0x380] sm:$0xff]  ;;  %v260_v55 = vld [vmem:[%s6914_s0 + $0x788] sm:$0xff] }
  0x3e   :  { %3872 = vmatpush1.bf16.msra.mxu0 %v3871_v61  ;;  %1276 = vmatprep.mubr.f32.mxu0 %v4023_v3  ;;  %v62_v61 = vld [vmem:[%s6914_s0 + $0x158] sm:$0xff]  ;;  %v3915_v2 = vpack.c.bf16 %v249_v59, %v185_v58  ;;  %v133_v58 = vld [vmem:[%s6914_s0 + $0x390] sm:$0xff] }
  0x3f   :  { %3719 = vmatmul.mubr.msk.f32.vlgmr.msra.gmra.mrb[24].mxu1 %vm275_vm0, %v4115_v29  ;;  %3874 = vmatprep.subr.bf16.mxu0 %v3873_v0  ;;  %v59_v0 = vld [vmem:[%s6914_s0 + $0x140] sm:$0xff]  ;;  %v3925_v6 = vpack.c.bf16 %v126_v62, %v62_v61  ;;  %v262_v61 = vld [vmem:[%s6914_s0 + $0x798] sm:$0xff] }
  0x40   :  { %3880 = vmatpush1.bf16.msra.mxu1 %v3879_v4  ;;  %1353 = vmatprep.mubr.f32.mxu1 %v4023_v3  ;;  %v188_v4 = vld [vmem:[%s6914_s0 + $0x548] sm:$0xff]  ;;  %v3919_v9 = vpack.c.bf16 %v123_v1, %v59_v0  ;;  %v259_v0 = vld [vmem:[%s6914_s0 + $0x780] sm:$0xff] }
  0x41   :  { %3718 = vmatmul.mubr.msk.f32.gmra.mrb[26].mxu0 %vm275_vm0, %v4165_v50  ;;  %3882 = vmatprep.subr.bf16.mxu1 %v3881_v7  ;;  %v61_v7 = vld [vmem:[%s6914_s0 + $0x150] sm:$0xff]  ;;  %v3921_v12 = vpack.c.bf16 %v252_v5, %v188_v4  ;;  %v136_v4 = vld [vmem:[%s6914_s0 + $0x3a8] sm:$0xff] }
  0x42   :  { %3876 = vmatpush1.bf16.msra.mxu0 %v3875_v10  ;;  %1424 = vmatprep.mubr.f32.mxu0 %v4023_v3  ;;  %v190_v10 = vld [vmem:[%s6914_s0 + $0x558] sm:$0xff]  ;;  %v3927_v15 = vpack.c.bf16 %v125_v8, %v61_v7  ;;  %v261_v7 = vld [vmem:[%s6914_s0 + $0x790] sm:$0xff] }
  0x43   :  { %3720 = vmatmul.mubr.msk.f32.gmra.mrb[26].mxu1 %vm275_vm0, %v4165_v50  ;;  %3886 = vmatprep.subr.bf16.mxu0 %v3885_v13  ;;  %v187_v13 = vld [vmem:[%s6914_s0 + $0x540] sm:$0xff]  ;;  %v3929_v18 = vpack.c.bf16 %v254_v11, %v190_v10  ;;  %v138_v10 = vld [vmem:[%s6914_s0 + $0x3b8] sm:$0xff] }
  0x44   :  { %3884 = vmatpush1.bf16.msra.mxu1 %v3883_v16  ;;  %1501 = vmatprep.mubr.f32.mxu1 %v4023_v3  ;;  %v64_v16 = vld [vmem:[%s6914_s0 + $0x168] sm:$0xff]  ;;  %v3923_v21 = vpack.c.bf16 %v251_v14, %v187_v13  ;;  %v135_v13 = vld [vmem:[%s6914_s0 + $0x3a0] sm:$0xff] }
  0x45   :  { %3721 = vmatmul.mubr.msk.f32.vlgmr.msra.gmra.mrb[28].mxu0 %vm275_vm0, %v4115_v29  ;;  %3894 = vmatprep.subr.bf16.mxu1 %v3893_v19  ;;  %v189_v19 = vld [vmem:[%s6914_s0 + $0x550] sm:$0xff]  ;;  %v3933_v24 = vpack.c.bf16 %v128_v17, %v64_v16  ;;  %v264_v16 = vld [vmem:[%s6914_s0 + $0x7a8] sm:$0xff] }
  0x46   :  { %3888 = vmatpush1.bf16.msra.mxu0 %v3887_v22  ;;  %1430 = vmatprep.mubr.f32.mxu0 %v4023_v3  ;;  %v66_v22 = vld [vmem:[%s6914_s0 + $0x178] sm:$0xff]  ;;  %v3931_v27 = vpack.c.bf16 %v253_v20, %v189_v19  ;;  %v137_v19 = vld [vmem:[%s6914_s0 + $0x3b0] sm:$0xff] }
  0x47   :  { %3723 = vmatmul.mubr.msk.f32.vlgmr.msra.gmra.mrb[28].mxu1 %vm275_vm0, %v4115_v29  ;;  %3890 = vmatprep.subr.bf16.mxu0 %v3889_v25  ;;  %v63_v25 = vld [vmem:[%s6914_s0 + $0x160] sm:$0xff]  ;;  %v3941_v31 = vpack.c.bf16 %v130_v23, %v66_v22  ;;  %v266_v22 = vld [vmem:[%s6914_s0 + $0x7b8] sm:$0xff] }
  0x48   :  { %3896 = vmatpush1.bf16.msra.mxu1 %v3895_v28  ;;  %1507 = vmatprep.mubr.f32.mxu1 %v4023_v3  ;;  %v192_v28 = vld [vmem:[%s6914_s0 + $0x568] sm:$0xff]  ;;  %v3935_v34 = vpack.c.bf16 %v127_v26, %v63_v25  ;;  %v263_v25 = vld [vmem:[%s6914_s0 + $0x7a0] sm:$0xff] }
  0x49   :  { %3722 = vmatmul.mubr.msk.f32.gmra.mrb[30].mxu0 %vm275_vm0, %v4165_v50  ;;  %3898 = vmatprep.subr.bf16.mxu1 %v3897_v32  ;;  %v65_v32 = vld [vmem:[%s6914_s0 + $0x170] sm:$0xff]  ;;  %v3937_v37 = vpack.c.bf16 %v256_v30, %v192_v28  ;;  %v140_v28 = vld [vmem:[%s6914_s0 + $0x3c8] sm:$0xff] }
  0x4a   :  { %3892 = vmatpush1.bf16.msra.mxu0 %v3891_v35  ;;  %1578 = vmatprep.mubr.f32.mxu0 %v4023_v3  ;;  %v194_v35 = vld [vmem:[%s6914_s0 + $0x578] sm:$0xff]  ;;  %v3943_v40 = vpack.c.bf16 %v129_v33, %v65_v32  ;;  %v265_v32 = vld [vmem:[%s6914_s0 + $0x7b0] sm:$0xff] }
  0x4b   :  { %3724 = vmatmul.mubr.msk.f32.gmra.mrb[30].mxu1 %vm275_vm0, %v4165_v50  ;;  %3902 = vmatprep.subr.bf16.mxu0 %v3901_v38  ;;  %v191_v38 = vld [vmem:[%s6914_s0 + $0x560] sm:$0xff]  ;;  %v3945_v43 = vpack.c.bf16 %v258_v36, %v194_v35 }
  0x4c   :  { %3900 = vmatpush1.bf16.msra.mxu1 %v3899_v41  ;;  %1655 = vmatprep.mubr.f32.mxu1 %v4023_v3  ;;  %v68_v41 = vld [vmem:[%s6914_s0 + $0x188] sm:$0xff]  ;;  %v3939_v46 = vpack.c.bf16 %v255_v39, %v191_v38  ;;  %v4896_v35 = vld [vmem:[%s6915_s1] sm:$0xff] }
  0x4d   :  { %3725 = vmatmul.mubr.msk.f32.vlgmr.msra.gmra.mrb[32].mxu0 %vm275_vm0, %v4115_v29  ;;  %3910 = vmatprep.subr.bf16.mxu1 %v3909_v44  ;;  %v193_v44 = vld [vmem:[%s6914_s0 + $0x570] sm:$0xff]  ;;  %v3949_v49 = vpack.c.bf16 %v132_v42, %v68_v41  ;;  %v139_v38 = vld [vmem:[%s6914_s0 + $0x3c0] sm:$0xff]  ;;  %v268_v41 = vld [vmem:[%s6914_s0 + $0x7c8] sm:$0xff] }
  0x4e   :  { %3904 = vmatpush1.bf16.msra.mxu0 %v3903_v47  ;;  %1584 = vmatprep.mubr.f32.mxu0 %v4023_v3  ;;  %v70_v47 = vld [vmem:[%s6914_s0 + $0x198] sm:$0xff]  ;;  %v3947_v53 = vpack.c.bf16 %v257_v45, %v193_v44  ;;  %v141_v44 = vld [vmem:[%s6914_s0 + $0x3d0] sm:$0xff] }
  0x4f   :  { %3727 = vmatmul.mubr.msk.f32.vlgmr.msra.gmra.mrb[32].mxu1 %vm275_vm0, %v4115_v29  ;;  %3906 = vmatprep.subr.bf16.mxu0 %v3905_v51  ;;  %v67_v51 = vld [vmem:[%s6914_s0 + $0x180] sm:$0xff]  ;;  %v3957_v56 = vpack.c.bf16 %v134_v48, %v70_v47  ;;  %v270_v47 = vld [vmem:[%s6914_s0 + $0x7d8] sm:$0xff] }
  0x50   :  { %3912 = vmatpush1.bf16.msra.mxu1 %v3911_v54  ;;  %1661 = vmatprep.mubr.f32.mxu1 %v4023_v3  ;;  %v196_v54 = vld [vmem:[%s6914_s0 + $0x588] sm:$0xff]  ;;  %v3951_v59 = vpack.c.bf16 %v131_v52, %v67_v51  ;;  %v267_v51 = vld [vmem:[%s6914_s0 + $0x7c0] sm:$0xff] }
  0x51   :  { %3726 = vmatmul.mubr.msk.f32.gmra.mrb[34].mxu0 %vm275_vm0, %v4165_v50  ;;  %3914 = vmatprep.subr.bf16.mxu1 %v3913_v57  ;;  %v69_v57 = vld [vmem:[%s6914_s0 + $0x190] sm:$0xff]  ;;  %v3953_v62 = vpack.c.bf16 %v260_v55, %v196_v54 }
  0x52   :  { %3908 = vmatpush1.bf16.msra.mxu0 %v3907_v60  ;;  %1732 = vmatprep.mubr.f32.mxu0 %v4023_v3  ;;  %v198_v60 = vld [vmem:[%s6914_s0 + $0x598] sm:$0xff]  ;;  %v3959_v1 = vpack.c.bf16 %v133_v58, %v69_v57  ;;  %v205_v55 = vld [vmem:[%s6914_s0 + $0x5d0] sm:$0xff] }
  0x53   :  { %3728 = vmatmul.mubr.msk.f32.gmra.mrb[34].mxu1 %vm275_vm0, %v4165_v50  ;;  %3918 = vmatprep.subr.bf16.mxu0 %v3917_v63  ;;  %v195_v63 = vld [vmem:[%s6914_s0 + $0x580] sm:$0xff]  ;;  %v3961_v5 = vpack.c.bf16 %v262_v61, %v198_v60  ;;  %v82_v58 = vld [vmem:[%s6914_s0 + $0x1f8] sm:$0xff] }
  0x54   :  { %3916 = vmatpush1.bf16.msra.mxu1 %v3915_v2  ;;  %1809 = vmatprep.mubr.f32.mxu1 %v4023_v3  ;;  %v72_v2 = vld [vmem:[%s6914_s0 + $0x1a8] sm:$0xff]  ;;  %v3955_v8 = vpack.c.bf16 %v259_v0, %v195_v63  ;;  %v79_v61 = vld [vmem:[%s6914_s0 + $0x1e0] sm:$0xff] }
  0x55   :  { %3729 = vmatmul.mubr.msk.f32.vlgmr.msra.gmra.mrb[36].mxu0 %vm275_vm0, %v4115_v29  ;;  %3926 = vmatprep.subr.bf16.mxu1 %v3925_v6  ;;  %v197_v6 = vld [vmem:[%s6914_s0 + $0x590] sm:$0xff]  ;;  %v3965_v11 = vpack.c.bf16 %v136_v4, %v72_v2  ;;  %v208_v0 = vld [vmem:[%s6914_s0 + $0x5e8] sm:$0xff] }
  0x56   :  { %3920 = vmatpush1.bf16.msra.mxu0 %v3919_v9  ;;  %1738 = vmatprep.mubr.f32.mxu0 %v4023_v3  ;;  %v74_v9 = vld [vmem:[%s6914_s0 + $0x1b8] sm:$0xff]  ;;  %v3963_v14 = vpack.c.bf16 %v261_v7, %v197_v6  ;;  %v4022_v2 = vld [vmem:[%s6915_s1 + $0x8] sm:$0xff]  ;;  %v145_v6 = vld [vmem:[%s6914_s0 + $0x3f0] sm:$0xff] }
  0x57   :  { %3731 = vmatmul.mubr.msk.f32.vlgmr.msra.gmra.mrb[36].mxu1 %vm275_vm0, %v4115_v29  ;;  %3922 = vmatprep.subr.bf16.mxu0 %v3921_v12  ;;  %v71_v12 = vld [vmem:[%s6914_s0 + $0x1a0] sm:$0xff]  ;;  %v3973_v17 = vpack.c.bf16 %v138_v10, %v74_v9  ;;  %v274_v9 = vld [vmem:[%s6914_s0 + $0x7f8] sm:$0xff] }
  0x58   :  { %3928 = vmatpush1.bf16.msra.mxu1 %v3927_v15  ;;  %1815 = vmatprep.mubr.f32.mxu1 %v4023_v3  ;;  %v200_v15 = vld [vmem:[%s6914_s0 + $0x5a8] sm:$0xff]  ;;  %v3967_v20 = vpack.c.bf16 %v135_v13, %v71_v12  ;;  %v271_v12 = vld [vmem:[%s6914_s0 + $0x7e0] sm:$0xff] }
  0x59   :  { %3730 = vmatmul.mubr.msk.f32.gmra.mrb[38].mxu0 %vm275_vm0, %v4165_v50  ;;  %3930 = vmatprep.subr.bf16.mxu1 %v3929_v18  ;;  %v73_v18 = vld [vmem:[%s6914_s0 + $0x1b0] sm:$0xff]  ;;  %v3969_v23 = vpack.c.bf16 %v264_v16, %v200_v15 }
  0x5a   :  { %3924 = vmatpush1.bf16.msra.mxu0 %v3923_v21  ;;  %1886 = vmatprep.mubr.f32.mxu0 %v4023_v3  ;;  %v202_v21 = vld [vmem:[%s6914_s0 + $0x5b8] sm:$0xff]  ;;  %v3975_v26 = vpack.c.bf16 %v137_v19, %v73_v18  ;;  %v209_v15 = vld [vmem:[%s6914_s0 + $0x5f0] sm:$0xff] }
  0x5b   :  { %3732 = vmatmul.mubr.msk.f32.gmra.mrb[38].mxu1 %vm275_vm0, %v4165_v50  ;;  %3934 = vmatprep.subr.bf16.mxu0 %v3933_v24  ;;  %v199_v24 = vld [vmem:[%s6914_s0 + $0x5a0] sm:$0xff]  ;;  %v3977_v30 = vpack.c.bf16 %v266_v22, %v202_v21  ;;  %v273_v16 = vld [vmem:[%s6914_s0 + $0x7f0] sm:$0xff] }
  0x5c   :  { %3932 = vmatpush1.bf16.msra.mxu1 %v3931_v27  ;;  %1963 = vmatprep.mubr.f32.mxu1 %v4023_v3  ;;  %v76_v27 = vld [vmem:[%s6914_s0 + $0x1c8] sm:$0xff]  ;;  %v3971_v33 = vpack.c.bf16 %v263_v25, %v199_v24  ;;  %v4011_v18 = vpack.c.bf16 %v273_v16, %v209_v15 }
  0x5d   :  { %3733 = vmatmul.mubr.msk.f32.vlgmr.msra.gmra.mrb[40].mxu0 %vm275_vm0, %v4115_v29  ;;  %3942 = vmatprep.subr.bf16.mxu1 %v3941_v31  ;;  %v201_v31 = vld [vmem:[%s6914_s0 + $0x5b0] sm:$0xff]  ;;  %v3981_v36 = vpack.c.bf16 %v140_v28, %v76_v27 }
  0x5e   :  { %3936 = vmatpush1.bf16.msra.mxu0 %v3935_v34  ;;  %1892 = vmatprep.mubr.f32.mxu0 %v4023_v3  ;;  %v78_v34 = vld [vmem:[%s6914_s0 + $0x1d8] sm:$0xff]  ;;  %v3979_v39 = vpack.c.bf16 %v265_v32, %v201_v31 }
  0x5f   :  { %3735 = vmatmul.mubr.msk.f32.vlgmr.msra.gmra.mrb[40].mxu1 %vm275_vm0, %v4115_v29  ;;  %3938 = vmatprep.subr.bf16.mxu0 %v3937_v37  ;;  %v75_v37 = vld [vmem:[%s6914_s0 + $0x1c0] sm:$0xff] }
  0x60   :  { %3944 = vmatpush1.bf16.msra.mxu1 %v3943_v40  ;;  %1969 = vmatprep.mubr.f32.mxu1 %v4023_v3  ;;  %v204_v40 = vld [vmem:[%s6914_s0 + $0x5c8] sm:$0xff]  ;;  %v3983_v45 = vpack.c.bf16 %v139_v38, %v75_v37 }
  0x61   :  { %3734 = vmatmul.mubr.msk.f32.gmra.mrb[42].mxu0 %vm275_vm0, %v4165_v50  ;;  %3946 = vmatprep.subr.bf16.mxu1 %v3945_v43  ;;  %v77_v43 = vld [vmem:[%s6914_s0 + $0x1d0] sm:$0xff]  ;;  %v3985_v48 = vpack.c.bf16 %v268_v41, %v204_v40 }
  0x62   :  { %3940 = vmatpush1.bf16.msra.mxu0 %v3939_v46  ;;  %2040 = vmatprep.mubr.f32.mxu0 %v4023_v3  ;;  %v206_v46 = vld [vmem:[%s6914_s0 + $0x5d8] sm:$0xff]  ;;  %v3991_v52 = vpack.c.bf16 %v141_v44, %v77_v43 }
  0x63   :  { %3736 = vmatmul.mubr.msk.f32.gmra.mrb[42].mxu1 %vm275_vm0, %v4165_v50  ;;  %3950 = vmatprep.subr.bf16.mxu0 %v3949_v49  ;;  %v203_v49 = vld [vmem:[%s6914_s0 + $0x5c0] sm:$0xff]  ;;  %v3993_v54 = vpack.c.bf16 %v270_v47, %v206_v46 }
  0x64   :  { %3948 = vmatpush1.bf16.msra.mxu1 %v3947_v53  ;;  %2117 = vmatprep.mubr.f32.mxu1 %v4023_v3  ;;  %v80_v53 = vld [vmem:[%s6914_s0 + $0x1e8] sm:$0xff]  ;;  %v3987_v57 = vpack.c.bf16 %v267_v51, %v203_v49 }
  0x65   :  { %3737 = vmatmul.mubr.msk.f32.vlgmr.msra.gmra.mrb[44].mxu0 %vm275_vm0, %v4115_v29  ;;  %3958 = vmatprep.subr.bf16.mxu1 %v3957_v56  ;;  %v269_v56 = vld [vmem:[%s6914_s0 + $0x7d0] sm:$0xff] }
  0x66   :  { %3952 = vmatpush1.bf16.msra.mxu0 %v3951_v59  ;;  %2046 = vmatprep.mubr.f32.mxu0 %v4023_v3  ;;  %v146_v59 = vld [vmem:[%s6914_s0 + $0x3f8] sm:$0xff]  ;;  %v3995_v63 = vpack.c.bf16 %v269_v56, %v205_v55 }
  0x67   :  { %3739 = vmatmul.mubr.msk.f32.vlgmr.msra.gmra.mrb[44].mxu1 %vm275_vm0, %v4115_v29  ;;  %3954 = vmatprep.subr.bf16.mxu0 %v3953_v62  ;;  %v143_v62 = vld [vmem:[%s6914_s0 + $0x3e0] sm:$0xff]  ;;  %v4005_v4 = vpack.c.bf16 %v146_v59, %v82_v58 }
  0x68   :  { %3960 = vmatpush1.bf16.msra.mxu1 %v3959_v1  ;;  %2123 = vmatprep.mubr.f32.mxu1 %v4023_v3  ;;  %v272_v1 = vld [vmem:[%s6914_s0 + $0x7e8] sm:$0xff]  ;;  %v3999_v7 = vpack.c.bf16 %v143_v62, %v79_v61 }
  0x69   :  { %3738 = vmatmul.mubr.msk.f32.gmra.mrb[46].mxu0 %vm275_vm0, %v4165_v50  ;;  %3962 = vmatprep.subr.bf16.mxu1 %v3961_v5  ;;  %v81_v5 = vld [vmem:[%s6914_s0 + $0x1f0] sm:$0xff]  ;;  %v4001_v10 = vpack.c.bf16 %v272_v1, %v208_v0 }
  0x6a   :  { %3956 = vmatpush1.bf16.msra.mxu0 %v3955_v8  ;;  %2194 = vmatprep.mubr.f32.mxu0 %v4023_v3  ;;  %v210_v8 = vld [vmem:[%s6914_s0 + $0x5f8] sm:$0xff]  ;;  %v4007_v13 = vpack.c.bf16 %v145_v6, %v81_v5 }
  0x6b   :  { %3740 = vmatmul.mubr.msk.f32.gmra.mrb[46].mxu1 %vm275_vm0, %v4165_v50  ;;  %3966 = vmatprep.subr.bf16.mxu0 %v3965_v11  ;;  %v207_v11 = vld [vmem:[%s6914_s0 + $0x5e0] sm:$0xff] }
  0x6c   :  { %3964 = vmatpush1.bf16.msra.mxu1 %v3963_v14  ;;  %2271 = vmatprep.mubr.f32.mxu1 %v4023_v3  ;;  %v4009_v14 = vpack.c.bf16 %v274_v9, %v210_v8 }
  0x6d   :  { %3741 = vmatmul.mubr.msk.f32.vlgmr.msra.gmra.mrb[48].mxu0 %vm275_vm0, %v4115_v29  ;;  %3974 = vmatprep.subr.bf16.mxu1 %v3973_v17  ;;  %v142_v29 = vld [vmem:[%s6914_s0 + $0x3d8] sm:$0xff]  ;;  %v4003_v17 = vpack.c.bf16 %v271_v12, %v207_v11 }
  0x6e   :  { %3968 = vmatpush1.bf16.msra.mxu0 %v3967_v20  ;;  %2200 = vmatprep.mubr.f32.mxu0 %v4023_v3  ;;  %v3989_v42 = vpack.c.bf16 %v142_v29, %v78_v34 }
  0x6f   :  { %3743 = vmatmul.mubr.msk.f32.vlgmr.msra.gmra.mrb[48].mxu1 %vm275_vm0, %v4896_v35  ;;  %3970 = vmatprep.subr.bf16.mxu0 %v3969_v23 }
  0x70   :  { %3976 = vmatpush1.bf16.msra.mxu1 %v3975_v26  ;;  %2277 = vmatprep.mubr.f32.mxu1 %v4023_v3 }
  0x71   :  { %3742 = vmatmul.mubr.msk.f32.gmra.mrb[50].mxu0 %vm275_vm0, %v4165_v50  ;;  %3978 = vmatprep.subr.bf16.mxu1 %v3977_v30 }
  0x72   :  { %3972 = vmatpush1.bf16.msra.mxu0 %v3971_v33  ;;  %2348 = vmatprep.mubr.f32.mxu0 %v4023_v3 }
  0x73   :  { %3744 = vmatmul.mubr.msk.f32.gmra.mrb[50].mxu1 %vm275_vm0, %v4165_v50  ;;  %3982 = vmatprep.subr.bf16.mxu0 %v3981_v36  ;;  %v144_v50 = vld [vmem:[%s6914_s0 + $0x3e8] sm:$0xff] }
  0x74   :  { %3980 = vmatpush1.bf16.msra.mxu1 %v3979_v39  ;;  %2425 = vmatprep.mubr.f32.mxu1 %v4023_v3  ;;  %v3997_v60 = vpack.c.bf16 %v144_v50, %v80_v53 }
  0x75   :  { %3745 = vmatmul.mubr.msk.f32.vlgmr.msra.gmra.mrb[52].mxu0 %vm275_vm0, %v4896_v35  ;;  %3990 = vmatprep.subr.bf16.mxu1 %v3989_v42 }
  0x76   :  { %3984 = vmatpush1.bf16.msra.mxu0 %v3983_v45  ;;  %2354 = vmatprep.mubr.f32.mxu0 %v4023_v3 }
  0x77   :  { %3747 = vmatmul.mubr.msk.f32.vlgmr.msra.gmra.mrb[52].mxu1 %vm275_vm0, %v4896_v35  ;;  %3986 = vmatprep.subr.bf16.mxu0 %v3985_v48 }
  0x78   :  { %3992 = vmatpush1.bf16.msra.mxu1 %v3991_v52  ;;  %2431 = vmatprep.mubr.f32.mxu1 %v4023_v3 }
  0x79   :  { %3746 = vmatmul.mubr.msk.f32.gmra.mrb[54].mxu0 %vm275_vm0, %v4022_v2  ;;  %3994 = vmatprep.subr.bf16.mxu1 %v3993_v54 }
  0x7a   :  { %3988 = vmatpush1.bf16.msra.mxu0 %v3987_v57  ;;  %2502 = vmatprep.mubr.f32.mxu0 %v4023_v3 }
  0x7b   :  { %3748 = vmatmul.mubr.msk.f32.gmra.mrb[54].mxu1 %vm275_vm0, %v4022_v2  ;;  %3998 = vmatprep.subr.bf16.mxu0 %v3997_v60 }
  0x7c   :  { %3996 = vmatpush1.bf16.msra.mxu1 %v3995_v63  ;;  %2579 = vmatprep.mubr.f32.mxu1 %v4023_v3 }
  0x7d   :  { %3749 = vmatmul.mubr.msk.f32.vlgmr.msra.gmra.mrb[56].mxu0 %vm275_vm0, %v4896_v35  ;;  %4006 = vmatprep.subr.bf16.mxu1 %v4005_v4 }
  0x7e   :  { %4000 = vmatpush1.bf16.msra.mxu0 %v3999_v7  ;;  %2508 = vmatprep.mubr.f32.mxu0 %v4023_v3 }
  0x7f   :  { %3751 = vmatmul.mubr.msk.f32.vlgmr.msra.gmra.mrb[56].mxu1 %vm275_vm0, %v4896_v35  ;;  %4002 = vmatprep.subr.bf16.mxu0 %v4001_v10 }
  0x80   :  { %4008 = vmatpush1.bf16.msra.mxu1 %v4007_v13  ;;  %2585 = vmatprep.mubr.f32.mxu1 %v4023_v3 }
  0x81   :  { %3750 = vmatmul.mubr.msk.f32.gmra.mrb[58].mxu0 %vm275_vm0, %v4022_v2  ;;  %4010 = vmatprep.subr.bf16.mxu1 %v4009_v14 }
  0x82   :  { %4004 = vmatpush1.bf16.msra.mxu0 %v4003_v17  ;;  %2656 = vmatprep.mubr.f32.mxu0 %v4023_v3 }
  0x83   :  { %3752 = vmatmul.mubr.msk.f32.gmra.mrb[58].mxu1 %vm275_vm0, %v4022_v2 }
  0x84   :  { %4012 = vmatpush1.bf16.msra.mxu1 %v4011_v18  ;;  %2733 = vmatprep.mubr.f32.mxu1 %v4023_v3 }
  0x85   :  { %3753 = vmatmul.mubr.msk.f32.vlgmr.msra.gmra.mrb[60].mxu0 %vm275_vm0, %v4896_v35 }
  0x86   :  { %2662 = vmatprep.mubr.f32.mxu0 %v4023_v3 }
  0x87   :  { %3755 = vmatmul.mubr.msk.f32.vlgmr.msra.gmra.mrb[60].mxu1 %vm275_vm0, %v4896_v35 }
  0x88   :  { %2739 = vmatprep.mubr.f32.mxu1 %v4023_v3 }
  0x89   :  { %3754 = vmatmul.mubr.msk.f32.gmra.mrb[62].mxu0 %vm275_vm0, %v4022_v2 }
  0x8b   :  { %3756 = vmatmul.mubr.msk.f32.gmra.mrb[62].mxu1 %vm275_vm0, %v4022_v2 }
  0xe0   :  { %v5022_v19 = vpop.f32.mrb[0].mxu0 }
  0xe1   :  { %v2876_v20 = vmul.f32 %v5022_v19, %v5022_v19  ;;  %v5026_v21 = vpop.f32.mrb[1].mxu0 }
  0xe2   :  { %v2746_v22 = vadd.f32 %v5026_v21, %v5022_v19  ;;  %v2877_v23 = vmul.f32 %v5026_v21, %v5026_v21  ;;  %v5032_v24 = vpop.f32.mrb[0].mxu1 }
  0xe3   :  { %v2878_v3 = vmul.f32 %v5032_v24, %v5032_v24  ;;  %v5036_v25 = vpop.f32.mrb[1].mxu1 }
  0xe4   :  { %v3004_v26 = vadd.f32 %v2877_v23, %v2876_v20  ;;  %v2747_v27 = vadd.f32 %v2746_v22, %v5032_v24  ;;  %v5039_v28 = vpop.f32.mrb[2].mxu0  ;;  %v2879_v30 = vmul.f32 %v5036_v25, %v5036_v25 }
  0xe5   :  { %7021 = vst [vmem:[#allocation2_spill] sm:$0xff] %v5039_v28  ;;  %v2940_v31 = vmul.f32 %v5039_v28, %v5039_v28  ;;  %v5045_v32 = vpop.f32.mrb[3].mxu0 }
  0xe6   :  { %7022 = vst [vmem:[#allocation3_spill] sm:$0xff] %v5045_v32  ;;  %v3005_v33 = vadd.f32 %v3004_v26, %v2878_v3  ;;  %v2811_v34 = vadd.f32 %v5045_v32, %v5039_v28  ;;  %v2941_v29 = vmul.f32 %v5045_v32, %v5045_v32  ;;  %v2748_v35 = vadd.f32 %v2747_v27, %v5036_v25  ;;  %v5052_v36 = vpop.f32.mrb[2].mxu1 }
  0xe7   :  { %7023 = vst [vmem:[#allocation4_spill] sm:$0xff] %v5052_v36  ;;  %v2942_v37 = vmul.f32 %v5052_v36, %v5052_v36  ;;  %v5056_v38 = vpop.f32.mrb[3].mxu1 }
  0xe8   :  { %7024 = vst [vmem:[#allocation5_spill] sm:$0xff] %v5056_v38  ;;  %v3069_v39 = vadd.f32 %v2941_v29, %v2940_v31  ;;  %v3006_v40 = vadd.f32 %v3005_v33, %v2879_v30  ;;  %v2812_v41 = vadd.f32 %v2811_v34, %v5052_v36  ;;  %v5059_v42 = vpop.f32.mrb[4].mxu0  ;;  %v2943_v43 = vmul.f32 %v5056_v38, %v5056_v38 }
  0xe9   :  { %v2749_v44 = vadd.f32 %v2748_v35, %v5059_v42  ;;  %v2880_v45 = vmul.f32 %v5059_v42, %v5059_v42  ;;  %v5066_v46 = vpop.f32.mrb[5].mxu0 }
  0xea   :  { %v3070_v47 = vadd.f32 %v3069_v39, %v2942_v37  ;;  %v2813_v48 = vadd.f32 %v2812_v41, %v5056_v38  ;;  %v2881_v49 = vmul.f32 %v5066_v46, %v5066_v46  ;;  %v5071_v51 = vpop.f32.mrb[4].mxu1 }
  0xeb   :  { %v3007_v52 = vadd.f32 %v3006_v40, %v2880_v45  ;;  %v2750_v53 = vadd.f32 %v2749_v44, %v5066_v46  ;;  %v2882_v50 = vmul.f32 %v5071_v51, %v5071_v51  ;;  %v5076_v54 = vpop.f32.mrb[5].mxu1 }
  0xec   :  { %v3071_v55 = vadd.f32 %v3070_v47, %v2943_v43  ;;  %v5078_v56 = vpop.f32.mrb[6].mxu0  ;;  %v2883_v63 = vmul.f32 %v5076_v54, %v5076_v54 }
  0xed   :  { %7025 = vst [vmem:[#allocation6_spill] sm:$0xff] %v5078_v56  ;;  %v3008_v57 = vadd.f32 %v3007_v52, %v2881_v49  ;;  %v2814_v58 = vadd.f32 %v2813_v48, %v5078_v56  ;;  %v2944_v59 = vmul.f32 %v5078_v56, %v5078_v56  ;;  %v2751_v60 = vadd.f32 %v2750_v53, %v5071_v51  ;;  %v5084_v61 = vpop.f32.mrb[7].mxu0 }
  0xee   :  { %7026 = vst [vmem:[#allocation7_spill] sm:$0xff] %v5084_v61  ;;  %v2945_v62 = vmul.f32 %v5084_v61, %v5084_v61  ;;  %v5090_v0 = vpop.f32.mrb[6].mxu1 }
  0xef   :  { %7027 = vst [vmem:[#allocation8_spill] sm:$0xff] %v5090_v0  ;;  %v3072_v1 = vadd.f32 %v3071_v55, %v2944_v59  ;;  %v3009_v2 = vadd.f32 %v3008_v57, %v2882_v50  ;;  %v2815_v4 = vadd.f32 %v2814_v58, %v5084_v61  ;;  %v2752_v5 = vadd.f32 %v2751_v60, %v5076_v54  ;;  %v5094_v6 = vpop.f32.mrb[7].mxu1 }
  0xf0   :  { %7028 = vst [vmem:[#allocation9_spill] sm:$0xff] %v5094_v6  ;;  %v2946_v7 = vmul.f32 %v5090_v0, %v5090_v0  ;;  %v5098_v8 = vpop.f32.mrb[8].mxu0  ;;  %v2947_v20 = vmul.f32 %v5094_v6, %v5094_v6 }
  0xf1   :  { %v3073_v9 = vadd.f32 %v3072_v1, %v2945_v62  ;;  %v3010_v10 = vadd.f32 %v3009_v2, %v2883_v63  ;;  %v2816_v11 = vadd.f32 %v2815_v4, %v5090_v0  ;;  %v2753_v12 = vadd.f32 %v2752_v5, %v5098_v8  ;;  %v5102_v13 = vpop.f32.mrb[9].mxu0 }
  0xf2   :  { %v2884_v14 = vmul.f32 %v5098_v8, %v5098_v8  ;;  %v2885_v15 = vmul.f32 %v5102_v13, %v5102_v13  ;;  %v5108_v16 = vpop.f32.mrb[8].mxu1 }
  0xf3   :  { %v3074_v17 = vadd.f32 %v3073_v9, %v2946_v7  ;;  %v2817_v18 = vadd.f32 %v2816_v11, %v5094_v6  ;;  %v2754_v22 = vadd.f32 %v2753_v12, %v5102_v13  ;;  %v5114_v23 = vpop.f32.mrb[9].mxu1  ;;  %v2886_v27 = vmul.f32 %v5108_v16, %v5108_v16 }
  0xf4   :  { %v3011_v3 = vadd.f32 %v3010_v10, %v2884_v14  ;;  %v5116_v26 = vpop.f32.mrb[10].mxu0  ;;  %v2887_v48 = vmul.f32 %v5114_v23, %v5114_v23 }
  0xf5   :  { %7029 = vst [vmem:[#allocation10_spill] sm:$0xff] %v5116_v26  ;;  %v3075_v30 = vadd.f32 %v3074_v17, %v2947_v20  ;;  %v2818_v31 = vadd.f32 %v2817_v18, %v5116_v26  ;;  %v2948_v33 = vmul.f32 %v5116_v26, %v5116_v26  ;;  %v2755_v34 = vadd.f32 %v2754_v22, %v5108_v16  ;;  %v5124_v29 = vpop.f32.mrb[11].mxu0 }
  0xf6   :  { %7030 = vst [vmem:[#allocation11_spill] sm:$0xff] %v5124_v29  ;;  %v3012_v35 = vadd.f32 %v3011_v3, %v2885_v15  ;;  %v2949_v37 = vmul.f32 %v5124_v29, %v5124_v29  ;;  %v5128_v39 = vpop.f32.mrb[10].mxu1 }
  0xf7   :  { %7031 = vst [vmem:[#allocation12_spill] sm:$0xff] %v5128_v39  ;;  %v3076_v40 = vadd.f32 %v3075_v30, %v2948_v33  ;;  %v2819_v41 = vadd.f32 %v2818_v31, %v5124_v29  ;;  %v2756_v43 = vadd.f32 %v2755_v34, %v5114_v23  ;;  %v2950_v44 = vmul.f32 %v5128_v39, %v5128_v39  ;;  %v5134_v45 = vpop.f32.mrb[11].mxu1 }
  0xf8   :  { %7032 = vst [vmem:[#allocation13_spill] sm:$0xff] %v5134_v45  ;;  %v3013_v47 = vadd.f32 %v3012_v35, %v2886_v27  ;;  %v5138_v49 = vpop.f32.mrb[12].mxu0  ;;  %v2951_v1 = vmul.f32 %v5134_v45, %v5134_v45 }
  0xf9   :  { %v3077_v52 = vadd.f32 %v3076_v40, %v2949_v37  ;;  %v2820_v53 = vadd.f32 %v2819_v41, %v5128_v39  ;;  %v2757_v50 = vadd.f32 %v2756_v43, %v5138_v49  ;;  %v2888_v55 = vmul.f32 %v5138_v49, %v5138_v49  ;;  %v5144_v57 = vpop.f32.mrb[13].mxu0 }
  0xfa   :  { %v3014_v58 = vadd.f32 %v3013_v47, %v2887_v48  ;;  %v2889_v59 = vmul.f32 %v5144_v57, %v5144_v57  ;;  %v5148_v60 = vpop.f32.mrb[12].mxu1 }
  0xfb   :  { %v3078_v62 = vadd.f32 %v3077_v52, %v2950_v44  ;;  %v2821_v63 = vadd.f32 %v2820_v53, %v5134_v45  ;;  %v2758_v2 = vadd.f32 %v2757_v50, %v5144_v57  ;;  %v5154_v4 = vpop.f32.mrb[13].mxu1  ;;  %v2890_v9 = vmul.f32 %v5148_v60, %v5148_v60 }
  0xfc   :  { %v3015_v5 = vadd.f32 %v3014_v58, %v2888_v55  ;;  %v5156_v7 = vpop.f32.mrb[14].mxu0  ;;  %v2891_v34 = vmul.f32 %v5154_v4, %v5154_v4 }
  0xfd   :  { %7033 = vst [vmem:[#allocation14_spill] sm:$0xff] %v5156_v7  ;;  %v3079_v10 = vadd.f32 %v3078_v62, %v2951_v1  ;;  %v2822_v11 = vadd.f32 %v2821_v63, %v5156_v7  ;;  %v2952_v12 = vmul.f32 %v5156_v7, %v5156_v7  ;;  %v2759_v14 = vadd.f32 %v2758_v2, %v5148_v60  ;;  %v5164_v15 = vpop.f32.mrb[15].mxu0 }
  0xfe   :  { %7034 = vst [vmem:[#allocation15_spill] sm:$0xff] %v5164_v15  ;;  %v3016_v17 = vadd.f32 %v3015_v5, %v2889_v59  ;;  %v2953_v18 = vmul.f32 %v5164_v15, %v5164_v15  ;;  %v5168_v20 = vpop.f32.mrb[14].mxu1 }
  0xff   :  { %7035 = vst [vmem:[#allocation16_spill] sm:$0xff] %v5168_v20  ;;  %v3080_v22 = vadd.f32 %v3079_v10, %v2952_v12  ;;  %v2823_v3 = vadd.f32 %v2822_v11, %v5164_v15  ;;  %v2760_v27 = vadd.f32 %v2759_v14, %v5154_v4  ;;  %v2954_v30 = vmul.f32 %v5168_v20, %v5168_v20  ;;  %v5174_v31 = vpop.f32.mrb[15].mxu1 }
 0x100   :  { %7036 = vst [vmem:[#allocation17_spill] sm:$0xff] %v5174_v31  ;;  %v3017_v33 = vadd.f32 %v3016_v17, %v2890_v9  ;;  %v5178_v35 = vpop.f32.mrb[16].mxu0  ;;  %v2955_v55 = vmul.f32 %v5174_v31, %v5174_v31 }
 0x101   :  { %v3081_v37 = vadd.f32 %v3080_v22, %v2953_v18  ;;  %v2824_v40 = vadd.f32 %v2823_v3, %v5168_v20  ;;  %v2761_v41 = vadd.f32 %v2760_v27, %v5178_v35  ;;  %v2892_v43 = vmul.f32 %v5178_v35, %v5178_v35  ;;  %v5184_v44 = vpop.f32.mrb[17].mxu0 }
 0x102   :  { %v3018_v47 = vadd.f32 %v3017_v33, %v2891_v34  ;;  %v2893_v48 = vmul.f32 %v5184_v44, %v5184_v44  ;;  %v5188_v52 = vpop.f32.mrb[16].mxu1 }
 0x103   :  { %v3082_v53 = vadd.f32 %v3081_v37, %v2954_v30  ;;  %v2825_v50 = vadd.f32 %v2824_v40, %v5174_v31  ;;  %v2762_v58 = vadd.f32 %v2761_v41, %v5184_v44  ;;  %v5194_v59 = vpop.f32.mrb[17].mxu1  ;;  %v2894_v1 = vmul.f32 %v5188_v52, %v5188_v52 }
 0x104   :  { %v3019_v62 = vadd.f32 %v3018_v47, %v2892_v43  ;;  %v5196_v63 = vpop.f32.mrb[18].mxu0  ;;  %v2895_v34 = vmul.f32 %v5194_v59, %v5194_v59 }
 0x105   :  { %7037 = vst [vmem:[#allocation18_spill] sm:$0xff] %v5196_v63  ;;  %v3083_v2 = vadd.f32 %v3082_v53, %v2955_v55  ;;  %v2826_v5 = vadd.f32 %v2825_v50, %v5196_v63  ;;  %v2956_v9 = vmul.f32 %v5196_v63, %v5196_v63  ;;  %v2763_v10 = vadd.f32 %v2762_v58, %v5188_v52  ;;  %v5204_v11 = vpop.f32.mrb[19].mxu0 }
 0x106   :  { %7038 = vst [vmem:[#allocation19_spill] sm:$0xff] %v5204_v11  ;;  %v3020_v12 = vadd.f32 %v3019_v62, %v2893_v48  ;;  %v2957_v14 = vmul.f32 %v5204_v11, %v5204_v11  ;;  %v5208_v17 = vpop.f32.mrb[18].mxu1 }
 0x107   :  { %7039 = vst [vmem:[#allocation20_spill] sm:$0xff] %v5208_v17  ;;  %v3084_v18 = vadd.f32 %v3083_v2, %v2956_v9  ;;  %v2827_v22 = vadd.f32 %v2826_v5, %v5204_v11  ;;  %v2764_v3 = vadd.f32 %v2763_v10, %v5194_v59  ;;  %v2958_v27 = vmul.f32 %v5208_v17, %v5208_v17  ;;  %v5214_v30 = vpop.f32.mrb[19].mxu1 }
 0x108   :  { %7040 = vst [vmem:[#allocation21_spill] sm:$0xff] %v5214_v30  ;;  %v3021_v33 = vadd.f32 %v3020_v12, %v2894_v1  ;;  %v5218_v37 = vpop.f32.mrb[20].mxu0  ;;  %v2959_v1 = vmul.f32 %v5214_v30, %v5214_v30 }
 0x109   :  { %v3085_v40 = vadd.f32 %v3084_v18, %v2957_v14  ;;  %v2828_v41 = vadd.f32 %v2827_v22, %v5208_v17  ;;  %v2765_v43 = vadd.f32 %v2764_v3, %v5218_v37  ;;  %v2896_v47 = vmul.f32 %v5218_v37, %v5218_v37  ;;  %v5224_v48 = vpop.f32.mrb[21].mxu0 }
 0x10a   :  { %v3022_v53 = vadd.f32 %v3021_v33, %v2895_v34  ;;  %v2897_v50 = vmul.f32 %v5224_v48, %v5224_v48  ;;  %v5228_v55 = vpop.f32.mrb[20].mxu1 }
 0x10b   :  { %v3086_v58 = vadd.f32 %v3085_v40, %v2958_v27  ;;  %v2829_v62 = vadd.f32 %v2828_v41, %v5214_v30  ;;  %v2766_v2 = vadd.f32 %v2765_v43, %v5224_v48  ;;  %v5234_v5 = vpop.f32.mrb[21].mxu1  ;;  %v2898_v12 = vmul.f32 %v5228_v55, %v5228_v55 }
 0x10c   :  { %v3023_v9 = vadd.f32 %v3022_v53, %v2896_v47  ;;  %v5236_v10 = vpop.f32.mrb[22].mxu0 }
 0x10d   :  { %7041 = vst [vmem:[#allocation22_spill] sm:$0xff] %v5236_v10  ;;  %v3087_v14 = vadd.f32 %v3086_v58, %v2959_v1  ;;  %v2830_v18 = vadd.f32 %v2829_v62, %v5236_v10  ;;  %v2960_v22 = vmul.f32 %v5236_v10, %v5236_v10  ;;  %v2767_v3 = vadd.f32 %v2766_v2, %v5228_v55  ;;  %v5244_v27 = vpop.f32.mrb[23].mxu0 }
 0x10e   :  { %7042 = vst [vmem:[#allocation23_spill] sm:$0xff] %v5244_v27  ;;  %v3024_v33 = vadd.f32 %v3023_v9, %v2897_v50  ;;  %v2961_v34 = vmul.f32 %v5244_v27, %v5244_v27  ;;  %v5248_v40 = vpop.f32.mrb[22].mxu1  ;;  %v2899_v1 = vmul.f32 %v5234_v5, %v5234_v5 }
 0x10f   :  { %7043 = vst [vmem:[#allocation24_spill] sm:$0xff] %v5248_v40  ;;  %v3088_v41 = vadd.f32 %v3087_v14, %v2960_v22  ;;  %v2831_v43 = vadd.f32 %v2830_v18, %v5244_v27  ;;  %v2768_v47 = vadd.f32 %v2767_v3, %v5234_v5  ;;  %v2962_v53 = vmul.f32 %v5248_v40, %v5248_v40  ;;  %v5254_v58 = vpop.f32.mrb[23].mxu1 }
 0x110   :  { %7044 = vst [vmem:[#allocation25_spill] sm:$0xff] %v5254_v58  ;;  %v3025_v62 = vadd.f32 %v3024_v33, %v2898_v12  ;;  %v5258_v50 = vpop.f32.mrb[24].mxu0 }
 0x111   :  { %v3089_v2 = vadd.f32 %v3088_v41, %v2961_v34  ;;  %v2832_v9 = vadd.f32 %v2831_v43, %v5248_v40  ;;  %v2769_v14 = vadd.f32 %v2768_v47, %v5258_v50  ;;  %v2900_v18 = vmul.f32 %v5258_v50, %v5258_v50  ;;  %v5264_v22 = vpop.f32.mrb[25].mxu0 }
 0x112   :  { %v3026_v3 = vadd.f32 %v3025_v62, %v2899_v1  ;;  %v2901_v27 = vmul.f32 %v5264_v22, %v5264_v22  ;;  %v5268_v12 = vpop.f32.mrb[24].mxu1  ;;  %v2963_v34 = vmul.f32 %v5254_v58, %v5254_v58 }
 0x113   :  { %v3090_v33 = vadd.f32 %v3089_v2, %v2962_v53  ;;  %v2833_v10 = vadd.f32 %v2832_v9, %v5254_v58  ;;  %v2770_v41 = vadd.f32 %v2769_v14, %v5264_v22  ;;  %v5274_v43 = vpop.f32.mrb[25].mxu1  ;;  %v2902_v62 = vmul.f32 %v5268_v12, %v5268_v12 }
 0x114   :  { %v3027_v47 = vadd.f32 %v3026_v3, %v2900_v18  ;;  %v5276_v40 = vpop.f32.mrb[26].mxu0 }
 0x115   :  { %7045 = vst [vmem:[#allocation26_spill] sm:$0xff] %v5276_v40  ;;  %v3091_v1 = vadd.f32 %v3090_v33, %v2963_v34  ;;  %v2834_v30 = vadd.f32 %v2833_v10, %v5276_v40  ;;  %v2964_v53 = vmul.f32 %v5276_v40, %v5276_v40  ;;  %v2771_v2 = vadd.f32 %v2770_v41, %v5268_v12  ;;  %v5284_v9 = vpop.f32.mrb[27].mxu0 }
 0x116   :  { %7046 = vst [vmem:[#allocation27_spill] sm:$0xff] %v5284_v9  ;;  %v3028_v58 = vadd.f32 %v3027_v47, %v2901_v27  ;;  %v2965_v14 = vmul.f32 %v5284_v9, %v5284_v9  ;;  %v5288_v18 = vpop.f32.mrb[26].mxu1  ;;  %v2903_v41 = vmul.f32 %v5274_v43, %v5274_v43 }
 0x117   :  { %7047 = vst [vmem:[#allocation28_spill] sm:$0xff] %v5288_v18  ;;  %v3092_v3 = vadd.f32 %v3091_v1, %v2964_v53  ;;  %v2835_v17 = vadd.f32 %v2834_v30, %v5284_v9  ;;  %v2772_v33 = vadd.f32 %v2771_v2, %v5274_v43  ;;  %v2966_v10 = vmul.f32 %v5288_v18, %v5288_v18  ;;  %v5294_v34 = vpop.f32.mrb[27].mxu1 }
 0x118   :  { %7048 = vst [vmem:[#allocation29_spill] sm:$0xff] %v5294_v34  ;;  %v3029_v40 = vadd.f32 %v3028_v58, %v2902_v62  ;;  %v5298_v27 = vpop.f32.mrb[28].mxu0 }
 0x119   :  { %v3093_v47 = vadd.f32 %v3092_v3, %v2965_v14  ;;  %v2836_v11 = vadd.f32 %v2835_v17, %v5288_v18  ;;  %v2773_v1 = vadd.f32 %v2772_v33, %v5298_v27  ;;  %v2904_v30 = vmul.f32 %v5298_v27, %v5298_v27  ;;  %v5304_v53 = vpop.f32.mrb[29].mxu0 }
 0x11a   :  { %v3030_v2 = vadd.f32 %v3029_v40, %v2903_v41  ;;  %v2905_v9 = vmul.f32 %v5304_v53, %v5304_v53  ;;  %v5308_v58 = vpop.f32.mrb[28].mxu1  ;;  %v2967_v14 = vmul.f32 %v5294_v34, %v5294_v34 }
 0x11b   :  { %v3094_v62 = vadd.f32 %v3093_v47, %v2966_v10  ;;  %v2837_v63 = vadd.f32 %v2836_v11, %v5294_v34  ;;  %v2774_v17 = vadd.f32 %v2773_v1, %v5304_v53  ;;  %v5314_v3 = vpop.f32.mrb[29].mxu1  ;;  %v2906_v40 = vmul.f32 %v5308_v58, %v5308_v58 }
 0x11c   :  { %v3031_v33 = vadd.f32 %v3030_v2, %v2904_v30  ;;  %v5316_v18 = vpop.f32.mrb[30].mxu0 }
 0x11d   :  { %7049 = vst [vmem:[#allocation30_spill] sm:$0xff] %v5316_v18  ;;  %v3095_v41 = vadd.f32 %v3094_v62, %v2967_v14  ;;  %v2838_v31 = vadd.f32 %v2837_v63, %v5316_v18  ;;  %v2968_v10 = vmul.f32 %v5316_v18, %v5316_v18  ;;  %v2775_v11 = vadd.f32 %v2774_v17, %v5308_v58  ;;  %v5324_v47 = vpop.f32.mrb[31].mxu0 }
 0x11e   :  { %7050 = vst [vmem:[#allocation31_spill] sm:$0xff] %v5324_v47  ;;  %v3032_v34 = vadd.f32 %v3031_v33, %v2905_v9  ;;  %v2969_v1 = vmul.f32 %v5324_v47, %v5324_v47  ;;  %v5328_v30 = vpop.f32.mrb[30].mxu1  ;;  %v2907_v17 = vmul.f32 %v5314_v3, %v5314_v3 }
 0x11f   :  { %7051 = vst [vmem:[#allocation32_spill] sm:$0xff] %v5328_v30  ;;  %v3096_v2 = vadd.f32 %v3095_v41, %v2968_v10  ;;  %v2839_v20 = vadd.f32 %v2838_v31, %v5324_v47  ;;  %v2776_v62 = vadd.f32 %v2775_v11, %v5314_v3  ;;  %v2970_v63 = vmul.f32 %v5328_v30, %v5328_v30  ;;  %v5334_v14 = vpop.f32.mrb[31].mxu1 }
 0x120   :  { %7052 = vst [vmem:[#allocation33_spill] sm:$0xff] %v5334_v14  ;;  %v3033_v18 = vadd.f32 %v3032_v34, %v2906_v40  ;;  %v5338_v9 = vpop.f32.mrb[32].mxu0 }
 0x121   :  { %v3097_v33 = vadd.f32 %v3096_v2, %v2969_v1  ;;  %v2840_v15 = vadd.f32 %v2839_v20, %v5328_v30  ;;  %v2777_v41 = vadd.f32 %v2776_v62, %v5338_v9  ;;  %v2908_v31 = vmul.f32 %v5338_v9, %v5338_v9  ;;  %v5344_v10 = vpop.f32.mrb[33].mxu0 }
 0x122   :  { %v3034_v11 = vadd.f32 %v3033_v18, %v2907_v17  ;;  %v2909_v47 = vmul.f32 %v5344_v10, %v5344_v10  ;;  %v5348_v34 = vpop.f32.mrb[32].mxu1  ;;  %v2971_v1 = vmul.f32 %v5334_v14, %v5334_v14 }
 0x123   :  { %v3098_v40 = vadd.f32 %v3097_v33, %v2970_v63  ;;  %v2841_v7 = vadd.f32 %v2840_v15, %v5334_v14  ;;  %v2778_v20 = vadd.f32 %v2777_v41, %v5344_v10  ;;  %v5354_v2 = vpop.f32.mrb[33].mxu1  ;;  %v2910_v18 = vmul.f32 %v5348_v34, %v5348_v34 }
 0x124   :  { %v3035_v62 = vadd.f32 %v3034_v11, %v2908_v31  ;;  %v5356_v30 = vpop.f32.mrb[34].mxu0 }
 0x125   :  { %7053 = vst [vmem:[#allocation34_spill] sm:$0xff] %v5356_v30  ;;  %v3099_v17 = vadd.f32 %v3098_v40, %v2971_v1  ;;  %v2842_v45 = vadd.f32 %v2841_v7, %v5356_v30  ;;  %v2972_v63 = vmul.f32 %v5356_v30, %v5356_v30  ;;  %v2779_v15 = vadd.f32 %v2778_v20, %v5348_v34  ;;  %v5364_v33 = vpop.f32.mrb[35].mxu0 }
 0x126   :  { %7054 = vst [vmem:[#allocation35_spill] sm:$0xff] %v5364_v33  ;;  %v3036_v14 = vadd.f32 %v3035_v62, %v2909_v47  ;;  %v2973_v41 = vmul.f32 %v5364_v33, %v5364_v33  ;;  %v5368_v31 = vpop.f32.mrb[34].mxu1  ;;  %v2911_v20 = vmul.f32 %v5354_v2, %v5354_v2 }
 0x127   :  { %7055 = vst [vmem:[#allocation36_spill] sm:$0xff] %v5368_v31  ;;  %v3100_v11 = vadd.f32 %v3099_v17, %v2972_v63  ;;  %v2843_v39 = vadd.f32 %v2842_v45, %v5364_v33  ;;  %v2780_v40 = vadd.f32 %v2779_v15, %v5354_v2  ;;  %v2974_v7 = vmul.f32 %v5368_v31, %v5368_v31  ;;  %v5374_v1 = vpop.f32.mrb[35].mxu1 }
 0x128   :  { %7056 = vst [vmem:[#allocation37_spill] sm:$0xff] %v5374_v1  ;;  %v3037_v30 = vadd.f32 %v3036_v14, %v2910_v18  ;;  %v5378_v47 = vpop.f32.mrb[36].mxu0 }
 0x129   :  { %v3101_v62 = vadd.f32 %v3100_v11, %v2973_v41  ;;  %v2844_v29 = vadd.f32 %v2843_v39, %v5368_v31  ;;  %v2781_v17 = vadd.f32 %v2780_v40, %v5378_v47  ;;  %v2912_v45 = vmul.f32 %v5378_v47, %v5378_v47  ;;  %v5384_v63 = vpop.f32.mrb[37].mxu0 }
 0x12a   :  { %v3038_v15 = vadd.f32 %v3037_v30, %v2911_v20  ;;  %v2913_v33 = vmul.f32 %v5384_v63, %v5384_v63  ;;  %v5388_v14 = vpop.f32.mrb[36].mxu1  ;;  %v2975_v41 = vmul.f32 %v5374_v1, %v5374_v1 }
 0x12b   :  { %v3102_v18 = vadd.f32 %v3101_v62, %v2974_v7  ;;  %v2845_v26 = vadd.f32 %v2844_v29, %v5374_v1  ;;  %v2782_v39 = vadd.f32 %v2781_v17, %v5384_v63  ;;  %v5394_v11 = vpop.f32.mrb[37].mxu1  ;;  %v2914_v30 = vmul.f32 %v5388_v14, %v5388_v14 }
 0x12c   :  { %v3039_v40 = vadd.f32 %v3038_v15, %v2912_v45  ;;  %v5396_v31 = vpop.f32.mrb[38].mxu0 }
 0x12d   :  { %7057 = vst [vmem:[#allocation38_spill] sm:$0xff] %v5396_v31  ;;  %v3103_v20 = vadd.f32 %v3102_v18, %v2975_v41  ;;  %v2846_v6 = vadd.f32 %v2845_v26, %v5396_v31  ;;  %v2976_v7 = vmul.f32 %v5396_v31, %v5396_v31  ;;  %v2783_v29 = vadd.f32 %v2782_v39, %v5388_v14  ;;  %v5404_v62 = vpop.f32.mrb[39].mxu0 }
 0x12e   :  { %7058 = vst [vmem:[#allocation39_spill] sm:$0xff] %v5404_v62  ;;  %v3040_v1 = vadd.f32 %v3039_v40, %v2913_v33  ;;  %v2977_v17 = vmul.f32 %v5404_v62, %v5404_v62  ;;  %v5408_v45 = vpop.f32.mrb[38].mxu1  ;;  %v2915_v39 = vmul.f32 %v5394_v11, %v5394_v11 }
 0x12f   :  { %7059 = vst [vmem:[#allocation40_spill] sm:$0xff] %v5408_v45  ;;  %v3104_v15 = vadd.f32 %v3103_v20, %v2976_v7  ;;  %v2847_v0 = vadd.f32 %v2846_v6, %v5404_v62  ;;  %v2784_v18 = vadd.f32 %v2783_v29, %v5394_v11  ;;  %v2978_v26 = vmul.f32 %v5408_v45, %v5408_v45  ;;  %v5414_v41 = vpop.f32.mrb[39].mxu1 }
 0x130   :  { %7060 = vst [vmem:[#allocation41_spill] sm:$0xff] %v5414_v41  ;;  %v3041_v31 = vadd.f32 %v3040_v1, %v2914_v30  ;;  %v5418_v33 = vpop.f32.mrb[40].mxu0 }
 0x131   :  { %v3105_v40 = vadd.f32 %v3104_v15, %v2977_v17  ;;  %v2848_v61 = vadd.f32 %v2847_v0, %v5408_v45  ;;  %v2785_v20 = vadd.f32 %v2784_v18, %v5418_v33  ;;  %v2916_v6 = vmul.f32 %v5418_v33, %v5418_v33  ;;  %v5424_v7 = vpop.f32.mrb[41].mxu0 }
 0x132   :  { %v3042_v29 = vadd.f32 %v3041_v31, %v2915_v39  ;;  %v2917_v62 = vmul.f32 %v5424_v7, %v5424_v7  ;;  %v5428_v1 = vpop.f32.mrb[40].mxu1  ;;  %v2979_v17 = vmul.f32 %v5414_v41, %v5414_v41 }
 0x133   :  { %7061 = vst [vmem:[#allocation42_spill] sm:$0xff] %v5428_v1  ;;  %v3106_v30 = vadd.f32 %v3105_v40, %v2978_v26  ;;  %v2849_v56 = vadd.f32 %v2848_v61, %v5414_v41  ;;  %v2786_v0 = vadd.f32 %v2785_v20, %v5424_v7  ;;  %v5434_v15 = vpop.f32.mrb[41].mxu1  ;;  %v2918_v31 = vmul.f32 %v5428_v1, %v5428_v1 }
 0x134   :  { %7062 = vst [vmem:[#allocation43_spill] sm:$0xff] %v5434_v15  ;;  %v3043_v18 = vadd.f32 %v3042_v29, %v2916_v6  ;;  %v5436_v45 = vpop.f32.mrb[42].mxu0 }
 0x135   :  { %7063 = vst [vmem:[#allocation44_spill] sm:$0xff] %v5436_v45  ;;  %v3107_v39 = vadd.f32 %v3106_v30, %v2979_v17  ;;  %v2850_v38 = vadd.f32 %v2849_v56, %v5436_v45  ;;  %v2980_v26 = vmul.f32 %v5436_v45, %v5436_v45  ;;  %v2787_v61 = vadd.f32 %v2786_v0, %v5428_v1  ;;  %v5444_v40 = vpop.f32.mrb[43].mxu0 }
 0x136   :  { %7064 = vst [vmem:[#allocation45_spill] sm:$0xff] %v5444_v40  ;;  %v3044_v41 = vadd.f32 %v3043_v18, %v2917_v62  ;;  %v2981_v20 = vmul.f32 %v5444_v40, %v5444_v40  ;;  %v5448_v6 = vpop.f32.mrb[42].mxu1  ;;  %v2919_v0 = vmul.f32 %v5434_v15, %v5434_v15 }
 0x137   :  { %7065 = vst [vmem:[#allocation46_spill] sm:$0xff] %v5448_v6  ;;  %v3108_v29 = vadd.f32 %v3107_v39, %v2980_v26  ;;  %v2851_v36 = vadd.f32 %v2850_v38, %v5444_v40  ;;  %v2788_v30 = vadd.f32 %v2787_v61, %v5434_v15  ;;  %v2982_v56 = vmul.f32 %v5448_v6, %v5448_v6  ;;  %v5454_v17 = vpop.f32.mrb[43].mxu1 }
 0x138   :  { %7066 = vst [vmem:[#allocation47_spill] sm:$0xff] %v5454_v17  ;;  %v3045_v45 = vadd.f32 %v3044_v41, %v2918_v31  ;;  %v5458_v62 = vpop.f32.mrb[44].mxu0 }
 0x139   :  { %7067 = vst [vmem:[#allocation48_spill] sm:$0xff] %v5458_v62  ;;  %v3109_v18 = vadd.f32 %v3108_v29, %v2981_v20  ;;  %v2852_v32 = vadd.f32 %v2851_v36, %v5448_v6  ;;  %v2789_v39 = vadd.f32 %v2788_v30, %v5458_v62  ;;  %v2920_v38 = vmul.f32 %v5458_v62, %v5458_v62  ;;  %v5464_v26 = vpop.f32.mrb[45].mxu0 }
 0x13a   :  { %7068 = vst [vmem:[#allocation49_spill] sm:$0xff] %v5464_v26  ;;  %v3046_v61 = vadd.f32 %v3045_v45, %v2919_v0  ;;  %v2921_v40 = vmul.f32 %v5464_v26, %v5464_v26  ;;  %v5468_v41 = vpop.f32.mrb[44].mxu1  ;;  %v2983_v20 = vmul.f32 %v5454_v17, %v5454_v17 }
 0x13b   :  { %7069 = vst [vmem:[#allocation50_spill] sm:$0xff] %v5468_v41  ;;  %v3110_v31 = vadd.f32 %v3109_v18, %v2982_v56  ;;  %v2853_v28 = vadd.f32 %v2852_v32, %v5454_v17  ;;  %v2790_v36 = vadd.f32 %v2789_v39, %v5464_v26  ;;  %v5474_v29 = vpop.f32.mrb[45].mxu1  ;;  %v2922_v45 = vmul.f32 %v5468_v41, %v5468_v41 }
 0x13c   :  { %7070 = vst [vmem:[#allocation51_spill] sm:$0xff] %v5474_v29  ;;  %v3047_v30 = vadd.f32 %v3046_v61, %v2920_v38  ;;  %v5476_v6 = vpop.f32.mrb[46].mxu0 }
 0x13d   :  { %7071 = vst [vmem:[#allocation52_spill] sm:$0xff] %v5476_v6  ;;  %v3111_v0 = vadd.f32 %v3110_v31, %v2983_v20  ;;  %v2854_v62 = vadd.f32 %v2853_v28, %v5476_v6  ;;  %v2984_v56 = vmul.f32 %v5476_v6, %v5476_v6  ;;  %v2791_v32 = vadd.f32 %v2790_v36, %v5468_v41  ;;  %v5484_v18 = vpop.f32.mrb[47].mxu0 }
 0x13e   :  { %7072 = vst [vmem:[#allocation53_spill] sm:$0xff] %v5484_v18  ;;  %v3048_v17 = vadd.f32 %v3047_v30, %v2921_v40  ;;  %v2985_v39 = vmul.f32 %v5484_v18, %v5484_v18  ;;  %v5488_v38 = vpop.f32.mrb[46].mxu1  ;;  %v2923_v36 = vmul.f32 %v5474_v29, %v5474_v29 }
 0x13f   :  { %7073 = vst [vmem:[#allocation54_spill] sm:$0xff] %v5488_v38  ;;  %v3112_v61 = vadd.f32 %v3111_v0, %v2984_v56  ;;  %v2855_v26 = vadd.f32 %v2854_v62, %v5484_v18  ;;  %v2792_v31 = vadd.f32 %v2791_v32, %v5474_v29  ;;  %v2986_v28 = vmul.f32 %v5488_v38, %v5488_v38  ;;  %v5494_v20 = vpop.f32.mrb[47].mxu1 }
 0x140   :  { %7074 = vst [vmem:[#allocation55_spill] sm:$0xff] %v5494_v20  ;;  %v3049_v6 = vadd.f32 %v3048_v17, %v2922_v45  ;;  %v5498_v40 = vpop.f32.mrb[48].mxu0 }
 0x141   :  { %7075 = vst [vmem:[#allocation56_spill] sm:$0xff] %v5498_v40  ;;  %v3113_v30 = vadd.f32 %v3112_v61, %v2985_v39  ;;  %v2856_v41 = vadd.f32 %v2855_v26, %v5488_v38  ;;  %v2793_v0 = vadd.f32 %v2792_v31, %v5498_v40  ;;  %v2924_v62 = vmul.f32 %v5498_v40, %v5498_v40  ;;  %v5504_v56 = vpop.f32.mrb[49].mxu0 }
 0x142   :  { %7076 = vst [vmem:[#allocation57_spill] sm:$0xff] %v5504_v56  ;;  %v3050_v32 = vadd.f32 %v3049_v6, %v2923_v36  ;;  %v2925_v18 = vmul.f32 %v5504_v56, %v5504_v56  ;;  %v5508_v17 = vpop.f32.mrb[48].mxu1  ;;  %v2987_v39 = vmul.f32 %v5494_v20, %v5494_v20 }
 0x143   :  { %7077 = vst [vmem:[#allocation58_spill] sm:$0xff] %v5508_v17  ;;  %v3114_v45 = vadd.f32 %v3113_v30, %v2986_v28  ;;  %v2857_v29 = vadd.f32 %v2856_v41, %v5494_v20  ;;  %v2794_v26 = vadd.f32 %v2793_v0, %v5504_v56  ;;  %v5514_v61 = vpop.f32.mrb[49].mxu1  ;;  %v2926_v6 = vmul.f32 %v5508_v17, %v5508_v17 }
 0x144   :  { %7078 = vst [vmem:[#allocation59_spill] sm:$0xff] %v5514_v61  ;;  %v3051_v31 = vadd.f32 %v3050_v32, %v2924_v62  ;;  %v5516_v38 = vpop.f32.mrb[50].mxu0 }
 0x145   :  { %7079 = vst [vmem:[#allocation60_spill] sm:$0xff] %v5516_v38  ;;  %v3115_v36 = vadd.f32 %v3114_v45, %v2987_v39  ;;  %v2858_v40 = vadd.f32 %v2857_v29, %v5516_v38  ;;  %v2988_v28 = vmul.f32 %v5516_v38, %v5516_v38  ;;  %v2795_v41 = vadd.f32 %v2794_v26, %v5508_v17  ;;  %v5524_v30 = vpop.f32.mrb[51].mxu0 }
 0x146   :  { %7080 = vst [vmem:[#allocation61_spill] sm:$0xff] %v5524_v30  ;;  %v3052_v20 = vadd.f32 %v3051_v31, %v2925_v18  ;;  %v2989_v0 = vmul.f32 %v5524_v30, %v5524_v30  ;;  %v5528_v62 = vpop.f32.mrb[50].mxu1  ;;  %v2927_v26 = vmul.f32 %v5514_v61, %v5514_v61 }
 0x147   :  { %7081 = vst [vmem:[#allocation62_spill] sm:$0xff] %v5528_v62  ;;  %v3116_v32 = vadd.f32 %v3115_v36, %v2988_v28  ;;  %v2859_v56 = vadd.f32 %v2858_v40, %v5524_v30  ;;  %v2796_v45 = vadd.f32 %v2795_v41, %v5514_v61  ;;  %v2990_v29 = vmul.f32 %v5528_v62, %v5528_v62  ;;  %v5534_v39 = vpop.f32.mrb[51].mxu1 }
 0x148   :  { %7082 = vst [vmem:[#allocation63_spill] sm:$0xff] %v5534_v39  ;;  %v3053_v38 = vadd.f32 %v3052_v20, %v2926_v6  ;;  %v5538_v18 = vpop.f32.mrb[52].mxu0 }
 0x149   :  { %7083 = vst [vmem:[#allocation64_spill] sm:$0xff] %v5538_v18  ;;  %v3117_v31 = vadd.f32 %v3116_v32, %v2989_v0  ;;  %v2860_v17 = vadd.f32 %v2859_v56, %v5528_v62  ;;  %v2797_v36 = vadd.f32 %v2796_v45, %v5538_v18  ;;  %v2928_v40 = vmul.f32 %v5538_v18, %v5538_v18  ;;  %v5544_v28 = vpop.f32.mrb[53].mxu0 }
 0x14a   :  { %7084 = vst [vmem:[#allocation65_spill] sm:$0xff] %v5544_v28  ;;  %v3054_v41 = vadd.f32 %v3053_v38, %v2927_v26  ;;  %v2929_v30 = vmul.f32 %v5544_v28, %v5544_v28  ;;  %v5548_v20 = vpop.f32.mrb[52].mxu1  ;;  %v2991_v0 = vmul.f32 %v5534_v39, %v5534_v39 }
 0x14b   :  { %7085 = vst [vmem:[#allocation66_spill] sm:$0xff] %v5548_v20  ;;  %v3118_v6 = vadd.f32 %v3117_v31, %v2990_v29  ;;  %v2861_v61 = vadd.f32 %v2860_v17, %v5534_v39  ;;  %v2798_v56 = vadd.f32 %v2797_v36, %v5544_v28  ;;  %v5554_v32 = vpop.f32.mrb[53].mxu1  ;;  %v2930_v38 = vmul.f32 %v5548_v20, %v5548_v20 }
 0x14c   :  { %7086 = vst [vmem:[#allocation67_spill] sm:$0xff] %v5554_v32  ;;  %v3055_v45 = vadd.f32 %v3054_v41, %v2928_v40  ;;  %v5556_v62 = vpop.f32.mrb[54].mxu0 }
 0x14d   :  { %7087 = vst [vmem:[#allocation68_spill] sm:$0xff] %v5556_v62  ;;  %v3119_v26 = vadd.f32 %v3118_v6, %v2991_v0  ;;  %v2862_v18 = vadd.f32 %v2861_v61, %v5556_v62  ;;  %v2992_v29 = vmul.f32 %v5556_v62, %v5556_v62  ;;  %v2799_v17 = vadd.f32 %v2798_v56, %v5548_v20  ;;  %v5564_v31 = vpop.f32.mrb[55].mxu0 }
 0x14e   :  { %7088 = vst [vmem:[#allocation69_spill] sm:$0xff] %v5564_v31  ;;  %v3056_v39 = vadd.f32 %v3055_v45, %v2929_v30  ;;  %v2993_v36 = vmul.f32 %v5564_v31, %v5564_v31  ;;  %v5568_v40 = vpop.f32.mrb[54].mxu1  ;;  %v2931_v56 = vmul.f32 %v5554_v32, %v5554_v32 }
 0x14f   :  { %7089 = vst [vmem:[#allocation70_spill] sm:$0xff] %v5568_v40  ;;  %v3120_v41 = vadd.f32 %v3119_v26, %v2992_v29  ;;  %v2863_v28 = vadd.f32 %v2862_v18, %v5564_v31  ;;  %v2800_v6 = vadd.f32 %v2799_v17, %v5554_v32  ;;  %v2994_v61 = vmul.f32 %v5568_v40, %v5568_v40  ;;  %v5574_v0 = vpop.f32.mrb[55].mxu1 }
 0x150   :  { %7090 = vst [vmem:[#allocation71_spill] sm:$0xff] %v5574_v0  ;;  %v3057_v62 = vadd.f32 %v3056_v39, %v2930_v38  ;;  %v5578_v30 = vpop.f32.mrb[56].mxu0 }
 0x151   :  { %7091 = vst [vmem:[#allocation72_spill] sm:$0xff] %v5578_v30  ;;  %v3121_v45 = vadd.f32 %v3120_v41, %v2993_v36  ;;  %v2864_v20 = vadd.f32 %v2863_v28, %v5568_v40  ;;  %v2801_v26 = vadd.f32 %v2800_v6, %v5578_v30  ;;  %v2932_v18 = vmul.f32 %v5578_v30, %v5578_v30  ;;  %v5584_v29 = vpop.f32.mrb[57].mxu0 }
 0x152   :  { %7092 = vst [vmem:[#allocation73_spill] sm:$0xff] %v5584_v29  ;;  %v3058_v17 = vadd.f32 %v3057_v62, %v2931_v56  ;;  %v2933_v31 = vmul.f32 %v5584_v29, %v5584_v29  ;;  %v5588_v39 = vpop.f32.mrb[56].mxu1  ;;  %v2995_v36 = vmul.f32 %v5574_v0, %v5574_v0 }
 0x153   :  { %7093 = vst [vmem:[#allocation74_spill] sm:$0xff] %v5588_v39  ;;  %v3122_v38 = vadd.f32 %v3121_v45, %v2994_v61  ;;  %v2865_v32 = vadd.f32 %v2864_v20, %v5574_v0  ;;  %v2802_v28 = vadd.f32 %v2801_v26, %v5584_v29  ;;  %v5594_v41 = vpop.f32.mrb[57].mxu1  ;;  %v2934_v62 = vmul.f32 %v5588_v39, %v5588_v39 }
 0x154   :  { %7094 = vst [vmem:[#allocation75_spill] sm:$0xff] %v5594_v41  ;;  %v3059_v6 = vadd.f32 %v3058_v17, %v2932_v18  ;;  %v5596_v40 = vpop.f32.mrb[58].mxu0 }
 0x155   :  { %7095 = vst [vmem:[#allocation76_spill] sm:$0xff] %v5596_v40  ;;  %v3123_v56 = vadd.f32 %v3122_v38, %v2995_v36  ;;  %v2866_v30 = vadd.f32 %v2865_v32, %v5596_v40  ;;  %v2996_v61 = vmul.f32 %v5596_v40, %v5596_v40  ;;  %v2803_v20 = vadd.f32 %v2802_v28, %v5588_v39  ;;  %v5604_v45 = vpop.f32.mrb[59].mxu0 }
 0x156   :  { %7096 = vst [vmem:[#allocation77_spill] sm:$0xff] %v5604_v45  ;;  %v3060_v0 = vadd.f32 %v3059_v6, %v2933_v31  ;;  %v2997_v26 = vmul.f32 %v5604_v45, %v5604_v45  ;;  %v5608_v18 = vpop.f32.mrb[58].mxu1  ;;  %v2935_v28 = vmul.f32 %v5594_v41, %v5594_v41 }
 0x157   :  { %7097 = vst [vmem:[#allocation78_spill] sm:$0xff] %v5608_v18  ;;  %v3124_v17 = vadd.f32 %v3123_v56, %v2996_v61  ;;  %v2867_v29 = vadd.f32 %v2866_v30, %v5604_v45  ;;  %v2804_v38 = vadd.f32 %v2803_v20, %v5594_v41  ;;  %v2998_v32 = vmul.f32 %v5608_v18, %v5608_v18  ;;  %v5614_v36 = vpop.f32.mrb[59].mxu1 }
 0x158   :  { %7098 = vst [vmem:[#allocation79_spill] sm:$0xff] %v5614_v36  ;;  %v3061_v40 = vadd.f32 %v3060_v0, %v2934_v62  ;;  %v5618_v31 = vpop.f32.mrb[60].mxu0 }
 0x159   :  { %7099 = vst [vmem:[#allocation80_spill] sm:$0xff] %v5618_v31  ;;  %v3125_v6 = vadd.f32 %v3124_v17, %v2997_v26  ;;  %v2868_v39 = vadd.f32 %v2867_v29, %v5608_v18  ;;  %v2805_v56 = vadd.f32 %v2804_v38, %v5618_v31  ;;  %v2936_v30 = vmul.f32 %v5618_v31, %v5618_v31  ;;  %v5624_v61 = vpop.f32.mrb[61].mxu0 }
 0x15a   :  { %7100 = vst [vmem:[#allocation81_spill] sm:$0xff] %v5624_v61  ;;  %v3062_v20 = vadd.f32 %v3061_v40, %v2935_v28  ;;  %v2937_v45 = vmul.f32 %v5624_v61, %v5624_v61  ;;  %v5628_v0 = vpop.f32.mrb[60].mxu1  ;;  %v2999_v26 = vmul.f32 %v5614_v36, %v5614_v36 }
 0x15b   :  { %7101 = vst [vmem:[#allocation82_spill] sm:$0xff] %v5628_v0  ;;  %v3126_v62 = vadd.f32 %v3125_v6, %v2998_v32  ;;  %v2869_v41 = vadd.f32 %v2868_v39, %v5614_v36  ;;  %v2806_v29 = vadd.f32 %v2805_v56, %v5624_v61  ;;  %v5634_v17 = vpop.f32.mrb[61].mxu1  ;;  %v2938_v40 = vmul.f32 %v5628_v0, %v5628_v0 }
 0x15c   :  { %v3063_v38 = vadd.f32 %v3062_v20, %v2936_v30  ;;  %v5636_v18 = vpop.f32.mrb[62].mxu0 }
 0x15d   :  { %7102 = vst [vmem:[#allocation83_spill] sm:$0xff] %v5636_v18  ;;  %v3127_v28 = vadd.f32 %v3126_v62, %v2999_v26  ;;  %v2870_v31 = vadd.f32 %v2869_v41, %v5636_v18  ;;  %v3000_v32 = vmul.f32 %v5636_v18, %v5636_v18  ;;  %v5643_v39 = vpop.f32.mrb[63].mxu0  ;;  %v2807_v6 = vadd.f32 %v2806_v29, %v5628_v0 }
 0x15e   :  { %7103 = vst [vmem:[#allocation84_spill] sm:$0xff] %v5643_v39  ;;  %v3001_v56 = vmul.f32 %v5643_v39, %v5643_v39  ;;  %v5648_v36 = vpop.f32.mrb[62].mxu1  ;;  %v3064_v30 = vadd.f32 %v3063_v38, %v2937_v45  ;;  %v2939_v18 = vmul.f32 %v5634_v17, %v5634_v17 }
 0x15f   :  { %7104 = vst [vmem:[#allocation85_spill] sm:$0xff] %v5648_v36  ;;  %v3128_v20 = vadd.f32 %v3127_v28, %v3000_v32  ;;  %v2871_v61 = vadd.f32 %v2870_v31, %v5643_v39  ;;  %v3002_v62 = vmul.f32 %v5648_v36, %v5648_v36  ;;  %v5653_v41 = vpop.f32.mrb[63].mxu1  ;;  %v2808_v26 = vadd.f32 %v2807_v6, %v5634_v17 }
 0x160   :  { %7105 = vst [vmem:[#allocation86_spill] sm:$0xff] %v5653_v41  ;;  %v3065_v29 = vadd.f32 %v3064_v30, %v2938_v40  ;;  %v3003_v45 = vmul.f32 %v5653_v41, %v5653_v41  ;;  %v4024_v32 = vmov 0  }
 0x161   :  { %v3129_v0 = vadd.f32 %v3128_v20, %v3001_v56  ;;  %2809 = vadd.xlane.f32.xlu0 %v2808_v26  ;;  %v2872_v15 = vadd.f32 %v2871_v61, %v5648_v36  ;;  %4016 = vset.pattern.permute.xlu1 %v4024_v32 }
 0x162   :  { %v3066_v1 = vadd.f32 %v3065_v29, %v2939_v18  ;;  %4015 = vset.pattern.permute.xlu0 %v4024_v32 }
 0x163   :  { %v2873_v31 = vadd.f32 %v2872_v15, %v5653_v41  ;;  %v3130_v38 = vadd.f32 %v3129_v0, %v3002_v62  ;;  %v3143_v62 = vld [vmem:[%s6916_s2] sm:$0xff]  ;;  %v7125_v41 = vld [vmem:[#allocation67_spill] sm:$0xff] }
 0x164   :  { %3067 = vadd.xlane.f32.xlu1 %v3066_v1 }
 0x165   :  { %2874 = vadd.xlane.f32.xlu0 %v2873_v31  ;;  %v3131_v28 = vadd.f32 %v3130_v38, %v3003_v45  ;;  %v3144_v38 = vld [vmem:[%s6916_s2 + $0x8] sm:$0xff] }
 0x168   :  { %3132 = vadd.xlane.f32.xlu1 %v3131_v28 }
 0x1ee   :  { %v2810_v6 = vpop.xlane.xlu0 %2809 }
 0x1ef   :  { %v3135_v40 = vmul.f32 0.00012207031, %v2810_v6 }
 0x1f1   :  { %v3139_v56 = vmul.f32 %v3135_v40, %v3135_v40  ;;  %v3068_v30 = vpop.xlane.xlu1 %3067 }
 0x1f2   :  { %v3137_v20 = vmul.f32 0.00012207031, %v3068_v30  ;;  %v2875_v61 = vpop.xlane.xlu0 %2874  ;;  %v3152_v30 = vld [vmem:[%s6917_s3 + $0x8] sm:$0xff] }
 0x1f3   :  { %v3136_v18 = vmul.f32 0.00012207031, %v2875_v61 }
 0x1f4   :  { %v3141_v26 = vsub.f32 %v3137_v20, %v3139_v56 }
 0x1f5   :  { %v3140_v29 = vmul.f32 %v3136_v18, %v3136_v18  ;;  %v3133_v36 = vpop.xlane.xlu1 %3132 }
 0x1f6   :  { %v3145_v39 = vadd.f32 1e-05, %v3141_v26  ;;  %v3138_v15 = vmul.f32 0.00012207031, %v3133_v36  ;;  %v3151_v36 = vld [vmem:[%s6917_s3] sm:$0xff] }
 0x1f8   :  { %4017 = vrsqrt.f32 %v3145_v39  ;;  %v3142_v1 = vsub.f32 %v3138_v15, %v3140_v29 }
 0x1fa   :  { %v3146_v0 = vadd.f32 1e-05, %v3142_v1 }
 0x1fc   :  { %4019 = vrsqrt.f32 %v3146_v0  ;;  %v7107_v0 = vld [vmem:[#allocation42_spill] sm:$0xff] }
 0x202   :  { %v4018_v45 = vpop.eup %4017 }
 0x203   :  { %v3149_v31 = vmul.f32 %v4018_v45, %v3143_v62  ;;  %v7108_v62 = vld [vmem:[#allocation43_spill] sm:$0xff]  ;;  %v7109_v45 = vld [vmem:[#allocation48_spill] sm:$0xff] }
 0x205   :  { %3159 = vperm.xlu0 %4015, %v3149_v31   ;;  %v3153_v6 = vmul.f32 %v3149_v31, %v3135_v40  ;;  %v7110_v31 = vld [vmem:[#allocation49_spill] sm:$0xff] }
 0x206   :  { %v4020_v28 = vpop.eup %4019 }
 0x207   :  { %v3150_v32 = vmul.f32 %v4020_v28, %v3144_v38  ;;  %v3155_v39 = vsub.f32 %v3151_v36, %v3153_v6  ;;  %v7111_v38 = vld [vmem:[#allocation50_spill] sm:$0xff]  ;;  %v7112_v28 = vld [vmem:[#allocation51_spill] sm:$0xff]  ;;  %v7113_v6 = vld [vmem:[#allocation56_spill] sm:$0xff] }
 0x209   :  { %3164 = vperm.xlu1 %4016, %v3150_v32   ;;  %v3154_v56 = vmul.f32 %v3150_v32, %v3136_v18 }
 0x20b   :  { %v3156_v20 = vsub.f32 %v3152_v30, %v3154_v56  ;;  %v7115_v30 = vld [vmem:[#allocation58_spill] sm:$0xff] }
 0x20d   :  { %3297 = vperm.xlu1 %4016, %v3155_v39   ;;  %v7114_v39 = vld [vmem:[#allocation57_spill] sm:$0xff] }
 0x211   :  { %3302 = vperm.xlu1 %4016, %v3156_v20  }
 0x284   :  { %v5674_v61 = vpop.permute.xlu0 %3159 }
 0x285   :  { %v5678_v26 = vmul.f32 %v5674_v61, %v5022_v19  ;;  %v5682_v40 = vmul.f32 %v5674_v61, %v5026_v21  ;;  %v5686_v18 = vmul.f32 %v5674_v61, %v5032_v24  ;;  %v5690_v29 = vmul.f32 %v5674_v61, %v5036_v25 }
 0x286   :  { %v5694_v15 = vmul.f32 %v5674_v61, %v5059_v42  ;;  %v5698_v19 = vmul.f32 %v5674_v61, %v5066_v46  ;;  %v5702_v21 = vmul.f32 %v5674_v61, %v5071_v51  ;;  %v5706_v24 = vmul.f32 %v5674_v61, %v5076_v54 }
 0x287   :  { %v5710_v25 = vmul.f32 %v5674_v61, %v5098_v8  ;;  %v5714_v42 = vmul.f32 %v5674_v61, %v5102_v13  ;;  %v5718_v46 = vmul.f32 %v5674_v61, %v5108_v16  ;;  %v5722_v51 = vmul.f32 %v5674_v61, %v5114_v23 }
 0x288   :  { %v5726_v54 = vmul.f32 %v5674_v61, %v5138_v49  ;;  %v5730_v8 = vmul.f32 %v5674_v61, %v5144_v57  ;;  %v5734_v13 = vmul.f32 %v5674_v61, %v5148_v60  ;;  %v5738_v16 = vmul.f32 %v5674_v61, %v5154_v4  ;;  %v5804_v1 = vpop.permute.xlu1 %3164 }
 0x289   :  { %v5742_v23 = vmul.f32 %v5674_v61, %v5178_v35  ;;  %v5746_v49 = vmul.f32 %v5674_v61, %v5184_v44  ;;  %v5750_v57 = vmul.f32 %v5674_v61, %v5188_v52  ;;  %v5754_v60 = vmul.f32 %v5674_v61, %v5194_v59  ;;  %7106 = vst [vmem:[#allocation87_spill] sm:$0xff] %v5804_v1 }
 0x28a   :  { %v5758_v4 = vmul.f32 %v5674_v61, %v5218_v37  ;;  %v5762_v35 = vmul.f32 %v5674_v61, %v5224_v48  ;;  %v5766_v44 = vmul.f32 %v5674_v61, %v5228_v55  ;;  %v5770_v52 = vmul.f32 %v5674_v61, %v5234_v5 }
 0x28b   :  { %v5774_v59 = vmul.f32 %v5674_v61, %v5258_v50  ;;  %v5778_v37 = vmul.f32 %v5674_v61, %v5264_v22  ;;  %v5782_v48 = vmul.f32 %v5674_v61, %v5268_v12  ;;  %v5786_v55 = vmul.f32 %v5674_v61, %v5274_v43 }
 0x28c   :  { %v5790_v5 = vmul.f32 %v5674_v61, %v5298_v27  ;;  %v5794_v50 = vmul.f32 %v5674_v61, %v5304_v53  ;;  %v5798_v22 = vmul.f32 %v5674_v61, %v5308_v58  ;;  %v5802_v12 = vmul.f32 %v5674_v61, %v5314_v3  ;;  %v5902_v1 = vpop.permute.xlu1 %3297 }
 0x28d   :  { %v5808_v43 = vmul.f32 %v5674_v61, %v5338_v9  ;;  %v5812_v27 = vmul.f32 %v5674_v61, %v5344_v10  ;;  %v5816_v53 = vmul.f32 %v5674_v61, %v5348_v34  ;;  %v5820_v58 = vmul.f32 %v5674_v61, %v5354_v2 }
 0x28e   :  { %v5824_v3 = vmul.f32 %v5674_v61, %v5378_v47  ;;  %v5828_v9 = vmul.f32 %v5674_v61, %v5384_v63  ;;  %v5832_v10 = vmul.f32 %v5674_v61, %v5388_v14  ;;  %v5836_v34 = vmul.f32 %v5674_v61, %v5394_v11 }
 0x28f   :  { %v5840_v2 = vmul.f32 %v5674_v61, %v5418_v33  ;;  %v5844_v47 = vmul.f32 %v5674_v61, %v5424_v7  ;;  %v5848_v63 = vmul.f32 %v5674_v61, %v7107_v0  ;;  %v5852_v14 = vmul.f32 %v5674_v61, %v7108_v62  ;;  %v7117_v0 = vld [vmem:[#allocation59_spill] sm:$0xff] }
 0x290   :  { %v5856_v11 = vmul.f32 %v5674_v61, %v7109_v45  ;;  %v5860_v33 = vmul.f32 %v5674_v61, %v7110_v31  ;;  %v5864_v7 = vmul.f32 %v5674_v61, %v7111_v38  ;;  %v5868_v32 = vmul.f32 %v5674_v61, %v7112_v28  ;;  %v7119_v45 = vld [vmem:[#allocation64_spill] sm:$0xff]  ;;  %v7121_v38 = vld [vmem:[#allocation65_spill] sm:$0xff] }
 0x291   :  { %v5872_v36 = vmul.f32 %v5674_v61, %v7113_v6  ;;  %v5876_v56 = vmul.f32 %v5674_v61, %v7114_v39  ;;  %v5880_v20 = vmul.f32 %v5674_v61, %v7115_v30  ;;  %v5884_v62 = vmul.f32 %v5674_v61, %v7117_v0  ;;  %v7123_v6 = vld [vmem:[#allocation66_spill] sm:$0xff]  ;;  %v7127_v0 = vld [vmem:[#allocation72_spill] sm:$0xff] }
 0x292   :  { %v5888_v31 = vmul.f32 %v5674_v61, %v7119_v45  ;;  %v5892_v28 = vmul.f32 %v5674_v61, %v7121_v38  ;;  %v5896_v39 = vmul.f32 %v5674_v61, %v7123_v6  ;;  %v5900_v30 = vmul.f32 %v5674_v61, %v7125_v41  ;;  %v7129_v45 = vld [vmem:[#allocation73_spill] sm:$0xff]  ;;  %v7130_v38 = vld [vmem:[#allocation74_spill] sm:$0xff]  ;;  %v7131_v6 = vld [vmem:[#allocation75_spill] sm:$0xff] }
 0x293   :  { %7116 = vst [vmem:[#allocation42_spill] sm:$0xff] %v5880_v20  ;;  %7118 = vst [vmem:[#allocation43_spill] sm:$0xff] %v5884_v62  ;;  %v5906_v62 = vmul.f32 %v5674_v61, %v7127_v0  ;;  %v7132_v41 = vld [vmem:[#allocation80_spill] sm:$0xff]  ;;  %v7133_v20 = vld [vmem:[#allocation81_spill] sm:$0xff] }
 0x294   :  { %7120 = vst [vmem:[#allocation48_spill] sm:$0xff] %v5888_v31  ;;  %7122 = vst [vmem:[#allocation49_spill] sm:$0xff] %v5892_v28  ;;  %v5910_v31 = vmul.f32 %v5674_v61, %v7129_v45  ;;  %v5914_v28 = vmul.f32 %v5674_v61, %v7130_v38  ;;  %v5926_v0 = vmul.f32 %v5674_v61, %v7133_v20 }
 0x295   :  { %7124 = vst [vmem:[#allocation50_spill] sm:$0xff] %v5896_v39  ;;  %7126 = vst [vmem:[#allocation51_spill] sm:$0xff] %v5900_v30  ;;  %v5918_v39 = vmul.f32 %v5674_v61, %v7131_v6  ;;  %v5922_v30 = vmul.f32 %v5674_v61, %v7132_v41  ;;  %v5934_v38 = vmul.f32 %v5674_v61, %v5634_v17 }
 0x296   :  { %7128 = vst [vmem:[#allocation56_spill] sm:$0xff] %v5906_v62  ;;  %v7134_v62 = vld [vmem:[#allocation82_spill] sm:$0xff]  ;;  %v5938_v6 = vadd.f32 %v5902_v1, %v5678_v26  ;;  %v5942_v41 = vadd.f32 %v5902_v1, %v5682_v40  ;;  %v5946_v20 = vadd.f32 %v5902_v1, %v5686_v18  ;;  %v5954_v17 = vadd.f32 %v5902_v1, %v5694_v15 }
 0x297   :  { %v5930_v45 = vmul.f32 %v5674_v61, %v7134_v62  ;;  %v5950_v62 = vadd.f32 %v5902_v1, %v5690_v29  ;;  %v5958_v61 = vadd.f32 %v5902_v1, %v5698_v19  ;;  %v5962_v26 = vadd.f32 %v5902_v1, %v5702_v21 }
 0x298   :  { %7135 = vst [vmem:[#allocation57_spill] sm:$0xff] %v5938_v6  ;;  %7136 = vst [vmem:[#allocation58_spill] sm:$0xff] %v5942_v41  ;;  %v5966_v40 = vadd.f32 %v5902_v1, %v5706_v24  ;;  %v5970_v18 = vadd.f32 %v5902_v1, %v5710_v25  ;;  %v5974_v29 = vadd.f32 %v5902_v1, %v5714_v42 }
 0x299   :  { %7137 = vst [vmem:[#allocation59_spill] sm:$0xff] %v5946_v20  ;;  %7138 = vst [vmem:[#allocation64_spill] sm:$0xff] %v5950_v62  ;;  %v5978_v15 = vadd.f32 %v5902_v1, %v5718_v46  ;;  %v5982_v19 = vadd.f32 %v5902_v1, %v5722_v51  ;;  %v5986_v21 = vadd.f32 %v5902_v1, %v5726_v54 }
 0x29a   :  { %7139 = vst [vmem:[#allocation65_spill] sm:$0xff] %v5954_v17  ;;  %7140 = vst [vmem:[#allocation66_spill] sm:$0xff] %v5958_v61  ;;  %v5990_v24 = vadd.f32 %v5902_v1, %v5730_v8  ;;  %v5994_v25 = vadd.f32 %v5902_v1, %v5734_v13  ;;  %v5998_v42 = vadd.f32 %v5902_v1, %v5738_v16 }
 0x29b   :  { %7141 = vst [vmem:[#allocation67_spill] sm:$0xff] %v5962_v26  ;;  %7142 = vst [vmem:[#allocation72_spill] sm:$0xff] %v5966_v40  ;;  %v6002_v46 = vadd.f32 %v5902_v1, %v5742_v23  ;;  %v6006_v51 = vadd.f32 %v5902_v1, %v5746_v49  ;;  %v6010_v54 = vadd.f32 %v5902_v1, %v5750_v57 }
 0x29c   :  { %v6014_v8 = vadd.f32 %v5902_v1, %v5754_v60  ;;  %v6018_v13 = vadd.f32 %v5902_v1, %v5758_v4  ;;  %v6022_v16 = vadd.f32 %v5902_v1, %v5762_v35  ;;  %v6026_v23 = vadd.f32 %v5902_v1, %v5766_v44 }
 0x29d   :  { %v6030_v49 = vadd.f32 %v5902_v1, %v5770_v52  ;;  %v6034_v57 = vadd.f32 %v5902_v1, %v5774_v59  ;;  %v6038_v60 = vadd.f32 %v5902_v1, %v5778_v37  ;;  %v6042_v4 = vadd.f32 %v5902_v1, %v5782_v48 }
 0x29e   :  { %v6046_v35 = vadd.f32 %v5902_v1, %v5786_v55  ;;  %v6050_v44 = vadd.f32 %v5902_v1, %v5790_v5  ;;  %v6054_v52 = vadd.f32 %v5902_v1, %v5794_v50  ;;  %v6058_v59 = vadd.f32 %v5902_v1, %v5798_v22 }
 0x29f   :  { %v6062_v37 = vadd.f32 %v5902_v1, %v5802_v12  ;;  %v6066_v48 = vadd.f32 %v5902_v1, %v5808_v43  ;;  %v6070_v55 = vadd.f32 %v5902_v1, %v5812_v27  ;;  %v6074_v5 = vadd.f32 %v5902_v1, %v5816_v53 }
 0x2a0   :  { %v6078_v50 = vadd.f32 %v5902_v1, %v5820_v58  ;;  %v6082_v22 = vadd.f32 %v5902_v1, %v5824_v3  ;;  %v6086_v12 = vadd.f32 %v5902_v1, %v5828_v9  ;;  %v6090_v43 = vadd.f32 %v5902_v1, %v5832_v10 }
 0x2a1   :  { %v6094_v27 = vadd.f32 %v5902_v1, %v5836_v34  ;;  %v6098_v53 = vadd.f32 %v5902_v1, %v5840_v2  ;;  %v6102_v58 = vadd.f32 %v5902_v1, %v5844_v47  ;;  %v6106_v3 = vadd.f32 %v5902_v1, %v5848_v63 }
 0x2a2   :  { %v6110_v9 = vadd.f32 %v5902_v1, %v5852_v14  ;;  %v6114_v10 = vadd.f32 %v5902_v1, %v5856_v11  ;;  %v6118_v34 = vadd.f32 %v5902_v1, %v5860_v33  ;;  %v6122_v2 = vadd.f32 %v5902_v1, %v5864_v7  ;;  %v7148_v11 = vld [vmem:[#allocation42_spill] sm:$0xff] }
 0x2a3   :  { %v6126_v47 = vadd.f32 %v5902_v1, %v5868_v32  ;;  %v6130_v63 = vadd.f32 %v5902_v1, %v5872_v36  ;;  %v6134_v14 = vadd.f32 %v5902_v1, %v5876_v56  ;;  %v6138_v33 = vadd.f32 %v5902_v1, %v7148_v11 }
 0x2a4   :  { %7143 = vst [vmem:[#allocation73_spill] sm:$0xff] %v6118_v34  ;;  %7144 = vst [vmem:[#allocation74_spill] sm:$0xff] %v6122_v2  ;;  %v7150_v34 = vld [vmem:[#allocation43_spill] sm:$0xff]  ;;  %v7151_v2 = vld [vmem:[#allocation48_spill] sm:$0xff] }
 0x2a5   :  { %7145 = vst [vmem:[#allocation75_spill] sm:$0xff] %v6126_v47  ;;  %7146 = vst [vmem:[#allocation80_spill] sm:$0xff] %v6130_v63  ;;  %v6142_v7 = vadd.f32 %v5902_v1, %v7150_v34  ;;  %v6146_v32 = vadd.f32 %v5902_v1, %v7151_v2  ;;  %v7152_v47 = vld [vmem:[#allocation49_spill] sm:$0xff]  ;;  %v7153_v63 = vld [vmem:[#allocation50_spill] sm:$0xff]  ;;  %v6166_v2 = vadd.f32 %v5902_v1, %v5910_v31 }
 0x2a6   :  { %7147 = vst [vmem:[#allocation81_spill] sm:$0xff] %v6134_v14  ;;  %7149 = vst [vmem:[#allocation82_spill] sm:$0xff] %v6138_v33  ;;  %v6150_v36 = vadd.f32 %v5902_v1, %v7152_v47  ;;  %v6154_v56 = vadd.f32 %v5902_v1, %v7153_v63  ;;  %v7154_v14 = vld [vmem:[#allocation51_spill] sm:$0xff]  ;;  %v7155_v33 = vld [vmem:[#allocation56_spill] sm:$0xff]  ;;  %v6170_v47 = vadd.f32 %v5902_v1, %v5914_v28 }
 0x2a7   :  { %v6158_v11 = vadd.f32 %v5902_v1, %v7154_v14  ;;  %v6162_v34 = vadd.f32 %v5902_v1, %v7155_v33  ;;  %v6174_v63 = vadd.f32 %v5902_v1, %v5918_v39  ;;  %v6178_v14 = vadd.f32 %v5902_v1, %v5922_v30 }
 0x2a8   :  { %7156 = vst [vmem:[#allocation42_spill] sm:$0xff] %v6170_v47  ;;  %v6182_v33 = vadd.f32 %v5902_v1, %v5926_v0  ;;  %v6186_v31 = vadd.f32 %v5902_v1, %v5930_v45  ;;  %v6190_v28 = vadd.f32 %v5902_v1, %v5934_v38  ;;  %v3442_v1 = vmax.f32 %v5974_v29, 0.0 }
 0x2a9   :  { %7157 = vst [vmem:[#allocation43_spill] sm:$0xff] %v6174_v63  ;;  %7158 = vst [vmem:[#allocation48_spill] sm:$0xff] %v6178_v14  ;;  %v3443_v38 = vmax.f32 %v5978_v15, 0.0  ;;  %v3444_v39 = vmax.f32 %v5982_v19, 0.0  ;;  %v3445_v63 = vmax.f32 %v5986_v21, 0.0  ;;  %v3446_v30 = vmax.f32 %v5990_v24, 0.0 }
 0x2aa   :  { %7159 = vst [vmem:[#allocation49_spill] sm:$0xff] %v6182_v33  ;;  %7160 = vst [vmem:[#allocation50_spill] sm:$0xff] %v6186_v31  ;;  %v3441_v31 = vmax.f32 %v5970_v18, 0.0  ;;  %v3447_v14 = vmax.f32 %v5994_v25, 0.0  ;;  %v3448_v0 = vmax.f32 %v5998_v42, 0.0  ;;  %v3449_v33 = vmax.f32 %v6002_v46, 0.0 }
 0x2ab   :  { %7161 = vst [vmem:[#allocation51_spill] sm:$0xff] %v6190_v28  ;;  %v3450_v45 = vmax.f32 %v6006_v51, 0.0  ;;  %v3451_v18 = vmax.f32 %v6010_v54, 0.0  ;;  %v3452_v29 = vmax.f32 %v6014_v8, 0.0  ;;  %v3453_v15 = vmax.f32 %v6018_v13, 0.0  ;;  %v7162_v47 = vld [vmem:[#allocation73_spill] sm:$0xff] }
 0x2ac   :  { %v3454_v19 = vmax.f32 %v6022_v16, 0.0  ;;  %v3455_v21 = vmax.f32 %v6026_v23, 0.0  ;;  %v3456_v24 = vmax.f32 %v6030_v49, 0.0  ;;  %v3457_v25 = vmax.f32 %v6034_v57, 0.0  ;;  %v7163_v40 = vld [vmem:[#allocation74_spill] sm:$0xff]  ;;  %v7164_v26 = vld [vmem:[#allocation75_spill] sm:$0xff] }
 0x2ad   :  { %v3458_v42 = vmax.f32 %v6038_v60, 0.0  ;;  %v3459_v46 = vmax.f32 %v6042_v4, 0.0  ;;  %v3460_v51 = vmax.f32 %v6046_v35, 0.0  ;;  %v3461_v54 = vmax.f32 %v6050_v44, 0.0  ;;  %v7165_v61 = vld [vmem:[#allocation80_spill] sm:$0xff]  ;;  %v7166_v17 = vld [vmem:[#allocation81_spill] sm:$0xff] }
 0x2ae   :  { %v3462_v8 = vmax.f32 %v6054_v52, 0.0  ;;  %v3463_v13 = vmax.f32 %v6058_v59, 0.0  ;;  %v3464_v16 = vmax.f32 %v6062_v37, 0.0  ;;  %v3465_v23 = vmax.f32 %v6066_v48, 0.0  ;;  %v7167_v62 = vld [vmem:[#allocation82_spill] sm:$0xff] }
 0x2af   :  { %v3466_v49 = vmax.f32 %v6070_v55, 0.0  ;;  %v3467_v57 = vmax.f32 %v6074_v5, 0.0  ;;  %v3468_v60 = vmax.f32 %v6078_v50, 0.0  ;;  %v3469_v4 = vmax.f32 %v6082_v22, 0.0  ;;  %v7168_v20 = vld [vmem:[#allocation42_spill] sm:$0xff] }
 0x2b0   :  { %v3470_v35 = vmax.f32 %v6086_v12, 0.0  ;;  %v3471_v44 = vmax.f32 %v6090_v43, 0.0  ;;  %v3472_v52 = vmax.f32 %v6094_v27, 0.0  ;;  %v3473_v59 = vmax.f32 %v6098_v53, 0.0  ;;  %v7169_v41 = vld [vmem:[#allocation43_spill] sm:$0xff]  ;;  %v7170_v6 = vld [vmem:[#allocation48_spill] sm:$0xff] }
 0x2b1   :  { %v3474_v37 = vmax.f32 %v6102_v58, 0.0  ;;  %v3475_v48 = vmax.f32 %v6106_v3, 0.0  ;;  %v3476_v55 = vmax.f32 %v6110_v9, 0.0  ;;  %v3477_v5 = vmax.f32 %v6114_v10, 0.0  ;;  %v7171_v28 = vld [vmem:[#allocation49_spill] sm:$0xff] }
 0x2b2   :  { %v3478_v50 = vmax.f32 %v7162_v47, 0.0  ;;  %v3479_v22 = vmax.f32 %v7163_v40, 0.0  ;;  %v3480_v12 = vmax.f32 %v7164_v26, 0.0  ;;  %v3481_v43 = vmax.f32 %v7165_v61, 0.0 }
 0x2b3   :  { %v3482_v27 = vmax.f32 %v7166_v17, 0.0  ;;  %v3483_v53 = vmax.f32 %v7167_v62, 0.0  ;;  %v3484_v58 = vmax.f32 %v6142_v7, 0.0  ;;  %v3485_v3 = vmax.f32 %v6146_v32, 0.0  ;;  %v7172_v32 = vld [vmem:[#allocation50_spill] sm:$0xff] }
 0x2b4   :  { %v3486_v9 = vmax.f32 %v6150_v36, 0.0  ;;  %v3487_v10 = vmax.f32 %v6154_v56, 0.0  ;;  %v3488_v47 = vmax.f32 %v6158_v11, 0.0  ;;  %v3489_v40 = vmax.f32 %v6162_v34, 0.0  ;;  %v7173_v56 = vld [vmem:[#allocation51_spill] sm:$0xff]  ;;  %v7174_v34 = vld [vmem:[#allocation57_spill] sm:$0xff] }
 0x2b5   :  { %v3490_v26 = vmax.f32 %v6166_v2, 0.0  ;;  %v3491_v61 = vmax.f32 %v7168_v20, 0.0  ;;  %v3492_v17 = vmax.f32 %v7169_v41, 0.0  ;;  %v3493_v62 = vmax.f32 %v7170_v6, 0.0  ;;  %v7176_v41 = vld [vmem:[#allocation58_spill] sm:$0xff] }
 0x2b6   :  { %v3494_v7 = vmax.f32 %v7171_v28, 0.0  ;;  %v3495_v36 = vmax.f32 %v7172_v32, 0.0  ;;  %v3496_v11 = vmax.f32 %v7173_v56, 0.0  ;;  %v7175_v2 = vmax.f32 %v7174_v34, 0.0  ;;  %v7178_v32 = vld [vmem:[#allocation59_spill] sm:$0xff] }
 0x2b7   :  { %v7177_v6 = vmax.f32 %v7176_v41, 0.0  ;;  %v7179_v56 = vmax.f32 %v7178_v32, 0.0 }
 0x2b8   :  { %v3561_v20 = vmax.f32 %v7175_v2, %v3441_v31  ;;  %v7180_v2 = vld [vmem:[#allocation64_spill] sm:$0xff] }
 0x2b9   :  { %v3562_v28 = vmax.f32 %v7177_v6, %v3442_v1  ;;  %v3563_v34 = vmax.f32 %v7179_v56, %v3443_v38  ;;  %v7181_v31 = vmax.f32 %v7180_v2, 0.0  ;;  %v7182_v1 = vld [vmem:[#allocation65_spill] sm:$0xff]  ;;  %v7184_v38 = vld [vmem:[#allocation66_spill] sm:$0xff] }
 0x2ba   :  { %v7183_v6 = vmax.f32 %v7182_v1, 0.0  ;;  %v7185_v56 = vmax.f32 %v7184_v38, 0.0 }
 0x2bb   :  { %v3564_v41 = vmax.f32 %v7181_v31, %v3444_v39  ;;  %v7186_v31 = vld [vmem:[#allocation67_spill] sm:$0xff] }
 0x2bc   :  { %v3565_v32 = vmax.f32 %v7183_v6, %v3445_v63  ;;  %v3566_v2 = vmax.f32 %v7185_v56, %v3446_v30  ;;  %v7187_v39 = vmax.f32 %v7186_v31, 0.0  ;;  %v7188_v6 = vld [vmem:[#allocation72_spill] sm:$0xff]  ;;  %v3577_v30 = vmax.f32 %v3561_v20, %v3449_v33 }
 0x2bd   :  { %v7189_v63 = vmax.f32 %v7188_v6, 0.0  ;;  %v3578_v56 = vmax.f32 %v3562_v28, %v3450_v45  ;;  %v3579_v31 = vmax.f32 %v3563_v34, %v3451_v18 }
 0x2be   :  { %v3567_v1 = vmax.f32 %v7187_v39, %v3447_v14  ;;  %v3580_v14 = vmax.f32 %v3564_v41, %v3452_v29  ;;  %v3581_v39 = vmax.f32 %v3565_v32, %v3453_v15  ;;  %v3582_v6 = vmax.f32 %v3566_v2, %v3454_v19 }
 0x2bf   :  { %v3568_v38 = vmax.f32 %v7189_v63, %v3448_v0  ;;  %v3593_v20 = vmax.f32 %v3577_v30, %v3457_v25  ;;  %v3594_v33 = vmax.f32 %v3578_v56, %v3458_v42  ;;  %v3595_v28 = vmax.f32 %v3579_v31, %v3459_v46 }
 0x2c0   :  { %v3583_v0 = vmax.f32 %v3567_v1, %v3455_v21  ;;  %v3596_v45 = vmax.f32 %v3580_v14, %v3460_v51  ;;  %v3597_v18 = vmax.f32 %v3581_v39, %v3461_v54  ;;  %v3598_v34 = vmax.f32 %v3582_v6, %v3462_v8  ;;  %v7201_v6 = vld [vmem:[#allocation12_spill] sm:$0xff] }
 0x2c1   :  { %v3584_v63 = vmax.f32 %v3568_v38, %v3456_v24  ;;  %v3609_v15 = vmax.f32 %v3593_v20, %v3465_v23  ;;  %v3610_v32 = vmax.f32 %v3594_v33, %v3466_v49  ;;  %v3611_v2 = vmax.f32 %v3595_v28, %v3467_v57  ;;  %v7203_v33 = vld [vmem:[#allocation14_spill] sm:$0xff] }
 0x2c2   :  { %v3599_v29 = vmax.f32 %v3583_v0, %v3463_v13  ;;  %v3612_v19 = vmax.f32 %v3596_v45, %v3468_v60  ;;  %v3613_v1 = vmax.f32 %v3597_v18, %v3469_v4  ;;  %v3614_v21 = vmax.f32 %v3598_v34, %v3470_v35  ;;  %v7204_v45 = vld [vmem:[#allocation15_spill] sm:$0xff]  ;;  %v7205_v34 = vld [vmem:[#allocation16_spill] sm:$0xff] }
 0x2c3   :  { %v3600_v41 = vmax.f32 %v3584_v63, %v3464_v16  ;;  %v3625_v25 = vmax.f32 %v3609_v15, %v3473_v59  ;;  %v3626_v30 = vmax.f32 %v3610_v32, %v3474_v37  ;;  %v3627_v42 = vmax.f32 %v3611_v2, %v3475_v48  ;;  %v7202_v63 = vld [vmem:[#allocation13_spill] sm:$0xff]  ;;  %v7207_v32 = vld [vmem:[#allocation18_spill] sm:$0xff] }
 0x2c4   :  { %v3615_v24 = vmax.f32 %v3599_v29, %v3471_v44  ;;  %v3628_v56 = vmax.f32 %v3612_v19, %v3476_v55  ;;  %v3629_v31 = vmax.f32 %v3613_v1, %v3477_v5  ;;  %v3630_v46 = vmax.f32 %v3614_v21, %v3478_v50  ;;  %v7190_v5 = vld [vmem:[#allocation2_spill] sm:$0xff]  ;;  %v7191_v50 = vld [vmem:[#allocation87_spill] sm:$0xff]  ;;  %v7209_v21 = vld [vmem:[#allocation20_spill] sm:$0xff] }
 0x2c5   :  { %v3616_v38 = vmax.f32 %v3600_v41, %v3472_v52  ;;  %v3641_v54 = vmax.f32 %v3625_v25, %v3481_v43  ;;  %v3642_v8 = vmax.f32 %v3626_v30, %v3482_v27  ;;  %v3643_v13 = vmax.f32 %v3627_v42, %v3483_v53  ;;  %v7193_v27 = vld [vmem:[#allocation4_spill] sm:$0xff]  ;;  %v7206_v41 = vld [vmem:[#allocation17_spill] sm:$0xff]  ;;  %v7208_v19 = vld [vmem:[#allocation19_spill] sm:$0xff] }
 0x2c6   :  { %v3631_v14 = vmax.f32 %v3615_v24, %v3479_v22  ;;  %v3644_v16 = vmax.f32 %v3628_v56, %v3484_v58  ;;  %v3645_v23 = vmax.f32 %v3629_v31, %v3485_v3  ;;  %v3646_v49 = vmax.f32 %v3630_v46, %v3486_v9  ;;  %v7194_v58 = vld [vmem:[#allocation5_spill] sm:$0xff]  ;;  %v7195_v9 = vld [vmem:[#allocation6_spill] sm:$0xff]  ;;  %v7212_v56 = vld [vmem:[#allocation23_spill] sm:$0xff] }
 0x2c7   :  { %v3632_v51 = vmax.f32 %v3616_v38, %v3480_v12  ;;  %v3657_v4 = vmax.f32 %v3641_v54, %v3489_v40  ;;  %v3658_v35 = vmax.f32 %v3642_v8, %v3490_v26  ;;  %v3659_v44 = vmax.f32 %v3643_v13, %v3491_v61  ;;  %v7192_v12 = vld [vmem:[#allocation3_spill] sm:$0xff]  ;;  %v7197_v26 = vld [vmem:[#allocation8_spill] sm:$0xff]  ;;  %v7210_v38 = vld [vmem:[#allocation21_spill] sm:$0xff] }
 0x2c8   :  { %v3647_v57 = vmax.f32 %v3631_v14, %v3487_v10  ;;  %v3660_v52 = vmax.f32 %v3644_v16, %v3492_v17  ;;  %v3661_v59 = vmax.f32 %v3645_v23, %v3493_v62  ;;  %v3662_v37 = vmax.f32 %v3646_v49, %v3494_v7  ;;  %v7198_v17 = vld [vmem:[#allocation9_spill] sm:$0xff]  ;;  %v7199_v7 = vld [vmem:[#allocation10_spill] sm:$0xff]  ;;  %v7213_v46 = vld [vmem:[#allocation24_spill] sm:$0xff] }
 0x2c9   :  { %v3648_v60 = vmax.f32 %v3632_v51, %v3488_v47  ;;  %3673 = vst [vmem:[%s6918_s4] sm:$0xff] %v3657_v4  ;;  %3674 = vst [vmem:[%s6918_s4 + $0x8] sm:$0xff] %v3658_v35  ;;  %v6286_v22 = vmul.f32 %v7191_v50, %v7190_v5  ;;  %v6290_v43 = vmul.f32 %v7191_v50, %v7192_v12  ;;  %v7196_v47 = vld [vmem:[#allocation7_spill] sm:$0xff]  ;;  %v7211_v30 = vld [vmem:[#allocation22_spill] sm:$0xff] }
 0x2ca   :  { %v3663_v48 = vmax.f32 %v3647_v57, %v3495_v36  ;;  %3675 = vst [vmem:[%s6918_s4 + $0x10] sm:$0xff] %v3659_v44  ;;  %3676 = vst [vmem:[%s6918_s4 + $0x18] sm:$0xff] %v3660_v52  ;;  %v6294_v53 = vmul.f32 %v7191_v50, %v7193_v27  ;;  %v6298_v3 = vmul.f32 %v7191_v50, %v7194_v58  ;;  %v7214_v51 = vld [vmem:[#allocation25_spill] sm:$0xff]  ;;  %v7215_v8 = vld [vmem:[#allocation26_spill] sm:$0xff] }
 0x2cb   :  { %v3664_v55 = vmax.f32 %v3648_v60, %v3496_v11  ;;  %3677 = vst [vmem:[%s6918_s4 + $0x20] sm:$0xff] %v3661_v59  ;;  %3678 = vst [vmem:[%s6918_s4 + $0x28] sm:$0xff] %v3662_v37  ;;  %v6314_v10 = vmul.f32 %v7191_v50, %v7195_v9  ;;  %v6318_v40 = vmul.f32 %v7191_v50, %v7196_v47  ;;  %v7200_v11 = vld [vmem:[#allocation11_spill] sm:$0xff]  ;;  %v7217_v49 = vld [vmem:[#allocation28_spill] sm:$0xff] }
 0x2cc   :  { %3679 = vst [vmem:[%s6918_s4 + $0x30] sm:$0xff] %v3663_v48  ;;  %v6322_v61 = vmul.f32 %v7191_v50, %v7197_v26  ;;  %v6326_v62 = vmul.f32 %v7191_v50, %v7198_v17  ;;  %v6330_v36 = vmul.f32 %v7191_v50, %v7199_v7  ;;  %v6334_v39 = vmul.f32 %v7191_v50, %v7200_v11  ;;  %v7216_v16 = vld [vmem:[#allocation27_spill] sm:$0xff]  ;;  %v7218_v60 = vld [vmem:[#allocation29_spill] sm:$0xff]  ;;  %v7219_v35 = vld [vmem:[#allocation30_spill] sm:$0xff] }
 0x2cd   :  { %3680 = vst [vmem:[%s6918_s4 + $0x38] sm:$0xff] %v3664_v55  ;;  %v6338_v0 = vmul.f32 %v7191_v50, %v7201_v6  ;;  %v6342_v20 = vmul.f32 %v7191_v50, %v7202_v63  ;;  %v6346_v28 = vmul.f32 %v7191_v50, %v7203_v33  ;;  %v6350_v18 = vmul.f32 %v7191_v50, %v7204_v45  ;;  %v7220_v52 = vld [vmem:[#allocation31_spill] sm:$0xff]  ;;  %v7221_v37 = vld [vmem:[#allocation32_spill] sm:$0xff]  ;;  %v7222_v55 = vld [vmem:[#allocation33_spill] sm:$0xff] }
 0x2ce   :  { %v6354_v29 = vmul.f32 %v7191_v50, %v7205_v34  ;;  %v6358_v15 = vmul.f32 %v7191_v50, %v7206_v41  ;;  %v6362_v2 = vmul.f32 %v7191_v50, %v7207_v32  ;;  %v6366_v1 = vmul.f32 %v7191_v50, %v7208_v19  ;;  %v7223_v12 = vld [vmem:[#allocation34_spill] sm:$0xff]  ;;  %v7224_v58 = vld [vmem:[#allocation35_spill] sm:$0xff]  ;;  %v7225_v47 = vld [vmem:[#allocation36_spill] sm:$0xff] }
 0x2cf   :  { %v6370_v24 = vmul.f32 %v7191_v50, %v7209_v21  ;;  %v6374_v25 = vmul.f32 %v7191_v50, %v7210_v38  ;;  %v6378_v42 = vmul.f32 %v7191_v50, %v7211_v30  ;;  %v6382_v31 = vmul.f32 %v7191_v50, %v7212_v56  ;;  %v7226_v17 = vld [vmem:[#allocation37_spill] sm:$0xff]  ;;  %v7227_v11 = vld [vmem:[#allocation38_spill] sm:$0xff]  ;;  %v7228_v63 = vld [vmem:[#allocation39_spill] sm:$0xff] }
 0x2d0   :  { %v6386_v14 = vmul.f32 %v7191_v50, %v7213_v46  ;;  %v6390_v54 = vmul.f32 %v7191_v50, %v7214_v51  ;;  %v6394_v13 = vmul.f32 %v7191_v50, %v7215_v8  ;;  %v6398_v23 = vmul.f32 %v7191_v50, %v7216_v16  ;;  %v7229_v45 = vld [vmem:[#allocation40_spill] sm:$0xff]  ;;  %v7230_v41 = vld [vmem:[#allocation41_spill] sm:$0xff]  ;;  %v7233_v56 = vld [vmem:[#allocation46_spill] sm:$0xff] }
 0x2d1   :  { %v6402_v57 = vmul.f32 %v7191_v50, %v7217_v49  ;;  %v6406_v4 = vmul.f32 %v7191_v50, %v7218_v60  ;;  %v6410_v44 = vmul.f32 %v7191_v50, %v7219_v35  ;;  %v6414_v59 = vmul.f32 %v7191_v50, %v7220_v52  ;;  %v7231_v19 = vld [vmem:[#allocation44_spill] sm:$0xff]  ;;  %v7232_v38 = vld [vmem:[#allocation45_spill] sm:$0xff]  ;;  %v7234_v51 = vld [vmem:[#allocation47_spill] sm:$0xff] }
 0x2d2   :  { %v6418_v48 = vmul.f32 %v7191_v50, %v7221_v37  ;;  %v6422_v5 = vmul.f32 %v7191_v50, %v7222_v55  ;;  %v6426_v27 = vmul.f32 %v7191_v50, %v7223_v12  ;;  %v6430_v9 = vmul.f32 %v7191_v50, %v7224_v58  ;;  %v7235_v16 = vld [vmem:[#allocation52_spill] sm:$0xff]  ;;  %v7236_v60 = vld [vmem:[#allocation53_spill] sm:$0xff]  ;;  %v7237_v52 = vld [vmem:[#allocation54_spill] sm:$0xff] }
 0x2d3   :  { %v6434_v26 = vmul.f32 %v7191_v50, %v7225_v47  ;;  %v6438_v7 = vmul.f32 %v7191_v50, %v7226_v17  ;;  %v6442_v6 = vmul.f32 %v7191_v50, %v7227_v11  ;;  %v6446_v33 = vmul.f32 %v7191_v50, %v7228_v63  ;;  %v7238_v55 = vld [vmem:[#allocation55_spill] sm:$0xff]  ;;  %v7239_v58 = vld [vmem:[#allocation60_spill] sm:$0xff]  ;;  %v7240_v17 = vld [vmem:[#allocation61_spill] sm:$0xff] }
 0x2d4   :  { %v6450_v34 = vmul.f32 %v7191_v50, %v7229_v45  ;;  %v6454_v32 = vmul.f32 %v7191_v50, %v7230_v41  ;;  %v6458_v21 = vmul.f32 %v7191_v50, %v7231_v19  ;;  %v6462_v30 = vmul.f32 %v7191_v50, %v7232_v38  ;;  %v7241_v63 = vld [vmem:[#allocation62_spill] sm:$0xff]  ;;  %v7242_v41 = vld [vmem:[#allocation63_spill] sm:$0xff]  ;;  %v7244_v38 = vld [vmem:[#allocation68_spill] sm:$0xff] }
 0x2d5   :  { %v6466_v46 = vmul.f32 %v7191_v50, %v7233_v56  ;;  %v6470_v8 = vmul.f32 %v7191_v50, %v7234_v51  ;;  %v6474_v49 = vmul.f32 %v7191_v50, %v7235_v16  ;;  %v6478_v35 = vmul.f32 %v7191_v50, %v7236_v60  ;;  %v7246_v51 = vld [vmem:[#allocation69_spill] sm:$0xff]  ;;  %v7248_v60 = vld [vmem:[#allocation70_spill] sm:$0xff] }
 0x2d6   :  { %v6482_v37 = vmul.f32 %v7191_v50, %v7237_v52  ;;  %v6486_v12 = vmul.f32 %v7191_v50, %v7238_v55  ;;  %v6490_v47 = vmul.f32 %v7191_v50, %v7239_v58  ;;  %v6494_v11 = vmul.f32 %v7191_v50, %v7240_v17  ;;  %v7250_v55 = vld [vmem:[#allocation71_spill] sm:$0xff]  ;;  %v6520_v17 = vpop.permute.xlu1 %3302 }
 0x2d7   :  { %v6498_v45 = vmul.f32 %v7191_v50, %v7241_v63  ;;  %v6502_v19 = vmul.f32 %v7191_v50, %v7242_v41  ;;  %v6506_v56 = vmul.f32 %v7191_v50, %v7244_v38  ;;  %v6510_v16 = vmul.f32 %v7191_v50, %v7246_v51  ;;  %v7252_v63 = vld [vmem:[#allocation76_spill] sm:$0xff]  ;;  %v7254_v38 = vld [vmem:[#allocation77_spill] sm:$0xff]  ;;  %v7256_v51 = vld [vmem:[#allocation78_spill] sm:$0xff] }
 0x2d8   :  { %v6514_v52 = vmul.f32 %v7191_v50, %v7248_v60  ;;  %v6518_v58 = vmul.f32 %v7191_v50, %v7250_v55  ;;  %v6524_v41 = vmul.f32 %v7191_v50, %v7252_v63  ;;  %v7257_v60 = vld [vmem:[#allocation79_spill] sm:$0xff] }
 0x2d9   :  { %7243 = vst [vmem:[#allocation56_spill] sm:$0xff] %v6502_v19  ;;  %7245 = vst [vmem:[#allocation73_spill] sm:$0xff] %v6506_v56  ;;  %v6528_v56 = vmul.f32 %v7191_v50, %v7254_v38  ;;  %v7258_v55 = vld [vmem:[#allocation83_spill] sm:$0xff]  ;;  %v7259_v19 = vld [vmem:[#allocation84_spill] sm:$0xff] }
 0x2da   :  { %7247 = vst [vmem:[#allocation74_spill] sm:$0xff] %v6510_v16  ;;  %7249 = vst [vmem:[#allocation75_spill] sm:$0xff] %v6514_v52  ;;  %v6532_v16 = vmul.f32 %v7191_v50, %v7256_v51  ;;  %v6536_v52 = vmul.f32 %v7191_v50, %v7257_v60  ;;  %v6544_v63 = vmul.f32 %v7191_v50, %v7259_v19 }
 0x2db   :  { %7251 = vst [vmem:[#allocation80_spill] sm:$0xff] %v6518_v58  ;;  %7253 = vst [vmem:[#allocation81_spill] sm:$0xff] %v6524_v41  ;;  %v6540_v58 = vmul.f32 %v7191_v50, %v7258_v55  ;;  %v7260_v41 = vld [vmem:[#allocation85_spill] sm:$0xff]  ;;  %v6556_v60 = vadd.f32 %v6520_v17, %v6286_v22  ;;  %v6560_v55 = vadd.f32 %v6520_v17, %v6290_v43 }
 0x2dc   :  { %7255 = vst [vmem:[#allocation82_spill] sm:$0xff] %v6528_v56  ;;  %v6548_v38 = vmul.f32 %v7191_v50, %v7260_v41  ;;  %v7261_v56 = vld [vmem:[#allocation86_spill] sm:$0xff]  ;;  %v6564_v19 = vadd.f32 %v6520_v17, %v6294_v53  ;;  %v6568_v41 = vadd.f32 %v6520_v17, %v6298_v3  ;;  %v6576_v22 = vadd.f32 %v6520_v17, %v6318_v40 }
 0x2dd   :  { %v6552_v51 = vmul.f32 %v7191_v50, %v7261_v56  ;;  %7262 = vst [vmem:[#allocation42_spill] sm:$0xff] %v6556_v60  ;;  %7263 = vst [vmem:[#allocation43_spill] sm:$0xff] %v6560_v55  ;;  %v6572_v50 = vadd.f32 %v6520_v17, %v6314_v10  ;;  %v6580_v43 = vadd.f32 %v6520_v17, %v6322_v61 }
 0x2de   :  { %7264 = vst [vmem:[#allocation48_spill] sm:$0xff] %v6564_v19  ;;  %7265 = vst [vmem:[#allocation49_spill] sm:$0xff] %v6568_v41  ;;  %v6584_v53 = vadd.f32 %v6520_v17, %v6326_v62  ;;  %v6588_v3 = vadd.f32 %v6520_v17, %v6330_v36  ;;  %v6592_v10 = vadd.f32 %v6520_v17, %v6334_v39 }
 0x2df   :  { %7266 = vst [vmem:[#allocation50_spill] sm:$0xff] %v6572_v50  ;;  %7267 = vst [vmem:[#allocation51_spill] sm:$0xff] %v6576_v22  ;;  %v6596_v40 = vadd.f32 %v6520_v17, %v6338_v0  ;;  %v6600_v61 = vadd.f32 %v6520_v17, %v6342_v20  ;;  %v6604_v62 = vadd.f32 %v6520_v17, %v6346_v28 }
 0x2e0   :  { %7268 = vst [vmem:[#allocation57_spill] sm:$0xff] %v6580_v43  ;;  %7269 = vst [vmem:[#allocation58_spill] sm:$0xff] %v6584_v53  ;;  %v6608_v36 = vadd.f32 %v6520_v17, %v6350_v18  ;;  %v6612_v39 = vadd.f32 %v6520_v17, %v6354_v29  ;;  %v6616_v0 = vadd.f32 %v6520_v17, %v6358_v15  ;;  %v7275_v56 = vld [vmem:[#allocation56_spill] sm:$0xff] }
 0x2e1   :  { %v6620_v20 = vadd.f32 %v6520_v17, %v6362_v2  ;;  %v6624_v28 = vadd.f32 %v6520_v17, %v6366_v1  ;;  %v6628_v18 = vadd.f32 %v6520_v17, %v6370_v24  ;;  %v6632_v29 = vadd.f32 %v6520_v17, %v6374_v25 }
 0x2e2   :  { %v6636_v15 = vadd.f32 %v6520_v17, %v6378_v42  ;;  %v6640_v2 = vadd.f32 %v6520_v17, %v6382_v31  ;;  %v6644_v1 = vadd.f32 %v6520_v17, %v6386_v14  ;;  %v6648_v24 = vadd.f32 %v6520_v17, %v6390_v54 }
 0x2e3   :  { %v6652_v25 = vadd.f32 %v6520_v17, %v6394_v13  ;;  %v6656_v42 = vadd.f32 %v6520_v17, %v6398_v23  ;;  %v6660_v31 = vadd.f32 %v6520_v17, %v6402_v57  ;;  %v6664_v14 = vadd.f32 %v6520_v17, %v6406_v4 }
 0x2e4   :  { %v6668_v54 = vadd.f32 %v6520_v17, %v6410_v44  ;;  %v6672_v13 = vadd.f32 %v6520_v17, %v6414_v59  ;;  %v6676_v23 = vadd.f32 %v6520_v17, %v6418_v48  ;;  %v6680_v57 = vadd.f32 %v6520_v17, %v6422_v5 }
 0x2e5   :  { %v6684_v4 = vadd.f32 %v6520_v17, %v6426_v27  ;;  %v6688_v44 = vadd.f32 %v6520_v17, %v6430_v9  ;;  %v6692_v59 = vadd.f32 %v6520_v17, %v6434_v26  ;;  %v6696_v48 = vadd.f32 %v6520_v17, %v6438_v7 }
 0x2e6   :  { %v6700_v5 = vadd.f32 %v6520_v17, %v6442_v6  ;;  %v6704_v27 = vadd.f32 %v6520_v17, %v6446_v33  ;;  %v6708_v9 = vadd.f32 %v6520_v17, %v6450_v34  ;;  %v6712_v26 = vadd.f32 %v6520_v17, %v6454_v32 }
 0x2e7   :  { %v6716_v7 = vadd.f32 %v6520_v17, %v6458_v21  ;;  %v6720_v6 = vadd.f32 %v6520_v17, %v6462_v30  ;;  %v6724_v33 = vadd.f32 %v6520_v17, %v6466_v46  ;;  %v6728_v34 = vadd.f32 %v6520_v17, %v6470_v8 }
 0x2e8   :  { %v6732_v32 = vadd.f32 %v6520_v17, %v6474_v49  ;;  %v6736_v21 = vadd.f32 %v6520_v17, %v6478_v35  ;;  %v6740_v30 = vadd.f32 %v6520_v17, %v6482_v37  ;;  %v6744_v46 = vadd.f32 %v6520_v17, %v6486_v12 }
 0x2e9   :  { %v6748_v8 = vadd.f32 %v6520_v17, %v6490_v47  ;;  %v6752_v49 = vadd.f32 %v6520_v17, %v6494_v11  ;;  %v6756_v35 = vadd.f32 %v6520_v17, %v6498_v45  ;;  %v6760_v37 = vadd.f32 %v6520_v17, %v7275_v56 }
 0x2ea   :  { %7270 = vst [vmem:[#allocation59_spill] sm:$0xff] %v6740_v30  ;;  %7271 = vst [vmem:[#allocation64_spill] sm:$0xff] %v6744_v46  ;;  %v7277_v30 = vld [vmem:[#allocation73_spill] sm:$0xff]  ;;  %v7278_v46 = vld [vmem:[#allocation74_spill] sm:$0xff] }
 0x2eb   :  { %7272 = vst [vmem:[#allocation65_spill] sm:$0xff] %v6748_v8  ;;  %7273 = vst [vmem:[#allocation66_spill] sm:$0xff] %v6752_v49  ;;  %v6764_v12 = vadd.f32 %v6520_v17, %v7277_v30  ;;  %v6768_v47 = vadd.f32 %v6520_v17, %v7278_v46  ;;  %v7279_v8 = vld [vmem:[#allocation75_spill] sm:$0xff]  ;;  %v7280_v49 = vld [vmem:[#allocation80_spill] sm:$0xff]  ;;  %v6788_v46 = vadd.f32 %v6520_v17, %v6532_v16 }
 0x2ec   :  { %7274 = vst [vmem:[#allocation67_spill] sm:$0xff] %v6756_v35  ;;  %7276 = vst [vmem:[#allocation72_spill] sm:$0xff] %v6760_v37  ;;  %v6772_v11 = vadd.f32 %v6520_v17, %v7279_v8  ;;  %v6776_v45 = vadd.f32 %v6520_v17, %v7280_v49  ;;  %v7281_v35 = vld [vmem:[#allocation81_spill] sm:$0xff]  ;;  %v7282_v37 = vld [vmem:[#allocation82_spill] sm:$0xff]  ;;  %v6792_v8 = vadd.f32 %v6520_v17, %v6536_v52  ;;  %v3508_v52 = vmax.f32 %v6600_v61, 0.0 }
 0x2ed   :  { %v6780_v56 = vadd.f32 %v6520_v17, %v7281_v35  ;;  %v6784_v30 = vadd.f32 %v6520_v17, %v7282_v37  ;;  %7283 = vst [vmem:[#allocation2_spill] sm:$0xff] %v6788_v46  ;;  %v6796_v49 = vadd.f32 %v6520_v17, %v6540_v58  ;;  %v6800_v35 = vadd.f32 %v6520_v17, %v6544_v63 }
 0x2ee   :  { %7284 = vst [vmem:[#allocation87_spill] sm:$0xff] %v6792_v8  ;;  %v6804_v37 = vadd.f32 %v6520_v17, %v6548_v38  ;;  %v6808_v16 = vadd.f32 %v6520_v17, %v6552_v51  ;;  %v3506_v17 = vmax.f32 %v6592_v10, 0.0  ;;  %v3507_v51 = vmax.f32 %v6596_v40, 0.0 }
 0x2ef   :  { %7285 = vst [vmem:[#allocation3_spill] sm:$0xff] %v6796_v49  ;;  %7286 = vst [vmem:[#allocation4_spill] sm:$0xff] %v6800_v35  ;;  %v3509_v8 = vmax.f32 %v6604_v62, 0.0  ;;  %v3510_v58 = vmax.f32 %v6608_v36, 0.0  ;;  %v3511_v49 = vmax.f32 %v6612_v39, 0.0  ;;  %v3512_v63 = vmax.f32 %v6616_v0, 0.0 }
 0x2f0   :  { %7287 = vst [vmem:[#allocation5_spill] sm:$0xff] %v6804_v37  ;;  %7288 = vst [vmem:[#allocation6_spill] sm:$0xff] %v6808_v16  ;;  %v3505_v37 = vmax.f32 %v6588_v3, 0.0  ;;  %v3513_v35 = vmax.f32 %v6620_v20, 0.0  ;;  %v3514_v38 = vmax.f32 %v6624_v28, 0.0  ;;  %v3515_v3 = vmax.f32 %v6628_v18, 0.0 }
 0x2f1   :  { %v3516_v10 = vmax.f32 %v6632_v29, 0.0  ;;  %v3517_v40 = vmax.f32 %v6636_v15, 0.0  ;;  %v3518_v61 = vmax.f32 %v6640_v2, 0.0  ;;  %v3519_v62 = vmax.f32 %v6644_v1, 0.0  ;;  %v7289_v46 = vld [vmem:[#allocation59_spill] sm:$0xff]  ;;  %v7290_v53 = vld [vmem:[#allocation64_spill] sm:$0xff] }
 0x2f2   :  { %v3520_v36 = vmax.f32 %v6648_v24, 0.0  ;;  %v3521_v39 = vmax.f32 %v6652_v25, 0.0  ;;  %v3522_v0 = vmax.f32 %v6656_v42, 0.0  ;;  %v3523_v20 = vmax.f32 %v6660_v31, 0.0  ;;  %v7291_v43 = vld [vmem:[#allocation65_spill] sm:$0xff]  ;;  %v7292_v22 = vld [vmem:[#allocation66_spill] sm:$0xff] }
 0x2f3   :  { %v3524_v28 = vmax.f32 %v6664_v14, 0.0  ;;  %v3525_v18 = vmax.f32 %v6668_v54, 0.0  ;;  %v3526_v29 = vmax.f32 %v6672_v13, 0.0  ;;  %v3527_v15 = vmax.f32 %v6676_v23, 0.0  ;;  %v7293_v50 = vld [vmem:[#allocation67_spill] sm:$0xff]  ;;  %v7294_v41 = vld [vmem:[#allocation72_spill] sm:$0xff] }
 0x2f4   :  { %v3528_v2 = vmax.f32 %v6680_v57, 0.0  ;;  %v3529_v1 = vmax.f32 %v6684_v4, 0.0  ;;  %v3530_v24 = vmax.f32 %v6688_v44, 0.0  ;;  %v3531_v25 = vmax.f32 %v6692_v59, 0.0  ;;  %v7295_v19 = vld [vmem:[#allocation2_spill] sm:$0xff] }
 0x2f5   :  { %v3532_v42 = vmax.f32 %v6696_v48, 0.0  ;;  %v3533_v31 = vmax.f32 %v6700_v5, 0.0  ;;  %v3534_v14 = vmax.f32 %v6704_v27, 0.0  ;;  %v3535_v54 = vmax.f32 %v6708_v9, 0.0  ;;  %v7296_v55 = vld [vmem:[#allocation87_spill] sm:$0xff] }
 0x2f6   :  { %v3536_v13 = vmax.f32 %v6712_v26, 0.0  ;;  %v3537_v23 = vmax.f32 %v6716_v7, 0.0  ;;  %v3538_v57 = vmax.f32 %v6720_v6, 0.0  ;;  %v3539_v4 = vmax.f32 %v6724_v33, 0.0  ;;  %v7297_v60 = vld [vmem:[#allocation3_spill] sm:$0xff]  ;;  %v7298_v16 = vld [vmem:[#allocation4_spill] sm:$0xff] }
 0x2f7   :  { %v3540_v44 = vmax.f32 %v6728_v34, 0.0  ;;  %v3541_v59 = vmax.f32 %v6732_v32, 0.0  ;;  %v3542_v48 = vmax.f32 %v6736_v21, 0.0  ;;  %v3543_v5 = vmax.f32 %v7289_v46, 0.0 }
 0x2f8   :  { %v3544_v27 = vmax.f32 %v7290_v53, 0.0  ;;  %v3545_v9 = vmax.f32 %v7291_v43, 0.0  ;;  %v3546_v26 = vmax.f32 %v7292_v22, 0.0  ;;  %v3547_v7 = vmax.f32 %v7293_v50, 0.0 }
 0x2f9   :  { %v3548_v6 = vmax.f32 %v7294_v41, 0.0  ;;  %v3549_v33 = vmax.f32 %v6764_v12, 0.0  ;;  %v3550_v34 = vmax.f32 %v6768_v47, 0.0  ;;  %v3551_v32 = vmax.f32 %v6772_v11, 0.0  ;;  %v7299_v12 = vld [vmem:[#allocation5_spill] sm:$0xff]  ;;  %v7300_v11 = vld [vmem:[#allocation6_spill] sm:$0xff] }
 0x2fa   :  { %v3552_v21 = vmax.f32 %v6776_v45, 0.0  ;;  %v3553_v46 = vmax.f32 %v6780_v56, 0.0  ;;  %v3554_v53 = vmax.f32 %v6784_v30, 0.0  ;;  %v3555_v43 = vmax.f32 %v7295_v19, 0.0  ;;  %v7301_v56 = vld [vmem:[#allocation42_spill] sm:$0xff] }
 0x2fb   :  { %v3556_v22 = vmax.f32 %v7296_v55, 0.0  ;;  %v3557_v50 = vmax.f32 %v7297_v60, 0.0  ;;  %v3558_v41 = vmax.f32 %v7298_v16, 0.0  ;;  %v3559_v47 = vmax.f32 %v7299_v12, 0.0  ;;  %v7303_v55 = vld [vmem:[#allocation43_spill] sm:$0xff]  ;;  %v7305_v12 = vld [vmem:[#allocation48_spill] sm:$0xff] }
 0x2fc   :  { %v3560_v45 = vmax.f32 %v7300_v11, 0.0  ;;  %v7302_v30 = vmax.f32 %v7301_v56, 0.0  ;;  %v7304_v60 = vmax.f32 %v7303_v55, 0.0  ;;  %v7306_v11 = vmax.f32 %v7305_v12, 0.0 }
 0x2fe   :  { %v3569_v19 = vmax.f32 %v7302_v30, %v3505_v37  ;;  %v3570_v16 = vmax.f32 %v7304_v60, %v3506_v17  ;;  %v3571_v56 = vmax.f32 %v7306_v11, %v3507_v51  ;;  %v7307_v30 = vld [vmem:[#allocation49_spill] sm:$0xff]  ;;  %v7309_v17 = vld [vmem:[#allocation50_spill] sm:$0xff]  ;;  %v7311_v11 = vld [vmem:[#allocation51_spill] sm:$0xff] }
 0x2ff   :  { %v7308_v37 = vmax.f32 %v7307_v30, 0.0  ;;  %v7310_v60 = vmax.f32 %v7309_v17, 0.0  ;;  %v7312_v51 = vmax.f32 %v7311_v11, 0.0 }
 0x301   :  { %v3572_v55 = vmax.f32 %v7308_v37, %v3508_v52  ;;  %v3573_v12 = vmax.f32 %v7310_v60, %v3509_v8  ;;  %v3574_v30 = vmax.f32 %v7312_v51, %v3510_v58  ;;  %v7313_v37 = vld [vmem:[#allocation57_spill] sm:$0xff]  ;;  %v7315_v8 = vld [vmem:[#allocation58_spill] sm:$0xff]  ;;  %v3585_v51 = vmax.f32 %v3569_v19, %v3513_v35 }
 0x302   :  { %v7314_v52 = vmax.f32 %v7313_v37, 0.0  ;;  %v7316_v60 = vmax.f32 %v7315_v8, 0.0  ;;  %v3586_v58 = vmax.f32 %v3570_v16, %v3514_v38  ;;  %v3587_v37 = vmax.f32 %v3571_v56, %v3515_v3 }
 0x303   :  { %v3590_v8 = vmax.f32 %v3574_v30, %v3518_v61  ;;  %v3601_v19 = vmax.f32 %v3585_v51, %v3521_v39 }
 0x304   :  { %v3575_v17 = vmax.f32 %v7314_v52, %v3511_v49  ;;  %v3576_v11 = vmax.f32 %v7316_v60, %v3512_v63  ;;  %v3588_v49 = vmax.f32 %v3572_v55, %v3516_v10  ;;  %v3589_v52 = vmax.f32 %v3573_v12, %v3517_v40 }
 0x305   :  { %v3602_v35 = vmax.f32 %v3586_v58, %v3522_v0  ;;  %v3603_v16 = vmax.f32 %v3587_v37, %v3523_v20  ;;  %v3606_v56 = vmax.f32 %v3590_v8, %v3526_v29  ;;  %v3617_v12 = vmax.f32 %v3601_v19, %v3529_v1 }
 0x306   :  { %v3591_v60 = vmax.f32 %v3575_v17, %v3519_v62  ;;  %v3592_v63 = vmax.f32 %v3576_v11, %v3520_v36  ;;  %v3604_v38 = vmax.f32 %v3588_v49, %v3524_v28  ;;  %v3605_v3 = vmax.f32 %v3589_v52, %v3525_v18 }
 0x307   :  { %v3618_v40 = vmax.f32 %v3602_v35, %v3530_v24  ;;  %v3619_v30 = vmax.f32 %v3603_v16, %v3531_v25  ;;  %v3622_v62 = vmax.f32 %v3606_v56, %v3534_v14  ;;  %v3633_v39 = vmax.f32 %v3617_v12, %v3537_v23 }
 0x308   :  { %v3607_v10 = vmax.f32 %v3591_v60, %v3527_v15  ;;  %v3608_v55 = vmax.f32 %v3592_v63, %v3528_v2  ;;  %v3620_v61 = vmax.f32 %v3604_v38, %v3532_v42  ;;  %v3621_v17 = vmax.f32 %v3605_v3, %v3533_v31 }
 0x309   :  { %v3634_v51 = vmax.f32 %v3618_v40, %v3538_v57  ;;  %v3635_v0 = vmax.f32 %v3619_v30, %v3539_v4  ;;  %v3638_v37 = vmax.f32 %v3622_v62, %v3542_v48  ;;  %v3649_v18 = vmax.f32 %v3633_v39, %v3545_v9 }
 0x30a   :  { %v3623_v11 = vmax.f32 %v3607_v10, %v3535_v54  ;;  %v3624_v36 = vmax.f32 %v3608_v55, %v3536_v13  ;;  %v3636_v58 = vmax.f32 %v3620_v61, %v3540_v44  ;;  %v3637_v20 = vmax.f32 %v3621_v17, %v3541_v59 }
 0x30b   :  { %v3650_v29 = vmax.f32 %v3634_v51, %v3546_v26  ;;  %v3651_v15 = vmax.f32 %v3635_v0, %v3547_v7  ;;  %v3654_v24 = vmax.f32 %v3638_v37, %v3550_v34  ;;  %v3665_v31 = vmax.f32 %v3649_v18, %v3553_v46 }
 0x30c   :  { %v3639_v28 = vmax.f32 %v3623_v11, %v3543_v5  ;;  %v3640_v49 = vmax.f32 %v3624_v36, %v3544_v27  ;;  %v3652_v2 = vmax.f32 %v3636_v58, %v3548_v6  ;;  %v3653_v1 = vmax.f32 %v3637_v20, %v3549_v33 }
 0x30d   :  { %v3666_v14 = vmax.f32 %v3650_v29, %v3554_v53  ;;  %v3667_v54 = vmax.f32 %v3651_v15, %v3555_v43  ;;  %v3670_v57 = vmax.f32 %v3654_v24, %v3558_v41  ;;  %3681 = vst [vmem:[%s6918_s4 + $0x40] sm:$0xff] %v3665_v31 }
 0x30e   :  { %v3655_v25 = vmax.f32 %v3639_v28, %v3551_v32  ;;  %v3656_v42 = vmax.f32 %v3640_v49, %v3552_v21  ;;  %v3668_v13 = vmax.f32 %v3652_v2, %v3556_v22  ;;  %v3669_v23 = vmax.f32 %v3653_v1, %v3557_v50 }
 0x30f   :  { %3682 = vst [vmem:[%s6918_s4 + $0x48] sm:$0xff] %v3666_v14  ;;  %3683 = vst [vmem:[%s6918_s4 + $0x50] sm:$0xff] %v3667_v54 }
 0x310   :  { %v3671_v4 = vmax.f32 %v3655_v25, %v3559_v47  ;;  %v3672_v44 = vmax.f32 %v3656_v42, %v3560_v45  ;;  %3684 = vst [vmem:[%s6918_s4 + $0x58] sm:$0xff] %v3668_v13  ;;  %3685 = vst [vmem:[%s6918_s4 + $0x60] sm:$0xff] %v3669_v23 }
 0x311   :  { %3686 = vst [vmem:[%s6918_s4 + $0x68] sm:$0xff] %v3670_v57 }
 0x312   :  { %3687 = vst [vmem:[%s6918_s4 + $0x70] sm:$0xff] %v3671_v4  ;;  %3688 = vst [vmem:[%s6918_s4 + $0x78] sm:$0xff] %v3672_v44 }

// kernel: simple_3d_conv_forward.3
= control target key start
LH: loop header
LB: loop body
LE: loop exit
PB: predicated region body
PF: predicated region fallthrough
CT: control target
= control target key end

     0   :  { %vm465_vm0 = vcmask 392192   ;;  %s3732_s0 = inlined_call_operand.vmem [shape: f32[432,1024], index: 0, kind: input, shape index: {}]   ;;  %s3733_s1 = inlined_call_operand.vmem [shape: f32[32,432], index: 1, kind: input, shape index: {}]   ;;  %s3734_s2 = inlined_call_operand.vmem [shape: f32[32,1], index: 2, kind: input, shape index: {}]   ;;  %s3735_s3 = inlined_call_operand.vmem [shape: f32[32,1], index: 3, kind: input, shape index: {}]   ;;  %s3736_s4 = inlined_call_operand.vmem [shape: f32[32,128], index: 4, kind: output, shape index: {}]  }
   0x1   :  { %v34_v0 = vld [vmem:[%s3732_s0 + $0x8] sm:$0xff]  ;;  %v36_v2 = vld [vmem:[%s3732_s0 + $0x18] sm:$0xff]  ;;  %v33_v5 = vld [vmem:[%s3732_s0] sm:$0xff] }
   0x2   :  { %v42_v1 = vld [vmem:[%s3732_s0 + $0x48] sm:$0xff]  ;;  %v44_v4 = vld [vmem:[%s3732_s0 + $0x58] sm:$0xff]  ;;  %v41_v6 = vld [vmem:[%s3732_s0 + $0x40] sm:$0xff] }
   0x3   :  { %v1527_v3 = vpack.c.bf16 %v42_v1, %v34_v0  ;;  %v1635_v7 = vpack.c.bf16 %v44_v4, %v36_v2  ;;  %v1529_v8 = vpack.c.bf16 %v41_v6, %v33_v5  ;;  %v35_v9 = vld [vmem:[%s3732_s0 + $0x10] sm:$0xff]  ;;  %v50_v11 = vld [vmem:[%s3732_s0 + $0x88] sm:$0xff]  ;;  %v52_v14 = vld [vmem:[%s3732_s0 + $0x98] sm:$0xff] }
   0x4   :  { %v43_v10 = vld [vmem:[%s3732_s0 + $0x50] sm:$0xff]  ;;  %v58_v13 = vld [vmem:[%s3732_s0 + $0xc8] sm:$0xff]  ;;  %v60_v15 = vld [vmem:[%s3732_s0 + $0xd8] sm:$0xff] }
   0x5   :  { %1528 = vmatprep.subr.bf16.mxu0 %v1527_v3  ;;  %v1637_v12 = vpack.c.bf16 %v43_v10, %v35_v9  ;;  %1636 = vmatprep.subr.bf16.mxu1 %v1635_v7  ;;  %v1531_v16 = vpack.c.bf16 %v58_v13, %v50_v11  ;;  %v1639_v17 = vpack.c.bf16 %v60_v15, %v52_v14  ;;  %v49_v18 = vld [vmem:[%s3732_s0 + $0x80] sm:$0xff]  ;;  %v51_v20 = vld [vmem:[%s3732_s0 + $0x90] sm:$0xff]  ;;  %v66_v23 = vld [vmem:[%s3732_s0 + $0x108] sm:$0xff] }
   0x6   :  { %1530 = vmatpush1.bf16.msra.mxu0 %v1529_v8  ;;  %v57_v19 = vld [vmem:[%s3732_s0 + $0xc0] sm:$0xff]  ;;  %v59_v22 = vld [vmem:[%s3732_s0 + $0xd0] sm:$0xff]  ;;  %v74_v24 = vld [vmem:[%s3732_s0 + $0x148] sm:$0xff] }
   0x7   :  { %1638 = vmatpush1.bf16.msra.mxu1 %v1637_v12  ;;  %v1533_v21 = vpack.c.bf16 %v57_v19, %v49_v18  ;;  %1532 = vmatprep.subr.bf16.mxu0 %v1531_v16  ;;  %v1641_v25 = vpack.c.bf16 %v59_v22, %v51_v20  ;;  %v1535_v26 = vpack.c.bf16 %v74_v24, %v66_v23  ;;  %v68_v27 = vld [vmem:[%s3732_s0 + $0x118] sm:$0xff]  ;;  %v65_v29 = vld [vmem:[%s3732_s0 + $0x100] sm:$0xff]  ;;  %v67_v32 = vld [vmem:[%s3732_s0 + $0x110] sm:$0xff] }
   0x8   :  { %1640 = vmatprep.subr.bf16.mxu1 %v1639_v17  ;;  %v76_v28 = vld [vmem:[%s3732_s0 + $0x158] sm:$0xff]  ;;  %v73_v31 = vld [vmem:[%s3732_s0 + $0x140] sm:$0xff]  ;;  %v75_v33 = vld [vmem:[%s3732_s0 + $0x150] sm:$0xff] }
   0x9   :  { %v1643_v30 = vpack.c.bf16 %v76_v28, %v68_v27  ;;  %v1537_v34 = vpack.c.bf16 %v73_v31, %v65_v29  ;;  %v82_v35 = vld [vmem:[%s3732_s0 + $0x188] sm:$0xff]  ;;  %v84_v37 = vld [vmem:[%s3732_s0 + $0x198] sm:$0xff]  ;;  %v1645_v38 = vpack.c.bf16 %v75_v33, %v67_v32  ;;  %v81_v41 = vld [vmem:[%s3732_s0 + $0x180] sm:$0xff] }
   0xa   :  { %1534 = vmatpush1.bf16.msra.mxu0 %v1533_v21  ;;  %v90_v36 = vld [vmem:[%s3732_s0 + $0x1c8] sm:$0xff]  ;;  %v92_v40 = vld [vmem:[%s3732_s0 + $0x1d8] sm:$0xff]  ;;  %v89_v42 = vld [vmem:[%s3732_s0 + $0x1c0] sm:$0xff] }
   0xb   :  { %1642 = vmatpush1.bf16.msra.mxu1 %v1641_v25  ;;  %1536 = vmatprep.subr.bf16.mxu0 %v1535_v26  ;;  %v1539_v39 = vpack.c.bf16 %v90_v36, %v82_v35  ;;  %v1647_v43 = vpack.c.bf16 %v92_v40, %v84_v37  ;;  %v83_v44 = vld [vmem:[%s3732_s0 + $0x190] sm:$0xff]  ;;  %v98_v46 = vld [vmem:[%s3732_s0 + $0x208] sm:$0xff]  ;;  %v100_v48 = vld [vmem:[%s3732_s0 + $0x218] sm:$0xff]  ;;  %v1541_v50 = vpack.c.bf16 %v89_v42, %v81_v41 }
   0xc   :  { %1644 = vmatprep.subr.bf16.mxu1 %v1643_v30  ;;  %v91_v45 = vld [vmem:[%s3732_s0 + $0x1d0] sm:$0xff]  ;;  %v106_v47 = vld [vmem:[%s3732_s0 + $0x248] sm:$0xff]  ;;  %v108_v49 = vld [vmem:[%s3732_s0 + $0x258] sm:$0xff] }
   0xd   :  { %v1649_v51 = vpack.c.bf16 %v91_v45, %v83_v44  ;;  %v1543_v52 = vpack.c.bf16 %v106_v47, %v98_v46  ;;  %v97_v53 = vld [vmem:[%s3732_s0 + $0x200] sm:$0xff]  ;;  %v99_v55 = vld [vmem:[%s3732_s0 + $0x210] sm:$0xff]  ;;  %v1651_v56 = vpack.c.bf16 %v108_v49, %v100_v48  ;;  %v114_v58 = vld [vmem:[%s3732_s0 + $0x288] sm:$0xff] }
   0xe   :  { %1538 = vmatpush1.bf16.msra.mxu0 %v1537_v34  ;;  %v105_v54 = vld [vmem:[%s3732_s0 + $0x240] sm:$0xff]  ;;  %v107_v57 = vld [vmem:[%s3732_s0 + $0x250] sm:$0xff]  ;;  %v122_v59 = vld [vmem:[%s3732_s0 + $0x2c8] sm:$0xff] }
   0xf   :  { %1646 = vmatpush1.bf16.msra.mxu1 %v1645_v38  ;;  %1540 = vmatprep.subr.bf16.mxu0 %v1539_v39  ;;  %v116_v60 = vld [vmem:[%s3732_s0 + $0x298] sm:$0xff]  ;;  %v1545_v62 = vpack.c.bf16 %v105_v54, %v97_v53  ;;  %v1653_v63 = vpack.c.bf16 %v107_v57, %v99_v55  ;;  %v1547_v0 = vpack.c.bf16 %v122_v59, %v114_v58  ;;  %v113_v1 = vld [vmem:[%s3732_s0 + $0x280] sm:$0xff]  ;;  %v115_v3 = vld [vmem:[%s3732_s0 + $0x290] sm:$0xff] }
  0x10   :  { %1648 = vmatprep.subr.bf16.mxu1 %v1647_v43  ;;  %v124_v61 = vld [vmem:[%s3732_s0 + $0x2d8] sm:$0xff]  ;;  %v121_v2 = vld [vmem:[%s3732_s0 + $0x2c0] sm:$0xff]  ;;  %v123_v5 = vld [vmem:[%s3732_s0 + $0x2d0] sm:$0xff] }
  0x11   :  { %v1655_v4 = vpack.c.bf16 %v124_v61, %v116_v60  ;;  %v130_v6 = vld [vmem:[%s3732_s0 + $0x308] sm:$0xff]  ;;  %v132_v8 = vld [vmem:[%s3732_s0 + $0x318] sm:$0xff]  ;;  %v1549_v10 = vpack.c.bf16 %v121_v2, %v113_v1  ;;  %v1657_v11 = vpack.c.bf16 %v123_v5, %v115_v3  ;;  %v129_v13 = vld [vmem:[%s3732_s0 + $0x300] sm:$0xff] }
  0x12   :  { %1542 = vmatpush1.bf16.msra.mxu0 %v1541_v50  ;;  %v138_v7 = vld [vmem:[%s3732_s0 + $0x348] sm:$0xff]  ;;  %v140_v9 = vld [vmem:[%s3732_s0 + $0x358] sm:$0xff]  ;;  %v137_v14 = vld [vmem:[%s3732_s0 + $0x340] sm:$0xff] }
  0x13   :  { %1650 = vmatpush1.bf16.msra.mxu1 %v1649_v51  ;;  %1544 = vmatprep.subr.bf16.mxu0 %v1543_v52  ;;  %v1551_v12 = vpack.c.bf16 %v138_v7, %v130_v6  ;;  %v131_v15 = vld [vmem:[%s3732_s0 + $0x310] sm:$0xff]  ;;  %v1659_v16 = vpack.c.bf16 %v140_v9, %v132_v8  ;;  %v146_v18 = vld [vmem:[%s3732_s0 + $0x388] sm:$0xff]  ;;  %v148_v20 = vld [vmem:[%s3732_s0 + $0x398] sm:$0xff]  ;;  %v1553_v22 = vpack.c.bf16 %v137_v14, %v129_v13 }
  0x14   :  { %1652 = vmatprep.subr.bf16.mxu1 %v1651_v56  ;;  %v139_v17 = vld [vmem:[%s3732_s0 + $0x350] sm:$0xff]  ;;  %v154_v19 = vld [vmem:[%s3732_s0 + $0x3c8] sm:$0xff]  ;;  %v156_v21 = vld [vmem:[%s3732_s0 + $0x3d8] sm:$0xff] }
  0x15   :  { %v1661_v23 = vpack.c.bf16 %v139_v17, %v131_v15  ;;  %v1555_v24 = vpack.c.bf16 %v154_v19, %v146_v18  ;;  %v145_v25 = vld [vmem:[%s3732_s0 + $0x380] sm:$0xff]  ;;  %v147_v27 = vld [vmem:[%s3732_s0 + $0x390] sm:$0xff]  ;;  %v1663_v28 = vpack.c.bf16 %v156_v21, %v148_v20  ;;  %v162_v30 = vld [vmem:[%s3732_s0 + $0x408] sm:$0xff] }
  0x16   :  { %1546 = vmatpush1.bf16.msra.mxu0 %v1545_v62  ;;  %v153_v26 = vld [vmem:[%s3732_s0 + $0x3c0] sm:$0xff]  ;;  %v155_v29 = vld [vmem:[%s3732_s0 + $0x3d0] sm:$0xff]  ;;  %v170_v31 = vld [vmem:[%s3732_s0 + $0x448] sm:$0xff] }
  0x17   :  { %1654 = vmatpush1.bf16.msra.mxu1 %v1653_v63  ;;  %1548 = vmatprep.subr.bf16.mxu0 %v1547_v0  ;;  %v164_v32 = vld [vmem:[%s3732_s0 + $0x418] sm:$0xff]  ;;  %v1557_v34 = vpack.c.bf16 %v153_v26, %v145_v25  ;;  %v1665_v35 = vpack.c.bf16 %v155_v29, %v147_v27  ;;  %v1559_v36 = vpack.c.bf16 %v170_v31, %v162_v30  ;;  %v161_v37 = vld [vmem:[%s3732_s0 + $0x400] sm:$0xff]  ;;  %v163_v39 = vld [vmem:[%s3732_s0 + $0x410] sm:$0xff] }
  0x18   :  { %1656 = vmatprep.subr.bf16.mxu1 %v1655_v4  ;;  %v172_v33 = vld [vmem:[%s3732_s0 + $0x458] sm:$0xff]  ;;  %v169_v38 = vld [vmem:[%s3732_s0 + $0x440] sm:$0xff]  ;;  %v171_v41 = vld [vmem:[%s3732_s0 + $0x450] sm:$0xff] }
  0x19   :  { %v1667_v40 = vpack.c.bf16 %v172_v33, %v164_v32  ;;  %v178_v42 = vld [vmem:[%s3732_s0 + $0x488] sm:$0xff]  ;;  %v180_v44 = vld [vmem:[%s3732_s0 + $0x498] sm:$0xff]  ;;  %v1561_v46 = vpack.c.bf16 %v169_v38, %v161_v37  ;;  %v1669_v47 = vpack.c.bf16 %v171_v41, %v163_v39  ;;  %v177_v49 = vld [vmem:[%s3732_s0 + $0x480] sm:$0xff] }
  0x1a   :  { %1550 = vmatpush1.bf16.msra.mxu0 %v1549_v10  ;;  %v186_v43 = vld [vmem:[%s3732_s0 + $0x4c8] sm:$0xff]  ;;  %v188_v45 = vld [vmem:[%s3732_s0 + $0x4d8] sm:$0xff]  ;;  %v185_v50 = vld [vmem:[%s3732_s0 + $0x4c0] sm:$0xff] }
  0x1b   :  { %1658 = vmatpush1.bf16.msra.mxu1 %v1657_v11  ;;  %1552 = vmatprep.subr.bf16.mxu0 %v1551_v12  ;;  %v1563_v48 = vpack.c.bf16 %v186_v43, %v178_v42  ;;  %v179_v51 = vld [vmem:[%s3732_s0 + $0x490] sm:$0xff]  ;;  %v1671_v52 = vpack.c.bf16 %v188_v45, %v180_v44  ;;  %v194_v54 = vld [vmem:[%s3732_s0 + $0x508] sm:$0xff]  ;;  %v196_v56 = vld [vmem:[%s3732_s0 + $0x518] sm:$0xff]  ;;  %v1565_v58 = vpack.c.bf16 %v185_v50, %v177_v49 }
  0x1c   :  { %1660 = vmatprep.subr.bf16.mxu1 %v1659_v16  ;;  %v187_v53 = vld [vmem:[%s3732_s0 + $0x4d0] sm:$0xff]  ;;  %v202_v55 = vld [vmem:[%s3732_s0 + $0x548] sm:$0xff]  ;;  %v204_v57 = vld [vmem:[%s3732_s0 + $0x558] sm:$0xff] }
  0x1d   :  { %v1673_v59 = vpack.c.bf16 %v187_v53, %v179_v51  ;;  %v1567_v60 = vpack.c.bf16 %v202_v55, %v194_v54  ;;  %v193_v61 = vld [vmem:[%s3732_s0 + $0x500] sm:$0xff]  ;;  %v195_v63 = vld [vmem:[%s3732_s0 + $0x510] sm:$0xff]  ;;  %v1675_v0 = vpack.c.bf16 %v204_v57, %v196_v56  ;;  %v210_v2 = vld [vmem:[%s3732_s0 + $0x588] sm:$0xff] }
  0x1e   :  { %1554 = vmatpush1.bf16.msra.mxu0 %v1553_v22  ;;  %v201_v62 = vld [vmem:[%s3732_s0 + $0x540] sm:$0xff]  ;;  %v203_v1 = vld [vmem:[%s3732_s0 + $0x550] sm:$0xff]  ;;  %v218_v3 = vld [vmem:[%s3732_s0 + $0x5c8] sm:$0xff] }
  0x1f   :  { %1662 = vmatpush1.bf16.msra.mxu1 %v1661_v23  ;;  %1556 = vmatprep.subr.bf16.mxu0 %v1555_v24  ;;  %v212_v4 = vld [vmem:[%s3732_s0 + $0x598] sm:$0xff]  ;;  %v1569_v6 = vpack.c.bf16 %v201_v62, %v193_v61  ;;  %v209_v7 = vld [vmem:[%s3732_s0 + $0x580] sm:$0xff]  ;;  %v1677_v8 = vpack.c.bf16 %v203_v1, %v195_v63  ;;  %v1571_v9 = vpack.c.bf16 %v218_v3, %v210_v2  ;;  %v211_v11 = vld [vmem:[%s3732_s0 + $0x590] sm:$0xff] }
  0x20   :  { %1664 = vmatprep.subr.bf16.mxu1 %v1663_v28  ;;  %v220_v5 = vld [vmem:[%s3732_s0 + $0x5d8] sm:$0xff]  ;;  %v217_v10 = vld [vmem:[%s3732_s0 + $0x5c0] sm:$0xff]  ;;  %v219_v12 = vld [vmem:[%s3732_s0 + $0x5d0] sm:$0xff] }
  0x21   :  { %v1679_v13 = vpack.c.bf16 %v220_v5, %v212_v4  ;;  %v226_v14 = vld [vmem:[%s3732_s0 + $0x608] sm:$0xff]  ;;  %v228_v17 = vld [vmem:[%s3732_s0 + $0x618] sm:$0xff]  ;;  %v1573_v19 = vpack.c.bf16 %v217_v10, %v209_v7  ;;  %v1681_v20 = vpack.c.bf16 %v219_v12, %v211_v11  ;;  %v225_v22 = vld [vmem:[%s3732_s0 + $0x600] sm:$0xff] }
  0x22   :  { %1558 = vmatpush1.bf16.msra.mxu0 %v1557_v34  ;;  %v234_v15 = vld [vmem:[%s3732_s0 + $0x648] sm:$0xff]  ;;  %v236_v18 = vld [vmem:[%s3732_s0 + $0x658] sm:$0xff]  ;;  %v233_v23 = vld [vmem:[%s3732_s0 + $0x640] sm:$0xff] }
  0x23   :  { %1666 = vmatpush1.bf16.msra.mxu1 %v1665_v35  ;;  %1560 = vmatprep.subr.bf16.mxu0 %v1559_v36  ;;  %v2325_v16 = vld [vmem:[%s3733_s1 + $0x8] sm:$0xff]  ;;  %v1575_v21 = vpack.c.bf16 %v234_v15, %v226_v14  ;;  %v227_v24 = vld [vmem:[%s3732_s0 + $0x610] sm:$0xff]  ;;  %v1683_v25 = vpack.c.bf16 %v236_v18, %v228_v17  ;;  %v244_v29 = vld [vmem:[%s3732_s0 + $0x698] sm:$0xff]  ;;  %v1577_v31 = vpack.c.bf16 %v233_v23, %v225_v22 }
  0x24   :  { %1668 = vmatprep.subr.bf16.mxu1 %v1667_v40  ;;  %542 = vmatprep.mubr.f32.mxu0 %v2325_v16  ;;  %v235_v26 = vld [vmem:[%s3732_s0 + $0x650] sm:$0xff]  ;;  %v242_v27 = vld [vmem:[%s3732_s0 + $0x688] sm:$0xff]  ;;  %v252_v30 = vld [vmem:[%s3732_s0 + $0x6d8] sm:$0xff] }
  0x25   :  { %720 = vmatprep.mubr.f32.mxu1 %v2325_v16  ;;  %v250_v28 = vld [vmem:[%s3732_s0 + $0x6c8] sm:$0xff]  ;;  %v1685_v32 = vpack.c.bf16 %v235_v26, %v227_v24  ;;  %v241_v34 = vld [vmem:[%s3732_s0 + $0x680] sm:$0xff]  ;;  %v243_v36 = vld [vmem:[%s3732_s0 + $0x690] sm:$0xff]  ;;  %v1687_v37 = vpack.c.bf16 %v252_v30, %v244_v29 }
  0x26   :  { %1562 = vmatpush1.bf16.msra.mxu0 %v1561_v46  ;;  %v1579_v33 = vpack.c.bf16 %v250_v28, %v242_v27  ;;  %v249_v35 = vld [vmem:[%s3732_s0 + $0x6c0] sm:$0xff]  ;;  %v251_v38 = vld [vmem:[%s3732_s0 + $0x6d0] sm:$0xff]  ;;  %v258_v39 = vld [vmem:[%s3732_s0 + $0x708] sm:$0xff] }
  0x27   :  { %1670 = vmatpush1.bf16.msra.mxu1 %v1669_v47  ;;  %1564 = vmatprep.subr.bf16.mxu0 %v1563_v48  ;;  %v266_v40 = vld [vmem:[%s3732_s0 + $0x748] sm:$0xff]  ;;  %v260_v41 = vld [vmem:[%s3732_s0 + $0x718] sm:$0xff]  ;;  %v1581_v43 = vpack.c.bf16 %v249_v35, %v241_v34  ;;  %v1689_v44 = vpack.c.bf16 %v251_v38, %v243_v36  ;;  %v257_v46 = vld [vmem:[%s3732_s0 + $0x700] sm:$0xff] }
  0x28   :  { %1672 = vmatprep.subr.bf16.mxu1 %v1671_v52  ;;  %v268_v42 = vld [vmem:[%s3732_s0 + $0x758] sm:$0xff]  ;;  %v1583_v45 = vpack.c.bf16 %v266_v40, %v258_v39  ;;  %v265_v47 = vld [vmem:[%s3732_s0 + $0x740] sm:$0xff]  ;;  %v259_v48 = vld [vmem:[%s3732_s0 + $0x710] sm:$0xff] }
  0x29   :  { %v1691_v49 = vpack.c.bf16 %v268_v42, %v260_v41  ;;  %v267_v50 = vld [vmem:[%s3732_s0 + $0x750] sm:$0xff]  ;;  %v274_v51 = vld [vmem:[%s3732_s0 + $0x788] sm:$0xff]  ;;  %v276_v53 = vld [vmem:[%s3732_s0 + $0x798] sm:$0xff]  ;;  %v1585_v55 = vpack.c.bf16 %v265_v47, %v257_v46 }
  0x2a   :  { %1566 = vmatpush1.bf16.msra.mxu0 %v1565_v58  ;;  %v282_v52 = vld [vmem:[%s3732_s0 + $0x7c8] sm:$0xff]  ;;  %v284_v54 = vld [vmem:[%s3732_s0 + $0x7d8] sm:$0xff]  ;;  %v1693_v56 = vpack.c.bf16 %v267_v50, %v259_v48  ;;  %v273_v58 = vld [vmem:[%s3732_s0 + $0x780] sm:$0xff] }
  0x2b   :  { %1674 = vmatpush1.bf16.msra.mxu1 %v1673_v59  ;;  %1568 = vmatprep.subr.bf16.mxu0 %v1567_v60  ;;  %v1587_v57 = vpack.c.bf16 %v282_v52, %v274_v51  ;;  %v281_v59 = vld [vmem:[%s3732_s0 + $0x7c0] sm:$0xff]  ;;  %v275_v60 = vld [vmem:[%s3732_s0 + $0x790] sm:$0xff]  ;;  %v1695_v61 = vpack.c.bf16 %v284_v54, %v276_v53  ;;  %v290_v63 = vld [vmem:[%s3732_s0 + $0x808] sm:$0xff] }
  0x2c   :  { %1676 = vmatprep.subr.bf16.mxu1 %v1675_v0  ;;  %v283_v62 = vld [vmem:[%s3732_s0 + $0x7d0] sm:$0xff]  ;;  %v298_v0 = vld [vmem:[%s3732_s0 + $0x848] sm:$0xff]  ;;  %v292_v1 = vld [vmem:[%s3732_s0 + $0x818] sm:$0xff]  ;;  %v1589_v3 = vpack.c.bf16 %v281_v59, %v273_v58 }
  0x2d   :  { %v300_v2 = vld [vmem:[%s3732_s0 + $0x858] sm:$0xff]  ;;  %v1697_v4 = vpack.c.bf16 %v283_v62, %v275_v60  ;;  %v1591_v5 = vpack.c.bf16 %v298_v0, %v290_v63  ;;  %v297_v7 = vld [vmem:[%s3732_s0 + $0x840] sm:$0xff]  ;;  %v299_v10 = vld [vmem:[%s3732_s0 + $0x850] sm:$0xff] }
  0x2e   :  { %1570 = vmatpush1.bf16.msra.mxu0 %v1569_v6  ;;  %v289_v6 = vld [vmem:[%s3732_s0 + $0x800] sm:$0xff]  ;;  %v306_v11 = vld [vmem:[%s3732_s0 + $0x888] sm:$0xff]  ;;  %v316_v14 = vld [vmem:[%s3732_s0 + $0x8d8] sm:$0xff] }
  0x2f   :  { %1678 = vmatpush1.bf16.msra.mxu1 %v1677_v8  ;;  %1572 = vmatprep.subr.bf16.mxu0 %v1571_v9  ;;  %v291_v8 = vld [vmem:[%s3732_s0 + $0x810] sm:$0xff]  ;;  %v1699_v9 = vpack.c.bf16 %v300_v2, %v292_v1  ;;  %v314_v12 = vld [vmem:[%s3732_s0 + $0x8c8] sm:$0xff]  ;;  %v2458_v15 = vld [vmem:[%s3733_s1] sm:$0xff]  ;;  %v1593_v17 = vpack.c.bf16 %v297_v7, %v289_v6 }
  0x30   :  { %1680 = vmatprep.subr.bf16.mxu1 %v1679_v13  ;;  %v308_v13 = vld [vmem:[%s3732_s0 + $0x898] sm:$0xff]  ;;  %v1701_v18 = vpack.c.bf16 %v299_v10, %v291_v8  ;;  %v307_v22 = vld [vmem:[%s3732_s0 + $0x890] sm:$0xff]  ;;  %v330_v26 = vld [vmem:[%s3732_s0 + $0x948] sm:$0xff] }
  0x31   :  { %v1703_v23 = vpack.c.bf16 %v316_v14, %v308_v13  ;;  %v315_v24 = vld [vmem:[%s3732_s0 + $0x8d0] sm:$0xff]  ;;  %v324_v27 = vld [vmem:[%s3732_s0 + $0x918] sm:$0xff]  ;;  %v2488_v29 = vld [vmem:[%s3733_s1 + $0x28] sm:$0xff] }
  0x32   :  { %1574 = vmatpush1.bf16.msra.mxu0 %v1573_v19  ;;  %v1595_v19 = vpack.c.bf16 %v314_v12, %v306_v11  ;;  %v332_v28 = vld [vmem:[%s3732_s0 + $0x958] sm:$0xff]  ;;  %v321_v34 = vld [vmem:[%s3732_s0 + $0x900] sm:$0xff]  ;;  %v323_v36 = vld [vmem:[%s3732_s0 + $0x910] sm:$0xff] }
  0x33   :  { %1682 = vmatpush1.bf16.msra.mxu1 %v1681_v20  ;;  %1576 = vmatprep.subr.bf16.mxu0 %v1575_v21  ;;  %v305_v20 = vld [vmem:[%s3732_s0 + $0x880] sm:$0xff]  ;;  %v331_v38 = vld [vmem:[%s3732_s0 + $0x950] sm:$0xff]  ;;  %v338_v39 = vld [vmem:[%s3732_s0 + $0x988] sm:$0xff] }
  0x34   :  { %1684 = vmatprep.subr.bf16.mxu1 %v1683_v25  ;;  %v313_v21 = vld [vmem:[%s3732_s0 + $0x8c0] sm:$0xff]  ;;  %v322_v25 = vld [vmem:[%s3732_s0 + $0x908] sm:$0xff]  ;;  %v340_v41 = vld [vmem:[%s3732_s0 + $0x998] sm:$0xff]  ;;  %v1709_v46 = vpack.c.bf16 %v331_v38, %v323_v36 }
  0x35   :  { %v1597_v30 = vpack.c.bf16 %v313_v21, %v305_v20  ;;  %v329_v35 = vld [vmem:[%s3732_s0 + $0x940] sm:$0xff]  ;;  %v346_v40 = vld [vmem:[%s3732_s0 + $0x9c8] sm:$0xff]  ;;  %v348_v42 = vld [vmem:[%s3732_s0 + $0x9d8] sm:$0xff] }
  0x36   :  { %1578 = vmatpush1.bf16.msra.mxu0 %v1577_v31  ;;  %v2494_v31 = vld [vmem:[%s3733_s1 + $0x20] sm:$0xff]  ;;  %v1603_v47 = vpack.c.bf16 %v346_v40, %v338_v39  ;;  %v339_v50 = vld [vmem:[%s3732_s0 + $0x990] sm:$0xff]  ;;  %v1711_v51 = vpack.c.bf16 %v348_v42, %v340_v41  ;;  %v354_v53 = vld [vmem:[%s3732_s0 + $0xa08] sm:$0xff] }
  0x37   :  { %1686 = vmatpush1.bf16.msra.mxu1 %v1685_v32  ;;  %1580 = vmatprep.subr.bf16.mxu0 %v1579_v33  ;;  %v1705_v32 = vpack.c.bf16 %v315_v24, %v307_v22  ;;  %v1599_v33 = vpack.c.bf16 %v330_v26, %v322_v25  ;;  %v337_v48 = vld [vmem:[%s3732_s0 + $0x980] sm:$0xff]  ;;  %v347_v52 = vld [vmem:[%s3732_s0 + $0x9d0] sm:$0xff]  ;;  %v362_v54 = vld [vmem:[%s3732_s0 + $0xa48] sm:$0xff] }
  0x38   :  { %1688 = vmatprep.subr.bf16.mxu1 %v1687_v37  ;;  %v1707_v37 = vpack.c.bf16 %v332_v28, %v324_v27  ;;  %v2570_v59 = vld [vmem:[%s3733_s1 + $0x60] sm:$0xff]  ;;  %v1713_v60 = vpack.c.bf16 %v347_v52, %v339_v50  ;;  %v355_v0 = vld [vmem:[%s3732_s0 + $0xa10] sm:$0xff]  ;;  %v380_v6 = vld [vmem:[%s3732_s0 + $0xad8] sm:$0xff] }
  0x39   :  { %v353_v62 = vld [vmem:[%s3732_s0 + $0xa00] sm:$0xff]  ;;  %v363_v2 = vld [vmem:[%s3732_s0 + $0xa50] sm:$0xff]  ;;  %v2602_v7 = vld [vmem:[%s3733_s1 + $0x18] sm:$0xff] }
  0x3a   :  { %1582 = vmatpush1.bf16.msra.mxu0 %v1581_v43  ;;  %v2526_v43 = vld [vmem:[%s3733_s1 + $0x48] sm:$0xff]  ;;  %v361_v63 = vld [vmem:[%s3732_s0 + $0xa40] sm:$0xff]  ;;  %v371_v13 = vld [vmem:[%s3732_s0 + $0xa90] sm:$0xff] }
  0x3b   :  { %1690 = vmatpush1.bf16.msra.mxu1 %v1689_v44  ;;  %1584 = vmatprep.subr.bf16.mxu0 %v1583_v45  ;;  %v1601_v44 = vpack.c.bf16 %v329_v35, %v321_v34  ;;  %v2532_v45 = vld [vmem:[%s3733_s1 + $0x40] sm:$0xff]  ;;  %v1609_v8 = vpack.c.bf16 %v361_v63, %v353_v62  ;;  %v388_v20 = vld [vmem:[%s3732_s0 + $0xb18] sm:$0xff]  ;;  %v387_v27 = vld [vmem:[%s3732_s0 + $0xb10] sm:$0xff] }
  0x3c   :  { %1692 = vmatprep.subr.bf16.mxu1 %v1691_v49  ;;  %v345_v49 = vld [vmem:[%s3732_s0 + $0x9c0] sm:$0xff]  ;;  %v396_v21 = vld [vmem:[%s3732_s0 + $0xb58] sm:$0xff]  ;;  %v403_v41 = vld [vmem:[%s3732_s0 + $0xb90] sm:$0xff] }
  0x3d   :  { %v1605_v58 = vpack.c.bf16 %v345_v49, %v337_v48  ;;  %v369_v11 = vld [vmem:[%s3732_s0 + $0xa80] sm:$0xff]  ;;  %v1723_v28 = vpack.c.bf16 %v396_v21, %v388_v20  ;;  %v404_v34 = vld [vmem:[%s3732_s0 + $0xb98] sm:$0xff]  ;;  %v451_v20 = vld [vmem:[%s3732_s0 + $0xd10] sm:$0xff] }
  0x3e   :  { %1586 = vmatpush1.bf16.msra.mxu0 %v1585_v55  ;;  %v356_v55 = vld [vmem:[%s3732_s0 + $0xa18] sm:$0xff]  ;;  %v377_v12 = vld [vmem:[%s3732_s0 + $0xac0] sm:$0xff] }
  0x3f   :  { %1694 = vmatpush1.bf16.msra.mxu1 %v1693_v56  ;;  %1588 = vmatprep.subr.bf16.mxu0 %v1587_v57  ;;  %v364_v56 = vld [vmem:[%s3732_s0 + $0xa58] sm:$0xff]  ;;  %v2564_v57 = vld [vmem:[%s3733_s1 + $0x68] sm:$0xff]  ;;  %v1613_v22 = vpack.c.bf16 %v377_v12, %v369_v11  ;;  %v385_v25 = vld [vmem:[%s3732_s0 + $0xb00] sm:$0xff] }
  0x40   :  { %1696 = vmatprep.subr.bf16.mxu1 %v1695_v61  ;;  %v1607_v61 = vpack.c.bf16 %v362_v54, %v354_v53  ;;  %v1715_v1 = vpack.c.bf16 %v364_v56, %v356_v55  ;;  %v393_v26 = vld [vmem:[%s3732_s0 + $0xb40] sm:$0xff]  ;;  %v412_v35 = vld [vmem:[%s3732_s0 + $0xbd8] sm:$0xff]  ;;  %v419_v55 = vld [vmem:[%s3732_s0 + $0xc10] sm:$0xff] }
  0x41   :  { %v1617_v36 = vpack.c.bf16 %v393_v26, %v385_v25  ;;  %v401_v39 = vld [vmem:[%s3732_s0 + $0xb80] sm:$0xff]  ;;  %v1727_v42 = vpack.c.bf16 %v412_v35, %v404_v34  ;;  %v420_v48 = vld [vmem:[%s3732_s0 + $0xc18] sm:$0xff]  ;;  %v39_v35 = vld [vmem:[%s3732_s0 + $0x30] sm:$0xff] }
  0x42   :  { %1590 = vmatpush1.bf16.msra.mxu0 %v1589_v3  ;;  %v370_v3 = vld [vmem:[%s3732_s0 + $0xa88] sm:$0xff]  ;;  %v409_v40 = vld [vmem:[%s3732_s0 + $0xbc0] sm:$0xff]  ;;  %v428_v49 = vld [vmem:[%s3732_s0 + $0xc58] sm:$0xff] }
  0x43   :  { %1698 = vmatpush1.bf16.msra.mxu1 %v1697_v4  ;;  %1592 = vmatprep.subr.bf16.mxu0 %v1591_v5  ;;  %v378_v4 = vld [vmem:[%s3732_s0 + $0xac8] sm:$0xff]  ;;  %v372_v5 = vld [vmem:[%s3732_s0 + $0xa98] sm:$0xff]  ;;  %v1621_v50 = vpack.c.bf16 %v409_v40, %v401_v39  ;;  %v417_v53 = vld [vmem:[%s3732_s0 + $0xc00] sm:$0xff]  ;;  %v1731_v56 = vpack.c.bf16 %v428_v49, %v420_v48 }
  0x44   :  { %1700 = vmatprep.subr.bf16.mxu1 %v1699_v9  ;;  %v1717_v9 = vpack.c.bf16 %v363_v2, %v355_v0  ;;  %v1611_v10 = vpack.c.bf16 %v378_v4, %v370_v3  ;;  %v1719_v14 = vpack.c.bf16 %v380_v6, %v372_v5  ;;  %v425_v54 = vld [vmem:[%s3732_s0 + $0xc40] sm:$0xff]  ;;  %v436_v62 = vld [vmem:[%s3732_s0 + $0xc98] sm:$0xff]  ;;  %v435_v5 = vld [vmem:[%s3732_s0 + $0xc90] sm:$0xff] }
  0x45   :  { %543 = vmatmul.mubr.f32.vlgmr.msra.gmra.mrb[0].mxu0 %v2458_v15  ;;  %v444_v63 = vld [vmem:[%s3732_s0 + $0xcd8] sm:$0xff]  ;;  %v1625_v0 = vpack.c.bf16 %v425_v54, %v417_v53  ;;  %v433_v3 = vld [vmem:[%s3732_s0 + $0xc80] sm:$0xff]  ;;  %v2774_v39 = vld [vmem:[%s3733_s1 + $0x10] sm:$0xff] }
  0x46   :  { %1594 = vmatpush1.bf16.msra.mxu0 %v1593_v17  ;;  %721 = vmatmul.mubr.f32.vlgmr.msra.gmra.mrb[0].mxu1 %v2458_v15  ;;  %v379_v17 = vld [vmem:[%s3732_s0 + $0xad0] sm:$0xff]  ;;  %v441_v4 = vld [vmem:[%s3732_s0 + $0xcc0] sm:$0xff]  ;;  %v1735_v6 = vpack.c.bf16 %v444_v63, %v436_v62  ;;  %v452_v11 = vld [vmem:[%s3732_s0 + $0xd18] sm:$0xff] }
  0x47   :  { %1702 = vmatpush1.bf16.msra.mxu1 %v1701_v18  ;;  %1596 = vmatprep.subr.bf16.mxu0 %v1595_v19  ;;  %v386_v18 = vld [vmem:[%s3732_s0 + $0xb08] sm:$0xff]  ;;  %v460_v12 = vld [vmem:[%s3732_s0 + $0xd58] sm:$0xff]  ;;  %v69_v62 = vld [vmem:[%s3732_s0 + $0x120] sm:$0xff] }
  0x48   :  { %1704 = vmatprep.subr.bf16.mxu1 %v1703_v23  ;;  %548 = vmatprep.mubr.f32.mxu0 %v2488_v29  ;;  %v394_v19 = vld [vmem:[%s3732_s0 + $0xb48] sm:$0xff]  ;;  %v1721_v23 = vpack.c.bf16 %v379_v17, %v371_v13  ;;  %v1629_v13 = vpack.c.bf16 %v441_v4, %v433_v3  ;;  %v1739_v21 = vpack.c.bf16 %v460_v12, %v452_v11  ;;  %v40_v25 = vld [vmem:[%s3732_s0 + $0x38] sm:$0xff]  ;;  %v77_v63 = vld [vmem:[%s3732_s0 + $0x160] sm:$0xff] }
  0x49   :  { %726 = vmatprep.mubr.f32.mxu1 %v2488_v29  ;;  %549 = vmatmul.mubr.f32.gmra.mrb[2].mxu0 %v2494_v31  ;;  %v1615_v24 = vpack.c.bf16 %v394_v19, %v386_v18  ;;  %v449_v18 = vld [vmem:[%s3732_s0 + $0xd00] sm:$0xff]  ;;  %v48_v26 = vld [vmem:[%s3732_s0 + $0x78] sm:$0xff]  ;;  %v70_v53 = vld [vmem:[%s3732_s0 + $0x128] sm:$0xff] }
  0x4a   :  { %1598 = vmatpush1.bf16.msra.mxu0 %v1597_v30  ;;  %727 = vmatmul.mubr.f32.gmra.mrb[2].mxu1 %v2494_v31  ;;  %v395_v30 = vld [vmem:[%s3732_s0 + $0xb50] sm:$0xff]  ;;  %v457_v19 = vld [vmem:[%s3732_s0 + $0xd40] sm:$0xff]  ;;  %v1851_v34 = vpack.c.bf16 %v48_v26, %v40_v25  ;;  %v2791_v48 = vld [vmem:[%s3733_s1 + $0x38] sm:$0xff] }
  0x4b   :  { %1706 = vmatpush1.bf16.msra.mxu1 %v1705_v32  ;;  %1600 = vmatprep.subr.bf16.mxu0 %v1599_v33  ;;  %v402_v32 = vld [vmem:[%s3732_s0 + $0xb88] sm:$0xff]  ;;  %v79_v3 = vld [vmem:[%s3732_s0 + $0x170] sm:$0xff]  ;;  %v88_v11 = vld [vmem:[%s3732_s0 + $0x1b8] sm:$0xff] }
  0x4c   :  { %1708 = vmatprep.subr.bf16.mxu1 %v1707_v37  ;;  %554 = vmatprep.mubr.f32.mxu0 %v2526_v43  ;;  %v410_v33 = vld [vmem:[%s3732_s0 + $0xbc8] sm:$0xff]  ;;  %v1725_v37 = vpack.c.bf16 %v395_v30, %v387_v27  ;;  %v1633_v27 = vpack.c.bf16 %v457_v19, %v449_v18  ;;  %v2843_v4 = vld [vmem:[%s3733_s1 + $0x50] sm:$0xff]  ;;  %v96_v12 = vld [vmem:[%s3732_s0 + $0x1f8] sm:$0xff] }
  0x4d   :  { %732 = vmatprep.mubr.f32.mxu1 %v2526_v43  ;;  %555 = vmatmul.mubr.f32.gmra.mrb[4].mxu0 %v2532_v45  ;;  %v1619_v38 = vpack.c.bf16 %v410_v33, %v402_v32  ;;  %v37_v32 = vld [vmem:[%s3732_s0 + $0x20] sm:$0xff]  ;;  %v78_v54 = vld [vmem:[%s3732_s0 + $0x168] sm:$0xff]  ;;  %v87_v18 = vld [vmem:[%s3732_s0 + $0x1b0] sm:$0xff] }
  0x4e   :  { %1602 = vmatpush1.bf16.msra.mxu0 %v1601_v44  ;;  %733 = vmatmul.mubr.f32.gmra.mrb[4].mxu1 %v2532_v45  ;;  %v411_v44 = vld [vmem:[%s3732_s0 + $0xbd0] sm:$0xff]  ;;  %v45_v33 = vld [vmem:[%s3732_s0 + $0x60] sm:$0xff]  ;;  %v112_v25 = vld [vmem:[%s3732_s0 + $0x278] sm:$0xff] }
  0x4f   :  { %1710 = vmatpush1.bf16.msra.mxu1 %v1709_v46  ;;  %1604 = vmatprep.subr.bf16.mxu0 %v1603_v47  ;;  %v418_v46 = vld [vmem:[%s3732_s0 + $0xc08] sm:$0xff]  ;;  %v1745_v40 = vpack.c.bf16 %v45_v33, %v37_v32  ;;  %v2896_v26 = vld [vmem:[%s3733_s1 + $0x70] sm:$0xff]  ;;  %v101_v32 = vld [vmem:[%s3732_s0 + $0x220] sm:$0xff] }
  0x50   :  { %1712 = vmatprep.subr.bf16.mxu1 %v1711_v51  ;;  %560 = vmatprep.mubr.f32.mxu0 %v2564_v57  ;;  %v426_v47 = vld [vmem:[%s3732_s0 + $0xc48] sm:$0xff]  ;;  %v1729_v51 = vpack.c.bf16 %v411_v44, %v403_v41  ;;  %v56_v41 = vld [vmem:[%s3732_s0 + $0xb8] sm:$0xff]  ;;  %v109_v33 = vld [vmem:[%s3732_s0 + $0x260] sm:$0xff] }
  0x51   :  { %738 = vmatprep.mubr.f32.mxu1 %v2564_v57  ;;  %561 = vmatmul.mubr.f32.gmra.mrb[6].mxu0 %v2570_v59  ;;  %v1623_v52 = vpack.c.bf16 %v426_v47, %v418_v46  ;;  %v53_v46 = vld [vmem:[%s3732_s0 + $0xa0] sm:$0xff] }
  0x52   :  { %1606 = vmatpush1.bf16.msra.mxu0 %v1605_v58  ;;  %739 = vmatmul.mubr.f32.gmra.mrb[6].mxu1 %v2570_v59  ;;  %v427_v58 = vld [vmem:[%s3732_s0 + $0xc50] sm:$0xff]  ;;  %v61_v47 = vld [vmem:[%s3732_s0 + $0xe0] sm:$0xff] }
  0x53   :  { %1714 = vmatpush1.bf16.msra.mxu1 %v1713_v60  ;;  %1608 = vmatprep.subr.bf16.mxu0 %v1607_v61  ;;  %v434_v60 = vld [vmem:[%s3732_s0 + $0xc88] sm:$0xff] }
  0x54   :  { %1716 = vmatprep.subr.bf16.mxu1 %v1715_v1  ;;  %1511 = vmatprep.mubr.msk.f32.mxu0 %vm465_vm0, %v2602_v7  ;;  %v442_v61 = vld [vmem:[%s3732_s0 + $0xcc8] sm:$0xff]  ;;  %v1733_v1 = vpack.c.bf16 %v427_v58, %v419_v55  ;;  %v2810_v55 = vld [vmem:[%s3733_s1 + $0x30] sm:$0xff]  ;;  %v72_v58 = vld [vmem:[%s3732_s0 + $0x138] sm:$0xff] }
  0x55   :  { %1515 = vmatprep.mubr.msk.f32.mxu1 %vm465_vm0, %v2602_v7  ;;  %v1627_v2 = vpack.c.bf16 %v442_v61, %v434_v60  ;;  %v80_v60 = vld [vmem:[%s3732_s0 + $0x178] sm:$0xff] }
  0x56   :  { %1610 = vmatpush1.bf16.msra.mxu0 %v1609_v8  ;;  %v443_v8 = vld [vmem:[%s3732_s0 + $0xcd0] sm:$0xff] }
  0x57   :  { %1718 = vmatpush1.bf16.msra.mxu1 %v1717_v9  ;;  %1612 = vmatprep.subr.bf16.mxu0 %v1611_v10  ;;  %v450_v9 = vld [vmem:[%s3732_s0 + $0xd08] sm:$0xff] }
  0x58   :  { %1720 = vmatprep.subr.bf16.mxu1 %v1719_v14  ;;  %v458_v10 = vld [vmem:[%s3732_s0 + $0xd48] sm:$0xff]  ;;  %v1737_v14 = vpack.c.bf16 %v443_v8, %v435_v5  ;;  %v1859_v5 = vpack.c.bf16 %v80_v60, %v72_v58  ;;  %v144_v58 = vld [vmem:[%s3732_s0 + $0x378] sm:$0xff] }
  0x59   :  { %v1631_v17 = vpack.c.bf16 %v458_v10, %v450_v9  ;;  %v94_v8 = vld [vmem:[%s3732_s0 + $0x1e8] sm:$0xff]  ;;  %v1753_v9 = vpack.c.bf16 %v77_v63, %v69_v62  ;;  %v2855_v10 = vld [vmem:[%s3733_s1 + $0x78] sm:$0xff]  ;;  %v133_v63 = vld [vmem:[%s3732_s0 + $0x320] sm:$0xff] }
  0x5a   :  { %1614 = vmatpush1.bf16.msra.mxu0 %v1613_v22  ;;  %v459_v22 = vld [vmem:[%s3732_s0 + $0xd50] sm:$0xff] }
  0x5b   :  { %1722 = vmatpush1.bf16.msra.mxu1 %v1721_v23  ;;  %1616 = vmatprep.subr.bf16.mxu0 %v1615_v24  ;;  %v38_v23 = vld [vmem:[%s3732_s0 + $0x28] sm:$0xff] }
  0x5c   :  { %1724 = vmatprep.subr.bf16.mxu1 %v1723_v28  ;;  %v46_v24 = vld [vmem:[%s3732_s0 + $0x68] sm:$0xff]  ;;  %v1741_v28 = vpack.c.bf16 %v459_v22, %v451_v20  ;;  %v95_v20 = vld [vmem:[%s3732_s0 + $0x1f0] sm:$0xff] }
  0x5d   :  { %v1743_v30 = vpack.c.bf16 %v46_v24, %v38_v23  ;;  %v110_v22 = vld [vmem:[%s3732_s0 + $0x268] sm:$0xff]  ;;  %v1863_v23 = vpack.c.bf16 %v96_v12, %v88_v11  ;;  %v104_v24 = vld [vmem:[%s3732_s0 + $0x238] sm:$0xff] }
  0x5e   :  { %1618 = vmatpush1.bf16.msra.mxu0 %v1617_v36  ;;  %v47_v36 = vld [vmem:[%s3732_s0 + $0x70] sm:$0xff] }
  0x5f   :  { %1726 = vmatpush1.bf16.msra.mxu1 %v1725_v37  ;;  %1620 = vmatprep.subr.bf16.mxu0 %v1619_v38  ;;  %v54_v37 = vld [vmem:[%s3732_s0 + $0xa8] sm:$0xff]  ;;  %v1853_v44 = vpack.c.bf16 %v47_v36, %v39_v35  ;;  %v1867_v35 = vpack.c.bf16 %v112_v25, %v104_v24  ;;  %v111_v36 = vld [vmem:[%s3732_s0 + $0x270] sm:$0xff]  ;;  %v176_v24 = vld [vmem:[%s3732_s0 + $0x478] sm:$0xff] }
  0x60   :  { %1728 = vmatprep.subr.bf16.mxu1 %v1727_v42  ;;  %v62_v38 = vld [vmem:[%s3732_s0 + $0xe8] sm:$0xff]  ;;  %v64_v42 = vld [vmem:[%s3732_s0 + $0xf8] sm:$0xff] }
  0x61   :  { %v1747_v49 = vpack.c.bf16 %v62_v38, %v54_v37  ;;  %v118_v37 = vld [vmem:[%s3732_s0 + $0x2a8] sm:$0xff] }
  0x62   :  { %1622 = vmatpush1.bf16.msra.mxu0 %v1621_v50  ;;  %v55_v50 = vld [vmem:[%s3732_s0 + $0xb0] sm:$0xff]  ;;  %v126_v38 = vld [vmem:[%s3732_s0 + $0x2e8] sm:$0xff] }
  0x63   :  { %1730 = vmatpush1.bf16.msra.mxu1 %v1729_v51  ;;  %1624 = vmatprep.subr.bf16.mxu0 %v1623_v52  ;;  %v63_v51 = vld [vmem:[%s3732_s0 + $0xf0] sm:$0xff]  ;;  %v1855_v52 = vpack.c.bf16 %v64_v42, %v56_v41  ;;  %v128_v41 = vld [vmem:[%s3732_s0 + $0x2f8] sm:$0xff]  ;;  %v1761_v42 = vpack.c.bf16 %v109_v33, %v101_v32  ;;  %v173_v32 = vld [vmem:[%s3732_s0 + $0x460] sm:$0xff] }
  0x64   :  { %1732 = vmatprep.subr.bf16.mxu1 %v1731_v56  ;;  %v1749_v56 = vpack.c.bf16 %v61_v47, %v53_v46  ;;  %v1857_v61 = vpack.c.bf16 %v63_v51, %v55_v50  ;;  %v1763_v46 = vpack.c.bf16 %v126_v38, %v118_v37  ;;  %v117_v47 = vld [vmem:[%s3732_s0 + $0x2a0] sm:$0xff]  ;;  %v119_v50 = vld [vmem:[%s3732_s0 + $0x2b0] sm:$0xff]  ;;  %v190_v37 = vld [vmem:[%s3732_s0 + $0x4e8] sm:$0xff] }
  0x65   :  { %v167_v33 = vld [vmem:[%s3732_s0 + $0x430] sm:$0xff]  ;;  %v184_v38 = vld [vmem:[%s3732_s0 + $0x4b8] sm:$0xff] }
  0x66   :  { %1626 = vmatpush1.bf16.msra.mxu0 %v1625_v0  ;;  %v2831_v0 = vld [vmem:[%s3733_s1 + $0x58] sm:$0xff] }
  0x67   :  { %1734 = vmatpush1.bf16.msra.mxu1 %v1733_v1  ;;  %1628 = vmatprep.subr.bf16.mxu0 %v1627_v2  ;;  %v1751_v1 = vpack.c.bf16 %v78_v54, %v70_v53  ;;  %v71_v2 = vld [vmem:[%s3732_s0 + $0x130] sm:$0xff]  ;;  %v134_v53 = vld [vmem:[%s3732_s0 + $0x328] sm:$0xff] }
  0x68   :  { %1736 = vmatprep.subr.bf16.mxu1 %v1735_v6  ;;  %v86_v6 = vld [vmem:[%s3732_s0 + $0x1a8] sm:$0xff] }
  0x69   :  { %v1755_v19 = vpack.c.bf16 %v94_v8, %v86_v6  ;;  %v142_v54 = vld [vmem:[%s3732_s0 + $0x368] sm:$0xff]  ;;  %v152_v8 = vld [vmem:[%s3732_s0 + $0x3b8] sm:$0xff] }
  0x6a   :  { %1630 = vmatpush1.bf16.msra.mxu0 %v1629_v13  ;;  %v1861_v13 = vpack.c.bf16 %v79_v3, %v71_v2  ;;  %v1767_v62 = vpack.c.bf16 %v142_v54, %v134_v53  ;;  %v135_v2 = vld [vmem:[%s3732_s0 + $0x330] sm:$0xff]  ;;  %v158_v6 = vld [vmem:[%s3732_s0 + $0x3e8] sm:$0xff]  ;;  %v200_v54 = vld [vmem:[%s3732_s0 + $0x538] sm:$0xff] }
  0x6b   :  { %1738 = vmatpush1.bf16.msra.mxu1 %v1737_v14  ;;  %1632 = vmatprep.subr.bf16.mxu0 %v1631_v17  ;;  %v85_v14 = vld [vmem:[%s3732_s0 + $0x1a0] sm:$0xff]  ;;  %v143_v3 = vld [vmem:[%s3732_s0 + $0x370] sm:$0xff]  ;;  %v206_v53 = vld [vmem:[%s3732_s0 + $0x568] sm:$0xff] }
  0x6c   :  { %1740 = vmatprep.subr.bf16.mxu1 %v1739_v21  ;;  %v93_v17 = vld [vmem:[%s3732_s0 + $0x1e0] sm:$0xff]  ;;  %v102_v21 = vld [vmem:[%s3732_s0 + $0x228] sm:$0xff]  ;;  %v1877_v12 = vpack.c.bf16 %v143_v3, %v135_v2 }
  0x6d   :  { %v214_v3 = vld [vmem:[%s3732_s0 + $0x5a8] sm:$0xff] }
  0x6e   :  { %1634 = vmatpush1.bf16.msra.mxu0 %v1633_v27  ;;  %v1757_v27 = vpack.c.bf16 %v93_v17, %v85_v14  ;;  %v149_v14 = vld [vmem:[%s3732_s0 + $0x3a0] sm:$0xff] }
  0x6f   :  { %1742 = vmatpush1.bf16.msra.mxu1 %v1741_v28  ;;  %1744 = vmatprep.subr.bf16.mxu0 %v1743_v30  ;;  %v1865_v28 = vpack.c.bf16 %v95_v20, %v87_v18  ;;  %v1759_v30 = vpack.c.bf16 %v110_v22, %v102_v21  ;;  %v157_v17 = vld [vmem:[%s3732_s0 + $0x3e0] sm:$0xff]  ;;  %v151_v18 = vld [vmem:[%s3732_s0 + $0x3b0] sm:$0xff]  ;;  %v166_v21 = vld [vmem:[%s3732_s0 + $0x428] sm:$0xff] }
  0x70   :  { %1852 = vmatprep.subr.bf16.mxu1 %v1851_v34  ;;  %v103_v34 = vld [vmem:[%s3732_s0 + $0x230] sm:$0xff]  ;;  %v174_v22 = vld [vmem:[%s3732_s0 + $0x468] sm:$0xff]  ;;  %v1773_v25 = vpack.c.bf16 %v157_v17, %v149_v14  ;;  %v221_v14 = vld [vmem:[%s3732_s0 + $0x5e0] sm:$0xff] }
  0x71   :  { %632 = vmatmul.mubr.f32.vlgmr.msra.gmra.mrb[0].mxu0 %v2774_v39  ;;  %v159_v20 = vld [vmem:[%s3732_s0 + $0x3f0] sm:$0xff] }
  0x72   :  { %810 = vmatmul.mubr.f32.vlgmr.msra.gmra.mrb[0].mxu1 %v2774_v39  ;;  %1746 = vmatpush1.bf16.msra.mxu0 %v1745_v40  ;;  %v120_v40 = vld [vmem:[%s3732_s0 + $0x2b8] sm:$0xff]  ;;  %v215_v17 = vld [vmem:[%s3732_s0 + $0x5b0] sm:$0xff] }
  0x73   :  { %1854 = vmatpush1.bf16.msra.mxu1 %v1853_v44  ;;  %1512 = vmatprep.mubr.msk.f32.mxu0 %vm465_vm0, %v2791_v48  ;;  %v1869_v44 = vpack.c.bf16 %v111_v36, %v103_v34  ;;  %v1871_v51 = vpack.c.bf16 %v128_v41, %v120_v40  ;;  %v182_v36 = vld [vmem:[%s3732_s0 + $0x4a8] sm:$0xff]  ;;  %v192_v40 = vld [vmem:[%s3732_s0 + $0x4f8] sm:$0xff] }
  0x74   :  { %1516 = vmatprep.mubr.msk.f32.mxu1 %vm465_vm0, %v2791_v48  ;;  %1748 = vmatprep.subr.bf16.mxu0 %v1747_v49  ;;  %v125_v49 = vld [vmem:[%s3732_s0 + $0x2e0] sm:$0xff] }
  0x75   :  { %638 = vmatmul.mubr.f32.gmra.mrb[2].mxu0 %v2810_v55  ;;  %1856 = vmatprep.subr.bf16.mxu1 %v1855_v52  ;;  %v127_v52 = vld [vmem:[%s3732_s0 + $0x2f0] sm:$0xff]  ;;  %v1765_v60 = vpack.c.bf16 %v125_v49, %v117_v47  ;;  %v189_v47 = vld [vmem:[%s3732_s0 + $0x4e0] sm:$0xff] }
  0x76   :  { %816 = vmatmul.mubr.f32.gmra.mrb[2].mxu1 %v2810_v55  ;;  %1750 = vmatpush1.bf16.msra.mxu0 %v1749_v56  ;;  %v136_v56 = vld [vmem:[%s3732_s0 + $0x338] sm:$0xff]  ;;  %v183_v49 = vld [vmem:[%s3732_s0 + $0x4b0] sm:$0xff] }
  0x77   :  { %1858 = vmatpush1.bf16.msra.mxu1 %v1857_v61  ;;  %1513 = vmatprep.mubr.msk.f32.mxu0 %vm465_vm0, %v2831_v0  ;;  %v1873_v61 = vpack.c.bf16 %v127_v52, %v119_v50  ;;  %v1887_v50 = vpack.c.bf16 %v192_v40, %v184_v38  ;;  %v198_v52 = vld [vmem:[%s3732_s0 + $0x528] sm:$0xff]  ;;  %v256_v38 = vld [vmem:[%s3732_s0 + $0x6f8] sm:$0xff] }
  0x78   :  { %1517 = vmatprep.mubr.msk.f32.mxu1 %vm465_vm0, %v2831_v0  ;;  %1752 = vmatprep.subr.bf16.mxu0 %v1751_v1  ;;  %v141_v1 = vld [vmem:[%s3732_s0 + $0x360] sm:$0xff] }
  0x79   :  { %644 = vmatmul.mubr.f32.gmra.mrb[4].mxu0 %v2843_v4  ;;  %1860 = vmatprep.subr.bf16.mxu1 %v1859_v5  ;;  %v150_v5 = vld [vmem:[%s3732_s0 + $0x3a8] sm:$0xff]  ;;  %v1769_v11 = vpack.c.bf16 %v141_v1, %v133_v63  ;;  %v205_v63 = vld [vmem:[%s3732_s0 + $0x560] sm:$0xff]  ;;  %v199_v1 = vld [vmem:[%s3732_s0 + $0x530] sm:$0xff] }
  0x7a   :  { %822 = vmatmul.mubr.f32.gmra.mrb[4].mxu1 %v2843_v4  ;;  %1754 = vmatpush1.bf16.msra.mxu0 %v1753_v9  ;;  %v160_v9 = vld [vmem:[%s3732_s0 + $0x3f8] sm:$0xff] }
  0x7b   :  { %1862 = vmatpush1.bf16.msra.mxu1 %v1861_v13  ;;  %1514 = vmatprep.mubr.msk.f32.mxu0 %vm465_vm0, %v2855_v10  ;;  %v1771_v13 = vpack.c.bf16 %v158_v6, %v150_v5  ;;  %v222_v5 = vld [vmem:[%s3732_s0 + $0x5e8] sm:$0xff]  ;;  %v216_v6 = vld [vmem:[%s3732_s0 + $0x5b8] sm:$0xff] }
  0x7c   :  { %1518 = vmatprep.mubr.msk.f32.mxu1 %vm465_vm0, %v2855_v10  ;;  %1756 = vmatprep.subr.bf16.mxu0 %v1755_v19  ;;  %v1879_v19 = vpack.c.bf16 %v160_v9, %v152_v8  ;;  %v224_v8 = vld [vmem:[%s3732_s0 + $0x5f8] sm:$0xff] }
  0x7d   :  { %650 = vmatmul.mubr.f32.gmra.mrb[6].mxu0 %v2896_v26  ;;  %1864 = vmatprep.subr.bf16.mxu1 %v1863_v23  ;;  %v168_v23 = vld [vmem:[%s3732_s0 + $0x438] sm:$0xff] }
  0x7e   :  { %828 = vmatmul.mubr.f32.gmra.mrb[6].mxu1 %v2896_v26  ;;  %1758 = vmatpush1.bf16.msra.mxu0 %v1757_v27  ;;  %v1881_v27 = vpack.c.bf16 %v159_v20, %v151_v18  ;;  %v1883_v34 = vpack.c.bf16 %v176_v24, %v168_v23  ;;  %v1895_v18 = vpack.c.bf16 %v224_v8, %v216_v6  ;;  %v230_v20 = vld [vmem:[%s3732_s0 + $0x628] sm:$0xff]  ;;  %v240_v23 = vld [vmem:[%s3732_s0 + $0x678] sm:$0xff] }
  0x7f   :  { %1866 = vmatpush1.bf16.msra.mxu1 %v1865_v28  ;;  %1760 = vmatprep.subr.bf16.mxu0 %v1759_v30  ;;  %v1775_v28 = vpack.c.bf16 %v174_v22, %v166_v21  ;;  %v165_v30 = vld [vmem:[%s3732_s0 + $0x420] sm:$0xff]  ;;  %v238_v21 = vld [vmem:[%s3732_s0 + $0x668] sm:$0xff]  ;;  %v232_v22 = vld [vmem:[%s3732_s0 + $0x638] sm:$0xff] }
  0x80   :  { %1868 = vmatprep.subr.bf16.mxu1 %v1867_v35  ;;  %898 = vmatprep.mubr.f32.mxu0 %v2325_v16  ;;  %v175_v35 = vld [vmem:[%s3732_s0 + $0x470] sm:$0xff]  ;;  %v1777_v41 = vpack.c.bf16 %v173_v32, %v165_v30  ;;  %v237_v30 = vld [vmem:[%s3732_s0 + $0x660] sm:$0xff]  ;;  %v288_v6 = vld [vmem:[%s3732_s0 + $0x7f8] sm:$0xff] }
  0x81   :  { %1076 = vmatprep.mubr.f32.mxu1 %v2325_v16  ;;  %v1875_v16 = vpack.c.bf16 %v144_v58, %v136_v56  ;;  %v208_v56 = vld [vmem:[%s3732_s0 + $0x578] sm:$0xff]  ;;  %v231_v32 = vld [vmem:[%s3732_s0 + $0x630] sm:$0xff] }
  0x82   :  { %1762 = vmatpush1.bf16.msra.mxu0 %v1761_v42  ;;  %v1885_v42 = vpack.c.bf16 %v175_v35, %v167_v33  ;;  %v1891_v2 = vpack.c.bf16 %v208_v56, %v200_v54  ;;  %v1899_v33 = vpack.c.bf16 %v240_v23, %v232_v22  ;;  %v246_v35 = vld [vmem:[%s3732_s0 + $0x6a8] sm:$0xff]  ;;  %v272_v54 = vld [vmem:[%s3732_s0 + $0x778] sm:$0xff] }
  0x83   :  { %1870 = vmatpush1.bf16.msra.mxu1 %v1869_v44  ;;  %1764 = vmatprep.subr.bf16.mxu0 %v1763_v46  ;;  %v1779_v44 = vpack.c.bf16 %v190_v37, %v182_v36  ;;  %v181_v46 = vld [vmem:[%s3732_s0 + $0x4a0] sm:$0xff]  ;;  %v254_v36 = vld [vmem:[%s3732_s0 + $0x6e8] sm:$0xff]  ;;  %v248_v37 = vld [vmem:[%s3732_s0 + $0x6b8] sm:$0xff] }
  0x84   :  { %1872 = vmatprep.subr.bf16.mxu1 %v1871_v51  ;;  %v191_v51 = vld [vmem:[%s3732_s0 + $0x4f0] sm:$0xff]  ;;  %v1781_v58 = vpack.c.bf16 %v189_v47, %v181_v46  ;;  %v253_v46 = vld [vmem:[%s3732_s0 + $0x6e0] sm:$0xff]  ;;  %v304_v22 = vld [vmem:[%s3732_s0 + $0x878] sm:$0xff] }
  0x85   :  { %v247_v47 = vld [vmem:[%s3732_s0 + $0x6b0] sm:$0xff] }
  0x86   :  { %1766 = vmatpush1.bf16.msra.mxu0 %v1765_v60  ;;  %v1889_v60 = vpack.c.bf16 %v191_v51, %v183_v49  ;;  %v1903_v49 = vpack.c.bf16 %v256_v38, %v248_v37  ;;  %v262_v51 = vld [vmem:[%s3732_s0 + $0x728] sm:$0xff]  ;;  %v320_v37 = vld [vmem:[%s3732_s0 + $0x8f8] sm:$0xff] }
  0x87   :  { %1874 = vmatpush1.bf16.msra.mxu1 %v1873_v61  ;;  %1768 = vmatprep.subr.bf16.mxu0 %v1767_v62  ;;  %v1783_v61 = vpack.c.bf16 %v206_v53, %v198_v52  ;;  %v197_v62 = vld [vmem:[%s3732_s0 + $0x520] sm:$0xff]  ;;  %v270_v52 = vld [vmem:[%s3732_s0 + $0x768] sm:$0xff]  ;;  %v264_v53 = vld [vmem:[%s3732_s0 + $0x738] sm:$0xff] }
  0x88   :  { %1876 = vmatprep.subr.bf16.mxu1 %v1875_v16  ;;  %v207_v16 = vld [vmem:[%s3732_s0 + $0x570] sm:$0xff]  ;;  %v1785_v9 = vpack.c.bf16 %v205_v63, %v197_v62  ;;  %v269_v62 = vld [vmem:[%s3732_s0 + $0x760] sm:$0xff] }
  0x89   :  { %v263_v63 = vld [vmem:[%s3732_s0 + $0x730] sm:$0xff] }
  0x8a   :  { %1770 = vmatpush1.bf16.msra.mxu0 %v1769_v11  ;;  %v1893_v11 = vpack.c.bf16 %v207_v16, %v199_v1  ;;  %v1907_v1 = vpack.c.bf16 %v272_v54, %v264_v53  ;;  %v278_v16 = vld [vmem:[%s3732_s0 + $0x7a8] sm:$0xff]  ;;  %v336_v53 = vld [vmem:[%s3732_s0 + $0x978] sm:$0xff] }
  0x8b   :  { %1878 = vmatpush1.bf16.msra.mxu1 %v1877_v12  ;;  %1772 = vmatprep.subr.bf16.mxu0 %v1771_v13  ;;  %v1787_v12 = vpack.c.bf16 %v222_v5, %v214_v3  ;;  %v213_v13 = vld [vmem:[%s3732_s0 + $0x5a0] sm:$0xff]  ;;  %v286_v3 = vld [vmem:[%s3732_s0 + $0x7e8] sm:$0xff]  ;;  %v280_v5 = vld [vmem:[%s3732_s0 + $0x7b8] sm:$0xff] }
  0x8c   :  { %1880 = vmatprep.subr.bf16.mxu1 %v1879_v19  ;;  %v223_v19 = vld [vmem:[%s3732_s0 + $0x5f0] sm:$0xff]  ;;  %v1789_v24 = vpack.c.bf16 %v221_v14, %v213_v13  ;;  %v285_v13 = vld [vmem:[%s3732_s0 + $0x7e0] sm:$0xff] }
  0x8d   :  { %v279_v14 = vld [vmem:[%s3732_s0 + $0x7b0] sm:$0xff] }
  0x8e   :  { %1774 = vmatpush1.bf16.msra.mxu0 %v1773_v25  ;;  %v1897_v25 = vpack.c.bf16 %v223_v19, %v215_v17  ;;  %v1911_v17 = vpack.c.bf16 %v288_v6, %v280_v5  ;;  %v294_v19 = vld [vmem:[%s3732_s0 + $0x828] sm:$0xff] }
  0x8f   :  { %1882 = vmatpush1.bf16.msra.mxu1 %v1881_v27  ;;  %1776 = vmatprep.subr.bf16.mxu0 %v1775_v28  ;;  %v1791_v27 = vpack.c.bf16 %v238_v21, %v230_v20  ;;  %v229_v28 = vld [vmem:[%s3732_s0 + $0x620] sm:$0xff]  ;;  %v302_v20 = vld [vmem:[%s3732_s0 + $0x868] sm:$0xff]  ;;  %v296_v21 = vld [vmem:[%s3732_s0 + $0x838] sm:$0xff] }
  0x90   :  { %1884 = vmatprep.subr.bf16.mxu1 %v1883_v34  ;;  %v239_v34 = vld [vmem:[%s3732_s0 + $0x670] sm:$0xff]  ;;  %v1793_v40 = vpack.c.bf16 %v237_v30, %v229_v28  ;;  %v301_v28 = vld [vmem:[%s3732_s0 + $0x860] sm:$0xff] }
  0x91   :  { %v295_v30 = vld [vmem:[%s3732_s0 + $0x830] sm:$0xff] }
  0x92   :  { %1778 = vmatpush1.bf16.msra.mxu0 %v1777_v41  ;;  %v1901_v41 = vpack.c.bf16 %v239_v34, %v231_v32  ;;  %v1915_v32 = vpack.c.bf16 %v304_v22, %v296_v21  ;;  %v310_v34 = vld [vmem:[%s3732_s0 + $0x8a8] sm:$0xff]  ;;  %v357_v22 = vld [vmem:[%s3732_s0 + $0xa20] sm:$0xff] }
  0x93   :  { %1886 = vmatpush1.bf16.msra.mxu1 %v1885_v42  ;;  %1780 = vmatprep.subr.bf16.mxu0 %v1779_v44  ;;  %v1795_v42 = vpack.c.bf16 %v254_v36, %v246_v35  ;;  %v245_v44 = vld [vmem:[%s3732_s0 + $0x6a0] sm:$0xff]  ;;  %v318_v35 = vld [vmem:[%s3732_s0 + $0x8e8] sm:$0xff]  ;;  %v312_v36 = vld [vmem:[%s3732_s0 + $0x8b8] sm:$0xff] }
  0x94   :  { %1888 = vmatprep.subr.bf16.mxu1 %v1887_v50  ;;  %v255_v50 = vld [vmem:[%s3732_s0 + $0x6f0] sm:$0xff]  ;;  %v1797_v56 = vpack.c.bf16 %v253_v46, %v245_v44  ;;  %v317_v44 = vld [vmem:[%s3732_s0 + $0x8e0] sm:$0xff] }
  0x95   :  { %v311_v46 = vld [vmem:[%s3732_s0 + $0x8b0] sm:$0xff] }
  0x96   :  { %1782 = vmatpush1.bf16.msra.mxu0 %v1781_v58  ;;  %v1905_v58 = vpack.c.bf16 %v255_v50, %v247_v47  ;;  %v1919_v47 = vpack.c.bf16 %v320_v37, %v312_v36  ;;  %v326_v50 = vld [vmem:[%s3732_s0 + $0x928] sm:$0xff]  ;;  %v381_v36 = vld [vmem:[%s3732_s0 + $0xae0] sm:$0xff] }
  0x97   :  { %1890 = vmatpush1.bf16.msra.mxu1 %v1889_v60  ;;  %1784 = vmatprep.subr.bf16.mxu0 %v1783_v61  ;;  %v1799_v60 = vpack.c.bf16 %v270_v52, %v262_v51  ;;  %v261_v61 = vld [vmem:[%s3732_s0 + $0x720] sm:$0xff]  ;;  %v334_v51 = vld [vmem:[%s3732_s0 + $0x968] sm:$0xff]  ;;  %v328_v52 = vld [vmem:[%s3732_s0 + $0x938] sm:$0xff] }
  0x98   :  { %1892 = vmatprep.subr.bf16.mxu1 %v1891_v2  ;;  %v271_v2 = vld [vmem:[%s3732_s0 + $0x770] sm:$0xff]  ;;  %v1801_v8 = vpack.c.bf16 %v269_v62, %v261_v61  ;;  %v333_v61 = vld [vmem:[%s3732_s0 + $0x960] sm:$0xff] }
  0x99   :  { %v327_v62 = vld [vmem:[%s3732_s0 + $0x930] sm:$0xff] }
  0x9a   :  { %1786 = vmatpush1.bf16.msra.mxu0 %v1785_v9  ;;  %v1909_v9 = vpack.c.bf16 %v271_v2, %v263_v63  ;;  %v1923_v63 = vpack.c.bf16 %v336_v53, %v328_v52  ;;  %v350_v2 = vld [vmem:[%s3732_s0 + $0x9e8] sm:$0xff]  ;;  %v399_v52 = vld [vmem:[%s3732_s0 + $0xb70] sm:$0xff] }
  0x9b   :  { %1894 = vmatpush1.bf16.msra.mxu1 %v1893_v11  ;;  %1788 = vmatprep.subr.bf16.mxu0 %v1787_v12  ;;  %v1803_v11 = vpack.c.bf16 %v286_v3, %v278_v16  ;;  %v277_v12 = vld [vmem:[%s3732_s0 + $0x7a0] sm:$0xff]  ;;  %v344_v16 = vld [vmem:[%s3732_s0 + $0x9b8] sm:$0xff]  ;;  %v406_v53 = vld [vmem:[%s3732_s0 + $0xba8] sm:$0xff] }
  0x9c   :  { %1896 = vmatprep.subr.bf16.mxu1 %v1895_v18  ;;  %v287_v18 = vld [vmem:[%s3732_s0 + $0x7f0] sm:$0xff]  ;;  %v1805_v23 = vpack.c.bf16 %v285_v13, %v277_v12  ;;  %v352_v3 = vld [vmem:[%s3732_s0 + $0x9f8] sm:$0xff]  ;;  %v358_v13 = vld [vmem:[%s3732_s0 + $0xa28] sm:$0xff] }
  0x9d   :  { %v1927_v12 = vpack.c.bf16 %v352_v3, %v344_v16  ;;  %v415_v16 = vld [vmem:[%s3732_s0 + $0xbf0] sm:$0xff]  ;;  %v422_v3 = vld [vmem:[%s3732_s0 + $0xc28] sm:$0xff] }
  0x9e   :  { %1790 = vmatpush1.bf16.msra.mxu0 %v1789_v24  ;;  %v1913_v24 = vpack.c.bf16 %v287_v18, %v279_v14  ;;  %v366_v14 = vld [vmem:[%s3732_s0 + $0xa68] sm:$0xff]  ;;  %v368_v18 = vld [vmem:[%s3732_s0 + $0xa78] sm:$0xff] }
  0x9f   :  { %1898 = vmatpush1.bf16.msra.mxu1 %v1897_v25  ;;  %1792 = vmatprep.subr.bf16.mxu0 %v1791_v27  ;;  %v1807_v25 = vpack.c.bf16 %v302_v20, %v294_v19  ;;  %v293_v27 = vld [vmem:[%s3732_s0 + $0x820] sm:$0xff]  ;;  %v1823_v21 = vpack.c.bf16 %v366_v14, %v358_v13  ;;  %v423_v13 = vld [vmem:[%s3732_s0 + $0xc30] sm:$0xff] }
  0xa0   :  { %1900 = vmatprep.subr.bf16.mxu1 %v1899_v33  ;;  %v303_v33 = vld [vmem:[%s3732_s0 + $0x870] sm:$0xff]  ;;  %v1809_v38 = vpack.c.bf16 %v301_v28, %v293_v27  ;;  %v382_v27 = vld [vmem:[%s3732_s0 + $0xae8] sm:$0xff]  ;;  %v376_v28 = vld [vmem:[%s3732_s0 + $0xab8] sm:$0xff] }
  0xa2   :  { %1794 = vmatpush1.bf16.msra.mxu0 %v1793_v40  ;;  %v1917_v40 = vpack.c.bf16 %v303_v33, %v295_v30  ;;  %v384_v30 = vld [vmem:[%s3732_s0 + $0xaf8] sm:$0xff] }
  0xa3   :  { %1902 = vmatpush1.bf16.msra.mxu1 %v1901_v41  ;;  %1796 = vmatprep.subr.bf16.mxu0 %v1795_v42  ;;  %v1811_v41 = vpack.c.bf16 %v318_v35, %v310_v34  ;;  %v309_v42 = vld [vmem:[%s3732_s0 + $0x8a0] sm:$0xff]  ;;  %v1935_v37 = vpack.c.bf16 %v384_v30, %v376_v28  ;;  %v447_v28 = vld [vmem:[%s3732_s0 + $0xcf0] sm:$0xff]  ;;  %v454_v30 = vld [vmem:[%s3732_s0 + $0xd28] sm:$0xff] }
  0xa4   :  { %1904 = vmatprep.subr.bf16.mxu1 %v1903_v49  ;;  %v319_v49 = vld [vmem:[%s3732_s0 + $0x8f0] sm:$0xff]  ;;  %v1813_v54 = vpack.c.bf16 %v317_v44, %v309_v42  ;;  %v373_v35 = vld [vmem:[%s3732_s0 + $0xaa0] sm:$0xff]  ;;  %v400_v42 = vld [vmem:[%s3732_s0 + $0xb78] sm:$0xff] }
  0xa5   :  { %v1829_v44 = vpack.c.bf16 %v381_v36, %v373_v35 }
  0xa6   :  { %1798 = vmatpush1.bf16.msra.mxu0 %v1797_v56  ;;  %v1921_v56 = vpack.c.bf16 %v319_v49, %v311_v46  ;;  %v389_v49 = vld [vmem:[%s3732_s0 + $0xb20] sm:$0xff] }
  0xa7   :  { %1906 = vmatpush1.bf16.msra.mxu1 %v1905_v58  ;;  %1800 = vmatprep.subr.bf16.mxu0 %v1799_v60  ;;  %v1815_v58 = vpack.c.bf16 %v334_v51, %v326_v50  ;;  %v325_v60 = vld [vmem:[%s3732_s0 + $0x920] sm:$0xff]  ;;  %v391_v51 = vld [vmem:[%s3732_s0 + $0xb30] sm:$0xff] }
  0xa8   :  { %1908 = vmatprep.subr.bf16.mxu1 %v1907_v1  ;;  %v342_v1 = vld [vmem:[%s3732_s0 + $0x9a8] sm:$0xff]  ;;  %v1817_v5 = vpack.c.bf16 %v333_v61, %v325_v60  ;;  %v397_v50 = vld [vmem:[%s3732_s0 + $0xb60] sm:$0xff]  ;;  %v1941_v61 = vpack.c.bf16 %v399_v52, %v391_v51 }
  0xa9   :  { %v1833_v60 = vpack.c.bf16 %v397_v50, %v389_v49 }
  0xaa   :  { %1802 = vmatpush1.bf16.msra.mxu0 %v1801_v8  ;;  %v1819_v8 = vpack.c.bf16 %v350_v2, %v342_v1  ;;  %v407_v1 = vld [vmem:[%s3732_s0 + $0xbb0] sm:$0xff] }
  0xab   :  { %1910 = vmatpush1.bf16.msra.mxu1 %v1909_v9  ;;  %1804 = vmatprep.subr.bf16.mxu0 %v1803_v11  ;;  %v341_v9 = vld [vmem:[%s3732_s0 + $0x9a0] sm:$0xff] }
  0xac   :  { %1912 = vmatprep.subr.bf16.mxu1 %v1911_v17  ;;  %v349_v11 = vld [vmem:[%s3732_s0 + $0x9e0] sm:$0xff]  ;;  %v360_v17 = vld [vmem:[%s3732_s0 + $0xa38] sm:$0xff] }
  0xad   :  { %v1821_v19 = vpack.c.bf16 %v349_v11, %v341_v9  ;;  %v1945_v11 = vpack.c.bf16 %v415_v16, %v407_v1 }
  0xae   :  { %1806 = vmatpush1.bf16.msra.mxu0 %v1805_v23  ;;  %v365_v23 = vld [vmem:[%s3732_s0 + $0xa60] sm:$0xff] }
  0xaf   :  { %1914 = vmatpush1.bf16.msra.mxu1 %v1913_v24  ;;  %1808 = vmatprep.subr.bf16.mxu0 %v1807_v25  ;;  %v1931_v24 = vpack.c.bf16 %v368_v18, %v360_v17  ;;  %v374_v25 = vld [vmem:[%s3732_s0 + $0xaa8] sm:$0xff]  ;;  %v431_v17 = vld [vmem:[%s3732_s0 + $0xc70] sm:$0xff] }
  0xb0   :  { %1916 = vmatprep.subr.bf16.mxu1 %v1915_v32  ;;  %v1825_v32 = vpack.c.bf16 %v365_v23, %v357_v22  ;;  %v1827_v34 = vpack.c.bf16 %v382_v27, %v374_v25  ;;  %v438_v18 = vld [vmem:[%s3732_s0 + $0xca8] sm:$0xff]  ;;  %v1949_v23 = vpack.c.bf16 %v431_v17, %v423_v13  ;;  %v439_v25 = vld [vmem:[%s3732_s0 + $0xcb0] sm:$0xff] }
  0xb1   :  { %899 = vmatmul.mubr.f32.vlgmr.msra.gmra.mrb[8].mxu0 %v2458_v15  ;;  %v1953_v36 = vpack.c.bf16 %v447_v28, %v439_v25 }
  0xb2   :  { %1810 = vmatpush1.bf16.msra.mxu0 %v1809_v38  ;;  %1077 = vmatmul.mubr.f32.vlgmr.msra.gmra.mrb[8].mxu1 %v2458_v15  ;;  %v335_v15 = vld [vmem:[%s3732_s0 + $0x970] sm:$0xff]  ;;  %v390_v38 = vld [vmem:[%s3732_s0 + $0xb28] sm:$0xff] }
  0xb3   :  { %1918 = vmatpush1.bf16.msra.mxu1 %v1917_v40  ;;  %1812 = vmatprep.subr.bf16.mxu0 %v1811_v41  ;;  %v1925_v6 = vpack.c.bf16 %v335_v15, %v327_v62  ;;  %v398_v40 = vld [vmem:[%s3732_s0 + $0xb68] sm:$0xff]  ;;  %v392_v41 = vld [vmem:[%s3732_s0 + $0xb38] sm:$0xff]  ;;  %v413_v15 = vld [vmem:[%s3732_s0 + $0xbe0] sm:$0xff] }
  0xb4   :  { %1920 = vmatprep.subr.bf16.mxu1 %v1919_v47  ;;  %904 = vmatprep.mubr.f32.mxu0 %v2488_v29  ;;  %v1831_v47 = vpack.c.bf16 %v398_v40, %v390_v38  ;;  %v455_v40 = vld [vmem:[%s3732_s0 + $0xd30] sm:$0xff] }
  0xb5   :  { %1082 = vmatprep.mubr.f32.mxu1 %v2488_v29  ;;  %905 = vmatmul.mubr.f32.gmra.mrb[10].mxu0 %v2494_v31  ;;  %v343_v29 = vld [vmem:[%s3732_s0 + $0x9b0] sm:$0xff] }
  0xb6   :  { %1814 = vmatpush1.bf16.msra.mxu0 %v1813_v54  ;;  %1083 = vmatmul.mubr.f32.gmra.mrb[10].mxu1 %v2494_v31  ;;  %v351_v31 = vld [vmem:[%s3732_s0 + $0x9f0] sm:$0xff]  ;;  %v414_v54 = vld [vmem:[%s3732_s0 + $0xbe8] sm:$0xff] }
  0xb7   :  { %1922 = vmatpush1.bf16.msra.mxu1 %v1921_v56  ;;  %1816 = vmatprep.subr.bf16.mxu0 %v1815_v58  ;;  %v1929_v20 = vpack.c.bf16 %v351_v31, %v343_v29  ;;  %v408_v56 = vld [vmem:[%s3732_s0 + $0xbb8] sm:$0xff]  ;;  %v1835_v62 = vpack.c.bf16 %v414_v54, %v406_v53  ;;  %v429_v31 = vld [vmem:[%s3732_s0 + $0xc60] sm:$0xff] }
  0xb8   :  { %1924 = vmatprep.subr.bf16.mxu1 %v1923_v63  ;;  %910 = vmatprep.mubr.f32.mxu0 %v2526_v43  ;;  %v416_v58 = vld [vmem:[%s3732_s0 + $0xbf8] sm:$0xff]  ;;  %v405_v63 = vld [vmem:[%s3732_s0 + $0xba0] sm:$0xff] }
  0xb9   :  { %1088 = vmatprep.mubr.f32.mxu1 %v2526_v43  ;;  %911 = vmatmul.mubr.f32.gmra.mrb[12].mxu0 %v2532_v45  ;;  %v359_v43 = vld [vmem:[%s3732_s0 + $0xa30] sm:$0xff]  ;;  %v1943_v2 = vpack.c.bf16 %v416_v58, %v408_v56  ;;  %v1837_v9 = vpack.c.bf16 %v413_v15, %v405_v63 }
  0xba   :  { %1818 = vmatpush1.bf16.msra.mxu0 %v1817_v5  ;;  %1089 = vmatmul.mubr.f32.gmra.mrb[12].mxu1 %v2532_v45  ;;  %v367_v45 = vld [vmem:[%s3732_s0 + $0xa70] sm:$0xff]  ;;  %v430_v5 = vld [vmem:[%s3732_s0 + $0xc68] sm:$0xff] }
  0xbb   :  { %1926 = vmatpush1.bf16.msra.mxu1 %v1925_v6  ;;  %1820 = vmatprep.subr.bf16.mxu0 %v1819_v8  ;;  %v1933_v33 = vpack.c.bf16 %v367_v45, %v359_v43  ;;  %v424_v6 = vld [vmem:[%s3732_s0 + $0xc38] sm:$0xff]  ;;  %v1839_v29 = vpack.c.bf16 %v430_v5, %v422_v3  ;;  %v445_v45 = vld [vmem:[%s3732_s0 + $0xce0] sm:$0xff] }
  0xbc   :  { %1928 = vmatprep.subr.bf16.mxu1 %v1927_v12  ;;  %916 = vmatprep.mubr.f32.mxu0 %v2564_v57  ;;  %v432_v8 = vld [vmem:[%s3732_s0 + $0xc78] sm:$0xff]  ;;  %v421_v12 = vld [vmem:[%s3732_s0 + $0xc20] sm:$0xff] }
  0xbd   :  { %1094 = vmatprep.mubr.f32.mxu1 %v2564_v57  ;;  %917 = vmatmul.mubr.f32.gmra.mrb[14].mxu0 %v2570_v59  ;;  %v375_v57 = vld [vmem:[%s3732_s0 + $0xab0] sm:$0xff]  ;;  %v1947_v14 = vpack.c.bf16 %v432_v8, %v424_v6  ;;  %v1841_v22 = vpack.c.bf16 %v429_v31, %v421_v12 }
  0xbe   :  { %1822 = vmatpush1.bf16.msra.mxu0 %v1821_v19  ;;  %1095 = vmatmul.mubr.f32.gmra.mrb[14].mxu1 %v2570_v59  ;;  %v383_v59 = vld [vmem:[%s3732_s0 + $0xaf0] sm:$0xff]  ;;  %v446_v19 = vld [vmem:[%s3732_s0 + $0xce8] sm:$0xff] }
  0xbf   :  { %1930 = vmatpush1.bf16.msra.mxu1 %v1929_v20  ;;  %1824 = vmatprep.subr.bf16.mxu0 %v1823_v21  ;;  %v1937_v46 = vpack.c.bf16 %v383_v59, %v375_v57  ;;  %v440_v20 = vld [vmem:[%s3732_s0 + $0xcb8] sm:$0xff]  ;;  %v1843_v43 = vpack.c.bf16 %v446_v19, %v438_v18  ;;  %v461_v59 = vld [vmem:[%s3732_s0 + $0xd60] sm:$0xff] }
  0xc0   :  { %1932 = vmatprep.subr.bf16.mxu1 %v1931_v24  ;;  %1519 = vmatprep.mubr.msk.f32.mxu0 %vm465_vm0, %v2602_v7  ;;  %v448_v21 = vld [vmem:[%s3732_s0 + $0xcf8] sm:$0xff]  ;;  %v437_v24 = vld [vmem:[%s3732_s0 + $0xca0] sm:$0xff] }
  0xc1   :  { %1523 = vmatprep.mubr.msk.f32.mxu1 %vm465_vm0, %v2602_v7  ;;  %v1939_v7 = vpack.c.bf16 %v400_v42, %v392_v41  ;;  %v1951_v27 = vpack.c.bf16 %v448_v21, %v440_v20  ;;  %v1845_v35 = vpack.c.bf16 %v445_v45, %v437_v24  ;;  %v463_v41 = vld [vmem:[%s3732_s0 + $0xd70] sm:$0xff] }
  0xc2   :  { %1826 = vmatpush1.bf16.msra.mxu0 %v1825_v32  ;;  %v462_v32 = vld [vmem:[%s3732_s0 + $0xd68] sm:$0xff] }
  0xc3   :  { %1934 = vmatpush1.bf16.msra.mxu1 %v1933_v33  ;;  %1828 = vmatprep.subr.bf16.mxu0 %v1827_v34  ;;  %v456_v33 = vld [vmem:[%s3732_s0 + $0xd38] sm:$0xff]  ;;  %v1847_v57 = vpack.c.bf16 %v462_v32, %v454_v30 }
  0xc4   :  { %1936 = vmatprep.subr.bf16.mxu1 %v1935_v37  ;;  %v464_v34 = vld [vmem:[%s3732_s0 + $0xd78] sm:$0xff]  ;;  %v453_v37 = vld [vmem:[%s3732_s0 + $0xd20] sm:$0xff] }
  0xc5   :  { %v1955_v38 = vpack.c.bf16 %v464_v34, %v456_v33  ;;  %v1849_v42 = vpack.c.bf16 %v461_v59, %v453_v37 }
  0xc6   :  { %1830 = vmatpush1.bf16.msra.mxu0 %v1829_v44  ;;  %v1957_v44 = vpack.c.bf16 %v463_v41, %v455_v40 }
  0xc7   :  { %1938 = vmatpush1.bf16.msra.mxu1 %v1937_v46  ;;  %1832 = vmatprep.subr.bf16.mxu0 %v1831_v47 }
  0xc8   :  { %1940 = vmatprep.subr.bf16.mxu1 %v1939_v7 }
  0xca   :  { %1834 = vmatpush1.bf16.msra.mxu0 %v1833_v60 }
  0xcb   :  { %1942 = vmatpush1.bf16.msra.mxu1 %v1941_v61  ;;  %1836 = vmatprep.subr.bf16.mxu0 %v1835_v62 }
  0xcc   :  { %1944 = vmatprep.subr.bf16.mxu1 %v1943_v2 }
  0xce   :  { %1838 = vmatpush1.bf16.msra.mxu0 %v1837_v9 }
  0xcf   :  { %1946 = vmatpush1.bf16.msra.mxu1 %v1945_v11  ;;  %1840 = vmatprep.subr.bf16.mxu0 %v1839_v29 }
  0xd0   :  { %1948 = vmatprep.subr.bf16.mxu1 %v1947_v14 }
  0xd2   :  { %1842 = vmatpush1.bf16.msra.mxu0 %v1841_v22 }
  0xd3   :  { %1950 = vmatpush1.bf16.msra.mxu1 %v1949_v23  ;;  %1844 = vmatprep.subr.bf16.mxu0 %v1843_v43 }
  0xd4   :  { %1952 = vmatprep.subr.bf16.mxu1 %v1951_v27 }
  0xd6   :  { %1846 = vmatpush1.bf16.msra.mxu0 %v1845_v35 }
  0xd7   :  { %1954 = vmatpush1.bf16.msra.mxu1 %v1953_v36  ;;  %1848 = vmatprep.subr.bf16.mxu0 %v1847_v57 }
  0xd8   :  { %1956 = vmatprep.subr.bf16.mxu1 %v1955_v38 }
  0xda   :  { %1850 = vmatpush1.bf16.msra.mxu0 %v1849_v42 }
  0xdb   :  { %1958 = vmatpush1.bf16.msra.mxu1 %v1957_v44 }
  0xdd   :  { %988 = vmatmul.mubr.f32.vlgmr.msra.gmra.mrb[8].mxu0 %v2774_v39 }
  0xde   :  { %1166 = vmatmul.mubr.f32.vlgmr.msra.gmra.mrb[8].mxu1 %v2774_v39  ;;  %1520 = vmatprep.mubr.msk.f32.mxu0 %vm465_vm0, %v2791_v48 }
  0xdf   :  { %1524 = vmatprep.mubr.msk.f32.mxu1 %vm465_vm0, %v2791_v48 }
  0xe1   :  { %994 = vmatmul.mubr.f32.gmra.mrb[10].mxu0 %v2810_v55 }
  0xe2   :  { %1172 = vmatmul.mubr.f32.gmra.mrb[10].mxu1 %v2810_v55  ;;  %1521 = vmatprep.mubr.msk.f32.mxu0 %vm465_vm0, %v2831_v0 }
  0xe3   :  { %1525 = vmatprep.mubr.msk.f32.mxu1 %vm465_vm0, %v2831_v0 }
  0xe5   :  { %1000 = vmatmul.mubr.f32.gmra.mrb[12].mxu0 %v2843_v4 }
  0xe6   :  { %1178 = vmatmul.mubr.f32.gmra.mrb[12].mxu1 %v2843_v4  ;;  %1522 = vmatprep.mubr.msk.f32.mxu0 %vm465_vm0, %v2855_v10 }
  0xe7   :  { %1526 = vmatprep.mubr.msk.f32.mxu1 %vm465_vm0, %v2855_v10 }
  0xe9   :  { %1006 = vmatmul.mubr.f32.gmra.mrb[14].mxu0 %v2896_v26 }
  0xea   :  { %1184 = vmatmul.mubr.f32.gmra.mrb[14].mxu1 %v2896_v26 }
 0x144   :  { %v3484_v39 = vpop.f32.mrb[0].mxu0 }
 0x145   :  { %v1226_v48 = vmul.f32 %v3484_v39, %v3484_v39  ;;  %v3488_v55 = vpop.f32.mrb[0].mxu1  ;;  %v3490_v0 = vpop.f32.mrb[1].mxu0 }
 0x146   :  { %v1190_v4 = vadd.f32 %v3490_v0, %v3484_v39  ;;  %v1227_v46 = vmul.f32 %v3490_v0, %v3490_v0  ;;  %v3496_v10 = vpop.f32.mrb[1].mxu1  ;;  %v1228_v26 = vmul.f32 %v3488_v55, %v3488_v55 }
 0x147   :  { %v1229_v54 = vmul.f32 %v3496_v10, %v3496_v10 }
 0x148   :  { %v1258_v47 = vadd.f32 %v1227_v46, %v1226_v48  ;;  %v1191_v49 = vadd.f32 %v1190_v4, %v3488_v55  ;;  %v3501_v50 = vpop.f32.mrb[2].mxu0 }
 0x149   :  { %v1234_v51 = vmul.f32 %v3501_v50, %v3501_v50  ;;  %v3505_v7 = vpop.f32.mrb[2].mxu1  ;;  %v3507_v52 = vpop.f32.mrb[3].mxu0 }
 0x14a   :  { %v1192_v53 = vadd.f32 %v1191_v49, %v3496_v10  ;;  %v1259_v56 = vadd.f32 %v1258_v47, %v1228_v26  ;;  %v1199_v58 = vadd.f32 %v3507_v52, %v3501_v50  ;;  %v3514_v60 = vpop.f32.mrb[3].mxu1  ;;  %v1235_v61 = vmul.f32 %v3507_v52, %v3507_v52 }
 0x14b   :  { %v1236_v1 = vmul.f32 %v3505_v7, %v3505_v7  ;;  %v1237_v29 = vmul.f32 %v3514_v60, %v3514_v60 }
 0x14c   :  { %v1260_v62 = vadd.f32 %v1259_v56, %v1229_v54  ;;  %v1200_v63 = vadd.f32 %v1199_v58, %v3505_v7  ;;  %v3519_v15 = vpop.f32.mrb[4].mxu0  ;;  %v1267_v2 = vadd.f32 %v1235_v61, %v1234_v51 }
 0x14d   :  { %v1242_v16 = vmul.f32 %v3519_v15, %v3519_v15  ;;  %v3525_v3 = vpop.f32.mrb[4].mxu1  ;;  %v3527_v5 = vpop.f32.mrb[5].mxu0 }
 0x14e   :  { %v1201_v6 = vadd.f32 %v1200_v63, %v3514_v60  ;;  %v1208_v8 = vadd.f32 %v3527_v5, %v3519_v15  ;;  %v1243_v9 = vmul.f32 %v3527_v5, %v3527_v5  ;;  %v3534_v11 = vpop.f32.mrb[5].mxu1  ;;  %v1268_v12 = vadd.f32 %v1267_v2, %v1236_v1 }
 0x14f   :  { %v1244_v31 = vmul.f32 %v3525_v3, %v3525_v3  ;;  %v1245_v23 = vmul.f32 %v3534_v11, %v3534_v11 }
 0x150   :  { %v1276_v13 = vadd.f32 %v1243_v9, %v1242_v16  ;;  %v1209_v14 = vadd.f32 %v1208_v8, %v3525_v3  ;;  %v3541_v17 = vpop.f32.mrb[6].mxu0  ;;  %v1269_v18 = vadd.f32 %v1268_v12, %v1237_v29 }
 0x151   :  { %v1250_v19 = vmul.f32 %v3541_v17, %v3541_v17  ;;  %v3545_v20 = vpop.f32.mrb[6].mxu1  ;;  %v3547_v21 = vpop.f32.mrb[7].mxu0 }
 0x152   :  { %v1210_v22 = vadd.f32 %v1209_v14, %v3534_v11  ;;  %v1277_v43 = vadd.f32 %v1276_v13, %v1244_v31  ;;  %v1217_v24 = vadd.f32 %v3547_v21, %v3541_v17  ;;  %v3554_v45 = vpop.f32.mrb[7].mxu1  ;;  %v1251_v25 = vmul.f32 %v3547_v21, %v3547_v21 }
 0x153   :  { %v1252_v30 = vmul.f32 %v3545_v20, %v3545_v20  ;;  %v1253_v34 = vmul.f32 %v3554_v45, %v3554_v45 }
 0x154   :  { %v1278_v27 = vadd.f32 %v1277_v43, %v1245_v23  ;;  %v1218_v28 = vadd.f32 %v1217_v24, %v3545_v20  ;;  %v1285_v32 = vadd.f32 %v1251_v25, %v1250_v19 }
 0x156   :  { %v1219_v33 = vadd.f32 %v1218_v28, %v3554_v45  ;;  %v1286_v35 = vadd.f32 %v1285_v32, %v1252_v30 }
 0x158   :  { %v1287_v36 = vadd.f32 %v1286_v35, %v1253_v34 }
 0x1b0   :  { %v3564_v57 = vpop.f32.mrb[8].mxu0 }
 0x1b1   :  { %v1193_v37 = vadd.f32 %v1192_v53, %v3564_v57  ;;  %v1230_v59 = vmul.f32 %v3564_v57, %v3564_v57  ;;  %v3569_v38 = vpop.f32.mrb[8].mxu1  ;;  %v3571_v40 = vpop.f32.mrb[9].mxu0 }
 0x1b2   :  { %v1231_v41 = vmul.f32 %v3571_v40, %v3571_v40  ;;  %v3575_v42 = vpop.f32.mrb[9].mxu1  ;;  %v1232_v4 = vmul.f32 %v3569_v38, %v3569_v38 }
 0x1b3   :  { %v1261_v44 = vadd.f32 %v1260_v62, %v1230_v59  ;;  %v1194_v48 = vadd.f32 %v1193_v37, %v3571_v40  ;;  %v1233_v61 = vmul.f32 %v3575_v42, %v3575_v42 }
 0x1b4   :  { %v3580_v46 = vpop.f32.mrb[10].mxu0 }
 0x1b5   :  { %v1202_v26 = vadd.f32 %v1201_v6, %v3580_v46  ;;  %v1238_v47 = vmul.f32 %v3580_v46, %v3580_v46  ;;  %v3585_v49 = vpop.f32.mrb[10].mxu1  ;;  %v3587_v51 = vpop.f32.mrb[11].mxu0  ;;  %v1195_v53 = vadd.f32 %v1194_v48, %v3569_v38  ;;  %v1262_v54 = vadd.f32 %v1261_v44, %v1231_v41 }
 0x1b6   :  { %v1239_v56 = vmul.f32 %v3587_v51, %v3587_v51  ;;  %v3592_v58 = vpop.f32.mrb[11].mxu1  ;;  %v1240_v16 = vmul.f32 %v3585_v49, %v3585_v49 }
 0x1b7   :  { %v1270_v62 = vadd.f32 %v1269_v18, %v1238_v47  ;;  %v1203_v63 = vadd.f32 %v1202_v26, %v3587_v51  ;;  %v1196_v1 = vadd.f32 %v1195_v53, %v3575_v42  ;;  %v1263_v2 = vadd.f32 %v1262_v54, %v1232_v4 }
 0x1b8   :  { %v3600_v6 = vpop.f32.mrb[12].mxu0  ;;  %v1241_v43 = vmul.f32 %v3592_v58, %v3592_v58 }
 0x1b9   :  { %v1211_v8 = vadd.f32 %v1210_v22, %v3600_v6  ;;  %v1246_v9 = vmul.f32 %v3600_v6, %v3600_v6  ;;  %v3605_v29 = vpop.f32.mrb[12].mxu1  ;;  %1197 = vadd.xlane.f32.xlu0 %v1196_v1  ;;  %v3607_v12 = vpop.f32.mrb[13].mxu0  ;;  %v1264_v31 = vadd.f32 %v1263_v2, %v1233_v61  ;;  %v1271_v13 = vadd.f32 %v1270_v62, %v1239_v56 }
 0x1ba   :  { %v3609_v14 = vpop.f32.mrb[13].mxu1  ;;  %v1247_v18 = vmul.f32 %v3607_v12, %v3607_v12  ;;  %v1204_v19 = vadd.f32 %v1203_v63, %v3585_v49  ;;  %v1248_v59 = vmul.f32 %v3605_v29, %v3605_v29 }
 0x1bb   :  { %v1279_v23 = vadd.f32 %v1278_v27, %v1246_v9  ;;  %v1212_v22 = vadd.f32 %v1211_v8, %v3607_v12  ;;  %v1272_v24 = vadd.f32 %v1271_v13, %v1240_v16  ;;  %v1249_v47 = vmul.f32 %v3609_v14, %v3609_v14 }
 0x1bc   :  { %v3617_v25 = vpop.f32.mrb[14].mxu0  ;;  %v1205_v28 = vadd.f32 %v1204_v19, %v3592_v58  ;;  %v2002_v16 = vmov 0  }
 0x1bd   :  { %v1220_v30 = vadd.f32 %v1219_v33, %v3617_v25  ;;  %v1254_v32 = vmul.f32 %v3617_v25, %v3617_v25  ;;  %v3623_v34 = vpop.f32.mrb[14].mxu1  ;;  %1265 = vadd.xlane.f32.xlu0 %v1264_v31  ;;  %v3625_v35 = vpop.f32.mrb[15].mxu0  ;;  %v1273_v27 = vadd.f32 %v1272_v24, %v1241_v43  ;;  %v1213_v37 = vadd.f32 %v1212_v22, %v3605_v29 }
 0x1be   :  { %v3630_v41 = vpop.f32.mrb[15].mxu1  ;;  %v1255_v44 = vmul.f32 %v3625_v35, %v3625_v35  ;;  %v1280_v33 = vadd.f32 %v1279_v23, %v1247_v18  ;;  %v1256_v54 = vmul.f32 %v3623_v34, %v3623_v34  ;;  %1992 = vset.pattern.permute.xlu0 %v2002_v16  ;;  %1993 = vset.pattern.permute.xlu1 %v2002_v16 }
 0x1bf   :  { %v1288_v48 = vadd.f32 %v1287_v36, %v1254_v32  ;;  %v1221_v4 = vadd.f32 %v1220_v30, %v3625_v35  ;;  %1274 = vadd.xlane.f32.xlu1 %v1273_v27  ;;  %v1214_v26 = vadd.f32 %v1213_v37, %v3609_v14  ;;  %v1257_v36 = vmul.f32 %v3630_v41, %v3630_v41 }
 0x1c0   :  { %v1281_v53 = vadd.f32 %v1280_v33, %v1248_v59 }
 0x1c1   :  { %v1289_v56 = vadd.f32 %v1288_v48, %v1255_v44  ;;  %1206 = vadd.xlane.f32.xlu0 %v1205_v28  ;;  %v1222_v61 = vadd.f32 %v1221_v4, %v3623_v34 }
 0x1c2   :  { %v1282_v62 = vadd.f32 %v1281_v53, %v1249_v47 }
 0x1c3   :  { %1215 = vadd.xlane.f32.xlu1 %v1214_v26  ;;  %v1223_v63 = vadd.f32 %v1222_v61, %v3630_v41  ;;  %v1290_v1 = vadd.f32 %v1289_v56, %v1256_v54  ;;  %v1311_v61 = vld [vmem:[%s3734_s2] sm:$0xff] }
 0x1c5   :  { %1283 = vadd.xlane.f32.xlu0 %v1282_v62  ;;  %v1291_v2 = vadd.f32 %v1290_v1, %v1257_v36 }
 0x1c7   :  { %1224 = vadd.xlane.f32.xlu1 %v1223_v63 }
 0x1cb   :  { %1292 = vadd.xlane.f32.xlu1 %v1291_v2  ;;  %v1312_v2 = vld [vmem:[%s3734_s2 + $0x8] sm:$0xff] }
 0x246   :  { %v1198_v8 = vpop.xlane.xlu0 %1197 }
 0x247   :  { %v1295_v9 = vmul.f32 0.0009765625, %v1198_v8 }
 0x249   :  { %v1303_v13 = vmul.f32 %v1295_v9, %v1295_v9 }
 0x24a   :  { %v1266_v31 = vpop.xlane.xlu0 %1265 }
 0x24b   :  { %v1299_v18 = vmul.f32 0.0009765625, %v1266_v31 }
 0x24c   :  { %v1275_v19 = vpop.xlane.xlu1 %1274 }
 0x24d   :  { %v1307_v23 = vsub.f32 %v1299_v18, %v1303_v13  ;;  %v1300_v30 = vmul.f32 0.0009765625, %v1275_v19  ;;  %v1327_v18 = vld [vmem:[%s3735_s3] sm:$0xff] }
 0x24e   :  { %v1207_v22 = vpop.xlane.xlu0 %1206 }
 0x24f   :  { %v1315_v43 = vadd.f32 1e-05, %v1307_v23  ;;  %v1296_v24 = vmul.f32 0.0009765625, %v1207_v22  ;;  %v1313_v22 = vld [vmem:[%s3734_s2 + $0x10] sm:$0xff] }
 0x250   :  { %v1216_v28 = vpop.xlane.xlu1 %1215 }
 0x251   :  { %1994 = vrsqrt.f32 %v1315_v43  ;;  %v1304_v32 = vmul.f32 %v1296_v24, %v1296_v24  ;;  %v1297_v27 = vmul.f32 0.0009765625, %v1216_v28 }
 0x252   :  { %v1284_v37 = vpop.xlane.xlu0 %1283 }
 0x253   :  { %v1308_v59 = vsub.f32 %v1300_v30, %v1304_v32  ;;  %v1305_v44 = vmul.f32 %v1297_v27, %v1297_v27  ;;  %v1301_v33 = vmul.f32 0.0009765625, %v1284_v37  ;;  %v1328_v30 = vld [vmem:[%s3735_s3 + $0x8] sm:$0xff]  ;;  %v1314_v37 = vld [vmem:[%s3734_s2 + $0x18] sm:$0xff] }
 0x254   :  { %v1225_v48 = vpop.xlane.xlu1 %1224 }
 0x255   :  { %v1316_v4 = vadd.f32 1e-05, %v1308_v59  ;;  %v1309_v26 = vsub.f32 %v1301_v33, %v1305_v44  ;;  %v1298_v47 = vmul.f32 0.0009765625, %v1225_v48  ;;  %v1329_v33 = vld [vmem:[%s3735_s3 + $0x10] sm:$0xff] }
 0x257   :  { %1996 = vrsqrt.f32 %v1316_v4  ;;  %v1317_v54 = vadd.f32 1e-05, %v1309_v26  ;;  %v1306_v36 = vmul.f32 %v1298_v47, %v1298_v47  ;;  %v1330_v4 = vld [vmem:[%s3735_s3 + $0x18] sm:$0xff] }
 0x258   :  { %v1293_v53 = vpop.xlane.xlu1 %1292 }
 0x259   :  { %v1302_v56 = vmul.f32 0.0009765625, %v1293_v53  ;;  %1998 = vrsqrt.f32 %v1317_v54 }
 0x25b   :  { %v1995_v62 = vpop.eup %1994  ;;  %v1310_v1 = vsub.f32 %v1302_v56, %v1306_v36 }
 0x25c   :  { %v1323_v63 = vmul.f32 %v1995_v62, %v1311_v61 }
 0x25d   :  { %v1318_v8 = vadd.f32 1e-05, %v1310_v1 }
 0x25e   :  { %1341 = vperm.xlu0 %1992, %v1323_v63   ;;  %v1331_v13 = vmul.f32 %v1323_v63, %v1295_v9 }
 0x25f   :  { %2000 = vrsqrt.f32 %v1318_v8 }
 0x260   :  { %v1335_v19 = vsub.f32 %v1327_v18, %v1331_v13 }
 0x261   :  { %v1997_v16 = vpop.eup %1996 }
 0x262   :  { %v1324_v31 = vmul.f32 %v1997_v16, %v1312_v2 }
 0x263   :  { %v1999_v23 = vpop.eup %1998 }
 0x264   :  { %1346 = vperm.xlu1 %1993, %v1324_v31   ;;  %v1332_v43 = vmul.f32 %v1324_v31, %v1296_v24  ;;  %v1325_v28 = vmul.f32 %v1999_v23, %v1313_v22 }
 0x266   :  { %v1336_v9 = vsub.f32 %v1328_v30, %v1332_v43  ;;  %v1333_v44 = vmul.f32 %v1325_v28, %v1297_v27 }
 0x268   :  { %1393 = vperm.xlu1 %1993, %v1335_v19   ;;  %v1337_v24 = vsub.f32 %v1329_v33, %v1333_v44 }
 0x269   :  { %v2001_v32 = vpop.eup %2000 }
 0x26a   :  { %v1326_v59 = vmul.f32 %v2001_v32, %v1314_v37 }
 0x26c   :  { %1351 = vperm.xlu1 %1993, %v1325_v28   ;;  %v1334_v48 = vmul.f32 %v1326_v59, %v1298_v47 }
 0x26e   :  { %v1338_v26 = vsub.f32 %v1330_v4, %v1334_v48 }
 0x270   :  { %1398 = vperm.xlu1 %1993, %v1336_v9  }
 0x274   :  { %1356 = vperm.xlu1 %1993, %v1326_v59  }
 0x278   :  { %1403 = vperm.xlu1 %1993, %v1337_v24  }
 0x27c   :  { %1408 = vperm.xlu1 %1993, %v1338_v26  }
 0x2dd   :  { %v1342_v53 = vpop.permute.xlu0 %1341 }
 0x2de   :  { %v1359_v56 = vmul.f32 %v1342_v53, %v3484_v39  ;;  %v1360_v27 = vmul.f32 %v1342_v53, %v3490_v0  ;;  %v1361_v61 = vmul.f32 %v1342_v53, %v3488_v55  ;;  %v1362_v36 = vmul.f32 %v1342_v53, %v3496_v10 }
 0x2df   :  { %v1363_v2 = vmul.f32 %v1342_v53, %v3564_v57  ;;  %v1364_v13 = vmul.f32 %v1342_v53, %v3571_v40  ;;  %v1365_v55 = vmul.f32 %v1342_v53, %v3569_v38  ;;  %v1366_v30 = vmul.f32 %v1342_v53, %v3575_v42 }
 0x2e3   :  { %v1347_v54 = vpop.permute.xlu1 %1346 }
 0x2e4   :  { %v1367_v23 = vmul.f32 %v1347_v54, %v3501_v50  ;;  %v1368_v22 = vmul.f32 %v1347_v54, %v3507_v52  ;;  %v1369_v43 = vmul.f32 %v1347_v54, %v3505_v7  ;;  %v1370_v40 = vmul.f32 %v1347_v54, %v3514_v60 }
 0x2e5   :  { %v1371_v50 = vmul.f32 %v1347_v54, %v3580_v46  ;;  %v1373_v42 = vmul.f32 %v1347_v54, %v3585_v49 }
 0x2e7   :  { %v1394_v62 = vpop.permute.xlu1 %1393 }
 0x2e8   :  { %v1411_v63 = vadd.f32 %v1394_v62, %v1359_v56  ;;  %v1412_v47 = vadd.f32 %v1394_v62, %v1360_v27  ;;  %v1413_v1 = vadd.f32 %v1394_v62, %v1361_v61  ;;  %v1414_v16 = vadd.f32 %v1394_v62, %v1362_v36 }
 0x2e9   :  { %v1415_v18 = vadd.f32 %v1394_v62, %v1363_v2  ;;  %v1416_v10 = vadd.f32 %v1394_v62, %v1364_v13  ;;  %v1417_v9 = vadd.f32 %v1394_v62, %v1365_v55  ;;  %v1418_v24 = vadd.f32 %v1394_v62, %v1366_v30 }
 0x2ea   :  { %v1443_v8 = vmax.f32 %v1411_v63, 0.0  ;;  %v1444_v31 = vmax.f32 %v1412_v47, 0.0  ;;  %v1445_v39 = vmax.f32 %v1413_v1, 0.0  ;;  %v1446_v57 = vmax.f32 %v1414_v16, 0.0 }
 0x2eb   :  { %v3674_v19 = vpop.permute.xlu1 %1351  ;;  %v1447_v32 = vmax.f32 %v1415_v18, 0.0  ;;  %v1448_v48 = vmax.f32 %v1416_v10, 0.0  ;;  %v1372_v56 = vmul.f32 %v1347_v54, %v3587_v51  ;;  %v1449_v27 = vmax.f32 %v1417_v9, 0.0 }
 0x2ec   :  { %v1475_v0 = vmax.f32 %v1443_v8, %v1444_v31  ;;  %v1374_v47 = vmul.f32 %v1347_v54, %v3592_v58  ;;  %v1450_v46 = vmax.f32 %v1418_v24, 0.0  ;;  %v1375_v62 = vmul.f32 %v3674_v19, %v3519_v15 }
 0x2ed   :  { %v1376_v1 = vmul.f32 %v3674_v19, %v3527_v5  ;;  %v1377_v8 = vmul.f32 %v3674_v19, %v3525_v3  ;;  %v1378_v31 = vmul.f32 %v3674_v19, %v3534_v11  ;;  %v1379_v5 = vmul.f32 %v3674_v19, %v3600_v6 }
 0x2ee   :  { %v1479_v28 = vmax.f32 %v1475_v0, %v1445_v39  ;;  %v1380_v55 = vmul.f32 %v3674_v19, %v3607_v12 }
 0x2ef   :  { %v1399_v37 = vpop.permute.xlu1 %1398 }
 0x2f0   :  { %v1483_v59 = vmax.f32 %v1479_v28, %v1446_v57  ;;  %v1419_v44 = vadd.f32 %v1399_v37, %v1367_v23  ;;  %v1420_v33 = vadd.f32 %v1399_v37, %v1368_v22  ;;  %v1421_v38 = vadd.f32 %v1399_v37, %v1369_v43 }
 0x2f1   :  { %v1422_v4 = vadd.f32 %v1399_v37, %v1370_v40  ;;  %v1423_v60 = vadd.f32 %v1399_v37, %v1371_v50  ;;  %v1424_v51 = vadd.f32 %v1399_v37, %v1372_v56  ;;  %v1425_v13 = vadd.f32 %v1399_v37, %v1373_v42 }
 0x2f2   :  { %v1487_v52 = vmax.f32 %v1483_v59, %v1447_v32  ;;  %v1451_v7 = vmax.f32 %v1419_v44, 0.0  ;;  %v1452_v26 = vmax.f32 %v1420_v33, 0.0  ;;  %v1453_v36 = vmax.f32 %v1421_v38, 0.0 }
 0x2f3   :  { %v3685_v53 = vpop.permute.xlu1 %1356  ;;  %v1454_v16 = vmax.f32 %v1422_v4, 0.0  ;;  %v1455_v18 = vmax.f32 %v1423_v60, 0.0  ;;  %v1381_v23 = vmul.f32 %v3674_v19, %v3605_v29  ;;  %v1426_v10 = vadd.f32 %v1399_v37, %v1374_v47 }
 0x2f4   :  { %v1491_v61 = vmax.f32 %v1487_v52, %v1448_v48  ;;  %v1476_v63 = vmax.f32 %v1451_v7, %v1452_v26  ;;  %v1456_v22 = vmax.f32 %v1424_v51, 0.0  ;;  %v1383_v6 = vmul.f32 %v3685_v53, %v3541_v17 }
 0x2f5   :  { %v1384_v12 = vmul.f32 %v3685_v53, %v3547_v21  ;;  %v1457_v40 = vmax.f32 %v1425_v13, 0.0  ;;  %v1385_v32 = vmul.f32 %v3685_v53, %v3545_v20  ;;  %v1458_v38 = vmax.f32 %v1426_v10, 0.0 }
 0x2f6   :  { %v1495_v2 = vmax.f32 %v1491_v61, %v1449_v27  ;;  %v1480_v49 = vmax.f32 %v1476_v63, %v1453_v36  ;;  %v1386_v24 = vmul.f32 %v3685_v53, %v3554_v45  ;;  %v1387_v26 = vmul.f32 %v3685_v53, %v3617_v25 }
 0x2f7   :  { %v1404_v58 = vpop.permute.xlu1 %1403  ;;  %v1382_v42 = vmul.f32 %v3674_v19, %v3609_v14  ;;  %v1388_v45 = vmul.f32 %v3685_v53, %v3625_v35  ;;  %v1390_v35 = vmul.f32 %v3685_v53, %v3630_v41 }
 0x2f8   :  { %v1499_v54 = vmax.f32 %v1495_v2, %v1450_v46  ;;  %v1484_v39 = vmax.f32 %v1480_v49, %v1454_v16  ;;  %v1427_v0 = vadd.f32 %v1404_v58, %v1375_v62  ;;  %v1428_v15 = vadd.f32 %v1404_v58, %v1376_v1 }
 0x2f9   :  { %v1429_v3 = vadd.f32 %v1404_v58, %v1377_v8  ;;  %v1430_v57 = vadd.f32 %v1404_v58, %v1378_v31  ;;  %v1431_v9 = vadd.f32 %v1404_v58, %v1379_v5  ;;  %v1432_v48 = vadd.f32 %v1404_v58, %v1380_v55 }
 0x2fa   :  { %v1488_v11 = vmax.f32 %v1484_v39, %v1455_v18  ;;  %v1459_v43 = vmax.f32 %v1427_v0, 0.0  ;;  %1503 = vst [vmem:[%s3736_s4] sm:$0xff] %v1499_v54  ;;  %v1460_v28 = vmax.f32 %v1428_v15, 0.0  ;;  %v1433_v60 = vadd.f32 %v1404_v58, %v1381_v23 }
 0x2fb   :  { %v1409_v30 = vpop.permute.xlu1 %1408  ;;  %v1461_v37 = vmax.f32 %v1429_v3, 0.0  ;;  %v1462_v52 = vmax.f32 %v1430_v57, 0.0  ;;  %v1463_v27 = vmax.f32 %v1431_v9, 0.0  ;;  %v1434_v46 = vadd.f32 %v1404_v58, %v1382_v42 }
 0x2fc   :  { %v1492_v29 = vmax.f32 %v1488_v11, %v1456_v22  ;;  %v1477_v59 = vmax.f32 %v1459_v43, %v1460_v28  ;;  %v1435_v44 = vadd.f32 %v1409_v30, %v1383_v6  ;;  %v1436_v33 = vadd.f32 %v1409_v30, %v1384_v12 }
 0x2fd   :  { %v1437_v17 = vadd.f32 %v1409_v30, %v1385_v32  ;;  %v1438_v56 = vadd.f32 %v1409_v30, %v1386_v24  ;;  %v1439_v36 = vadd.f32 %v1409_v30, %v1387_v26  ;;  %v1464_v25 = vmax.f32 %v1432_v48, 0.0 }
 0x2fe   :  { %v1496_v50 = vmax.f32 %v1492_v29, %v1457_v40  ;;  %v1481_v21 = vmax.f32 %v1477_v59, %v1461_v37  ;;  %v1467_v4 = vmax.f32 %v1435_v44, 0.0  ;;  %v1468_v20 = vmax.f32 %v1436_v33, 0.0 }
 0x2ff   :  { %v1469_v63 = vmax.f32 %v1437_v17, 0.0  ;;  %v1389_v1 = vmul.f32 %v3685_v53, %v3623_v34  ;;  %v1440_v14 = vadd.f32 %v1409_v30, %v1388_v45  ;;  %v1470_v19 = vmax.f32 %v1438_v56, 0.0 }
 0x300   :  { %v1500_v7 = vmax.f32 %v1496_v50, %v1458_v38  ;;  %v1485_v61 = vmax.f32 %v1481_v21, %v1462_v52  ;;  %v1478_v47 = vmax.f32 %v1467_v4, %v1468_v20  ;;  %v1465_v51 = vmax.f32 %v1433_v60, 0.0 }
 0x301   :  { %v1441_v49 = vadd.f32 %v1409_v30, %v1389_v1  ;;  %v1471_v8 = vmax.f32 %v1439_v36, 0.0  ;;  %v1466_v13 = vmax.f32 %v1434_v46, 0.0  ;;  %v1442_v54 = vadd.f32 %v1409_v30, %v1390_v35 }
 0x302   :  { %1504 = vst [vmem:[%s3736_s4 + $0x8] sm:$0xff] %v1500_v7  ;;  %v1489_v62 = vmax.f32 %v1485_v61, %v1463_v27  ;;  %v1482_v2 = vmax.f32 %v1478_v47, %v1469_v63  ;;  %v1472_v58 = vmax.f32 %v1440_v14, 0.0 }
 0x303   :  { %v1473_v15 = vmax.f32 %v1441_v49, 0.0  ;;  %v1474_v34 = vmax.f32 %v1442_v54, 0.0 }
 0x304   :  { %v1493_v16 = vmax.f32 %v1489_v62, %v1464_v25  ;;  %v1486_v31 = vmax.f32 %v1482_v2, %v1470_v19 }
 0x306   :  { %v1497_v18 = vmax.f32 %v1493_v16, %v1465_v51  ;;  %v1490_v39 = vmax.f32 %v1486_v31, %v1471_v8 }
 0x308   :  { %v1501_v0 = vmax.f32 %v1497_v18, %v1466_v13  ;;  %v1494_v5 = vmax.f32 %v1490_v39, %v1472_v58 }
 0x30a   :  { %1505 = vst [vmem:[%s3736_s4 + $0x10] sm:$0xff] %v1501_v0  ;;  %v1498_v55 = vmax.f32 %v1494_v5, %v1473_v15 }
 0x30c   :  { %v1502_v23 = vmax.f32 %v1498_v55, %v1474_v34 }
 0x30e   :  { %1506 = vst [vmem:[%s3736_s4 + $0x18] sm:$0xff] %v1502_v23 }

</bundles_post_ra>
